<compile_context>
chip_gen: v5e
topology: v5e:2x2
jax: 0.10.0
libtpu: 0.0.40
codegen_flags: <defaults>
</compile_context>

<pallas_src>
import functools

import jax
import jax.numpy as jnp
from jax import lax
from jax.experimental import pallas as pl
from jax.experimental.pallas import tpu as pltpu


def _round_up(x, m):
    return (x + m - 1) // m * m


def _pick_row_tile(n, cap=512):
    """Tile for a second-minor (sublane) dim.  Returns (tile, padded_n)."""
    if n <= cap:
        return n, n                       # block == full array dim: always legal
    for t in (512, 384, 256, 128):
        if t <= cap and n % t == 0:
            return t, n                    # no padding
    t = min(cap, 256)
    return t, _round_up(n, t)              # rare fallback: pad rows


def _pick_lane_tile(n, cap=512):
    """Tile for a minor (lane) dim: multiple of 128 or the full dim."""
    if n <= cap:
        return n, n                        # block == full array dim: always legal
    t = (cap // 128) * 128
    while t >= 128:
        if n % t == 0:
            return t, n                    # no padding (e.g. 384 for 768, 256 for 1280)
        t -= 128
    t = 256 if cap >= 256 else 128
    return t, _round_up(n, t)              # rare fallback: pad columns


# ----------------------------------------------------------------------------
# Tiled Linear (matmul + bias), with an optional zero-copy column window so the
# fused qkv weight can be consumed per-component without slicing it in HBM.
# ----------------------------------------------------------------------------
def _linear_kernel(x_ref, w_ref, b_ref, o_ref, acc_ref):
    k = pl.program_id(2)

    @pl.when(k == 0)
    def _():
        acc_ref[...] = jnp.zeros(acc_ref.shape, acc_ref.dtype)

    acc_ref[...] += jnp.dot(x_ref[...], w_ref[...],
                            preferred_element_type=jnp.float32)

    @pl.when(k == pl.num_programs(2) - 1)
    def _():
        # Bias added exactly once, at the final K step.
        o_ref[...] = (acc_ref[...] + b_ref[...]).astype(o_ref.dtype)


def linear_pallas(x, w, b, *, col_start=0, col_count=None,
                  tm_cap=512, tn_cap=512, tk_cap=1024):
    """y = x @ w[:, col_start:col_start+col_count] + b[col_start:...].

    The column window is read zero-copy (via the weight/bias index_map) when
    alignment allows; otherwise the (small) weight slice is materialized.
    """
    M, K = x.shape
    K_w, N_full = w.shape
    assert K_w == K
    N = N_full if col_count is None else col_count
    assert col_start + N <= N_full

    tm, Mp = _pick_row_tile(M, tm_cap)
    tk, Kp = _pick_lane_tile(K, tk_cap)
    tn, Np = _pick_lane_tile(N, tn_cap)

    windowed = (col_start != 0) or (N != N_full)
    zero_copy = (windowed and Np == N and Kp == K
                 and tn % 128 == 0 and col_start % tn == 0)
    if windowed and not zero_copy:
        # Rare fallback (e.g. dim not a multiple of 128): slice the weight.
        w = w[:, col_start:col_start + N]
        b = b[col_start:col_start + N]
        col_start = 0
    col_blk = (col_start // tn) if zero_copy else 0

    xp = x if (Mp == M and Kp == K) else jnp.pad(x, ((0, Mp - M), (0, Kp - K)))
    if zero_copy:
        wp, bp = w, b.reshape(1, N_full)
    else:
        wp = w if (Kp == K and Np == N) else jnp.pad(w, ((0, Kp - K), (0, Np - N)))
        bp = (b if Np == N else jnp.pad(b, (0, Np - N))).reshape(1, Np)

    grid = (Mp // tm, Np // tn, Kp // tk)
    itemsize = jnp.dtype(x.dtype).itemsize
    cost = pl.CostEstimate(
        flops=2 * Mp * Kp * Np,
        transcendentals=0,
        bytes_accessed=itemsize * (Mp * Kp * grid[1] + Kp * Np * grid[0] + Mp * Np),
    )

    out = pl.pallas_call(
        _linear_kernel,
        out_shape=jax.ShapeDtypeStruct((Mp, Np), x.dtype),
        grid_spec=pltpu.PrefetchScalarGridSpec(
            num_scalar_prefetch=0,
            grid=grid,
            in_specs=[
                pl.BlockSpec((tm, tk), lambda i, j, k: (i, k)),
                pl.BlockSpec((tk, tn), lambda i, j, k: (k, j + col_blk)),
                pl.BlockSpec((1, tn), lambda i, j, k: (0, j + col_blk)),
            ],
            out_specs=pl.BlockSpec((tm, tn), lambda i, j, k: (i, j)),
            scratch_shapes=[pltpu.VMEM((tm, tn), jnp.float32)],
        ),
        compiler_params=pltpu.CompilerParams(
            dimension_semantics=("parallel", "parallel", "arbitrary"),
            vmem_limit_bytes=40 * 1024 * 1024,  # safe on v7x's 64 MiB VMEM
        ),
        cost_estimate=cost,
    )(xp, wp, bp)
    if Mp != M or Np != N:
        out = out[:M, :N]
    return out


# ----------------------------------------------------------------------------
# Flash-style attention core.  q/k/v/out stay in (B, S, num_heads*head_dim)
# layout; heads are contiguous lane slices, so no transpose or head-dim
# padding is needed anywhere.
# ----------------------------------------------------------------------------
def _seq_tiles(S):
    """(tq, tkv, padded_S).  Prefers tiles that divide S exactly (no padding)."""
    if S <= 512:
        return S, S, S                        # single tile, no mask, no padding
    tq = next((t for t in (256, 128) if S % t == 0), None)
    tkv = next((t for t in (512, 256, 128) if S % t == 0), None)
    if tq is None or tkv is None:
        return 128, 128, _round_up(S, 128)    # rare fallback: pad + mask
    return tq, tkv, S


def _attn_kernel(q_ref, k_ref, v_ref, o_ref, m_sc, l_sc, acc_sc, *,
                 scale, num_heads, head_dim, seq_len, block_kv, mask_kv):
    j = pl.program_id(2)

    @pl.when(j == 0)
    def _():
        m_sc[...] = jnp.full(m_sc.shape, -jnp.inf, m_sc.dtype)
        l_sc[...] = jnp.zeros(l_sc.shape, l_sc.dtype)
        acc_sc[...] = jnp.zeros(acc_sc.shape, acc_sc.dtype)

    if mask_kv:
        # Only emitted on the rare padded-S fallback path; common shapes take
        # the no-padding path and pay nothing here.
        kv_idx = j * block_kv + lax.broadcasted_iota(jnp.int32, (1, block_kv), 1)
        kv_bias = jnp.where(kv_idx < seq_len, 0.0, -1e30)

    for h in range(num_heads):
        sl = slice(h * head_dim, (h + 1) * head_dim)
        q = q_ref[:, sl] * scale                           # (tq, hd)
        # (1,1)-contraction == q @ k^T, the standard transposed-RHS MXU path.
        s = lax.dot_general(q, k_ref[:, sl],
                            (((1,), (1,)), ((), ())),
                            preferred_element_type=jnp.float32)  # (tq, tkv)
        if mask_kv:
            s = s + kv_bias

        m_prev = m_sc[h]                                   # (tq, 1)
        m_new = jnp.maximum(m_prev, s.max(axis=-1, keepdims=True))
        alpha = jnp.exp(m_prev - m_new)
        p = jnp.exp(s - m_new)
        l_sc[h] = alpha * l_sc[h] + p.sum(axis=-1, keepdims=True)
        acc_sc[:, sl] = alpha * acc_sc[:, sl] + jnp.dot(
            p.astype(v_ref.dtype), v_ref[:, sl],
            preferred_element_type=jnp.float32)
        m_sc[h] = m_new

    @pl.when(j == pl.num_programs(2) - 1)
    def _():
        for h in range(num_heads):
            sl = slice(h * head_dim, (h + 1) * head_dim)
            inv = pl.reciprocal(l_sc[h], approx=True)      # EUP slot
            o_ref[:, sl] = (acc_sc[:, sl] * inv).astype(o_ref.dtype)


def attention_core_pallas(q, k, v, *, num_heads, scale):
    """q, k, v: (B, S, dim) with heads laid out as (num_heads, head_dim) along
    the last axis.  Returns concat_h softmax(scale*q_h k_h^T) v_h, (B, S, dim)."""
    B, S, dim = q.shape
    assert dim % num_heads == 0
    head_dim = dim // num_heads

    tq, tkv, Sp = _seq_tiles(S)
    mask_kv = Sp != S
    if mask_kv:
        pad = lambda a: jnp.pad(a, ((0, 0), (0, Sp - S), (0, 0)))
        q, k, v = pad(q), pad(k), pad(v)

    grid = (B, Sp // tq, Sp // tkv)
    itemsize = jnp.dtype(q.dtype).itemsize
    cost = pl.CostEstimate(
        flops=4 * B * Sp * Sp * dim,
        transcendentals=B * num_heads * Sp * Sp,
        bytes_accessed=itemsize * B * Sp * dim * (2 + 2 * grid[1]),
    )
    kernel = functools.partial(
        _attn_kernel, scale=scale, num_heads=num_heads, head_dim=head_dim,
        seq_len=S, block_kv=tkv, mask_kv=mask_kv)

    out = pl.pallas_call(
        kernel,
        out_shape=jax.ShapeDtypeStruct((B, Sp, dim), q.dtype),
        grid_spec=pltpu.PrefetchScalarGridSpec(
            num_scalar_prefetch=0,
            grid=grid,
            in_specs=[
                pl.BlockSpec((None, tq, dim), lambda b, i, j: (b, i, 0)),
                # On v5e, pipeline_mode=pl.Buffered(3) on k/v can hide more DMA;
                # default double-buffering keeps VMEM lower on v7x.
                pl.BlockSpec((None, tkv, dim), lambda b, i, j: (b, j, 0)),
                pl.BlockSpec((None, tkv, dim), lambda b, i, j: (b, j, 0)),
            ],
            out_specs=pl.BlockSpec((None, tq, dim), lambda b, i, j: (b, i, 0)),
            scratch_shapes=[
                pltpu.VMEM((num_heads, tq, 1), jnp.float32),   # running max
                pltpu.VMEM((num_heads, tq, 1), jnp.float32),   # running denom
                pltpu.VMEM((tq, dim), jnp.float32),            # output accumulator
            ],
        ),
        compiler_params=pltpu.CompilerParams(
            dimension_semantics=("parallel", "parallel", "arbitrary"),
            vmem_limit_bytes=40 * 1024 * 1024,  # fits v7x's 64 MiB VMEM
        ),
        cost_estimate=cost,
    )(q, k, v)
    if mask_kv:
        out = out[:, :S, :]
    return out


# ----------------------------------------------------------------------------
# Full module forward
# ----------------------------------------------------------------------------
def attention_forward(x, qkv_w, qkv_b, proj_w, proj_b, num_heads):
    """x: (B, H, W, dim); qkv_w: (dim, 3*dim); proj_w: (dim, dim)."""
    B, H, W, dim = x.shape
    S = H * W
    head_dim = dim // num_heads
    scale = head_dim ** (-0.5)
    x2d = x.reshape(B * S, dim)

    # qkv projection as three column windows of the fused weight (zero-copy
    # when dim is 128-aligned).  Each output is already laid out as
    # (B, S, num_heads*head_dim), so no HBM head-split/transpose is needed.
    q = linear_pallas(x2d, qkv_w, qkv_b, col_start=0 * dim, col_count=dim)
    k = linear_pallas(x2d, qkv_w, qkv_b, col_start=1 * dim, col_count=dim)
    v = linear_pallas(x2d, qkv_w, qkv_b, col_start=2 * dim, col_count=dim)
    q = q.reshape(B, S, dim)
    k = k.reshape(B, S, dim)
    v = v.reshape(B, S, dim)

    # scaled dot-product attention (flash-style Pallas kernel)
    o = attention_core_pallas(q, k, v, num_heads=num_heads, scale=scale)

    # output projection; o already has heads merged along the channel axis.
    out = linear_pallas(o.reshape(B * S, dim), proj_w, proj_b)
    return out.reshape(B, H, W, dim)


def attention_reference(x, qkv_w, qkv_b, proj_w, proj_b, num_heads):
    """Pure-JAX mirror of the PyTorch Attention.forward (use_rel_pos=False)."""
    B, H, W, dim = x.shape
    S = H * W
    hd = dim // num_heads
    scale = hd ** (-0.5)
    qkv = x.reshape(B * S, dim) @ qkv_w + qkv_b
    qkv = qkv.reshape(B, S, 3, num_heads, hd)
    qkv = jnp.transpose(qkv, (2, 0, 3, 1, 4)).reshape(3, B * num_heads, S, hd)
    q, k, v = qkv[0], qkv[1], qkv[2]
    attn = (q * scale) @ jnp.swapaxes(k, -2, -1)
    attn = jax.nn.softmax(attn, axis=-1)
    o = attn @ v
    o = o.reshape(B, num_heads, H, W, hd)
    o = jnp.transpose(o, (0, 2, 3, 1, 4)).reshape(B * S, dim)
    out = o @ proj_w + proj_b
    return out.reshape(B, H, W, dim)


if __name__ == "__main__":
    # Small shapes implied by the forward: x is (B, H, W, dim).
    B, H, W = 2, 8, 8
    dim = 32
    num_heads = 4

    key = jax.random.PRNGKey(0)
    kx, k1, k2, k3, k4 = jax.random.split(key, 5)

    x = jax.random.normal(kx, (B, H, W, dim), dtype=jnp.float32)
    bound = 1.0 / (dim ** 0.5)
    # Weights in (in, out) layout (== transposed nn.Linear weight).
    qkv_w = jax.random.uniform(k1, (dim, 3 * dim), jnp.float32, -bound, bound)
    qkv_b = jax.random.uniform(k2, (3 * dim,), jnp.float32, -bound, bound)
    proj_w = jax.random.uniform(k3, (dim, dim), jnp.float32, -bound, bound)
    proj_b = jax.random.uniform(k4, (dim,), jnp.float32, -bound, bound)

    fwd = jax.jit(functools.partial(attention_forward, num_heads=num_heads))
    out = fwd(x, qkv_w, qkv_b, proj_w, proj_b)
    out = jax.block_until_ready(out)

    ref = attention_reference(x, qkv_w, qkv_b, proj_w, proj_b, num_heads)

    assert out.shape == (B, H, W, dim)
    # Tolerance accommodates the EUP approximate reciprocal in the softmax
    # finalize (pl.reciprocal(..., approx=True)).
    assert jnp.allclose(out, ref, atol=1e-2, rtol=1e-2), \
        float(jnp.max(jnp.abs(out - ref)))

    print("KERNEL_OK")
</pallas_src>

<mosaic_0001>
module attributes {stable_mosaic.version = 11 : i64} {
  func.func @_linear_kernel(%arg0: i32, %arg1: i32, %arg2: i32, %arg3: memref<128x32xf32, #tpu.memory_space<vmem>>, %arg4: memref<32x32xf32, #tpu.memory_space<vmem>>, %arg5: memref<1x32xf32, #tpu.memory_space<vmem>>, %arg6: memref<128x32xf32, #tpu.memory_space<vmem>>, %arg7: memref<128x32xf32, #tpu.memory_space<vmem>>) attributes {dimension_semantics = [#tpu.dimension_semantics<parallel>, #tpu.dimension_semantics<parallel>, #tpu.dimension_semantics<arbitrary>], iteration_bounds = array<i64: 1, 1, 1>, scalar_prefetch = 0 : i64, scratch_operands = 1 : i64, tpu.core_type = #tpu.core_type<tc>, window_params = [{transform_indices = @transform_0, window_bounds = array<i64: 128, 32>}, {transform_indices = @transform_1, window_bounds = array<i64: 32, 32>}, {transform_indices = @transform_2, window_bounds = array<i64: 1, 32>}, {transform_indices = @transform_3, window_bounds = array<i64: 128, 32>}]} {
    %c0_i32 = arith.constant 0 : i32
    %0 = arith.cmpi eq, %arg2, %c0_i32 : i32
    %1 = arith.extui %0 : i1 to i32
    %c0_i32_0 = arith.constant 0 : i32
    %2 = arith.cmpi ne, %1, %c0_i32_0 : i32
    scf.if %2 {
      %cst_10 = arith.constant 0.000000e+00 : f32
      %12 = vector.broadcast %cst_10 : f32 to vector<128x32xf32>
      %c0_11 = arith.constant 0 : index
      %c0_12 = arith.constant 0 : index
      %13 = vector.load %arg7[%c0_11, %c0_12] : memref<128x32xf32, #tpu.memory_space<vmem>>, vector<128x32xf32>
      tpu.vector_store %arg7[%c0_11, %c0_12], %12 {strides = array<i32>} : memref<128x32xf32, #tpu.memory_space<vmem>>, vector<128x32xf32>,
    } else {
    }
    %c0 = arith.constant 0 : index
    %c0_1 = arith.constant 0 : index
    %3 = vector.load %arg7[%c0, %c0_1] : memref<128x32xf32, #tpu.memory_space<vmem>>, vector<128x32xf32>
    %c0_2 = arith.constant 0 : index
    %c0_3 = arith.constant 0 : index
    %4 = vector.load %arg3[%c0_2, %c0_3] : memref<128x32xf32, #tpu.memory_space<vmem>>, vector<128x32xf32>
    %c0_4 = arith.constant 0 : index
    %c0_5 = arith.constant 0 : index
    %5 = vector.load %arg4[%c0_4, %c0_5] : memref<32x32xf32, #tpu.memory_space<vmem>>, vector<32x32xf32>
    %cst = arith.constant dense<0.000000e+00> : vector<128x32xf32>
    %6 = tpu.matmul %4, %5, %cst {dimension_numbers = #tpu.dot_dimension_numbers<[1], [0], [0], [1], [0, 0, 1, 1], [], []>} : vector<128x32xf32>, vector<32x32xf32>, vector<128x32xf32> -> vector<128x32xf32>
    %7 = arith.addf %3, %6 : vector<128x32xf32>
    %c0_6 = arith.constant 0 : index
    %c0_7 = arith.constant 0 : index
    %8 = vector.load %arg7[%c0_6, %c0_7] : memref<128x32xf32, #tpu.memory_space<vmem>>, vector<128x32xf32>
    tpu.vector_store %arg7[%c0_6, %c0_7], %7 {strides = array<i32>} : memref<128x32xf32, #tpu.memory_space<vmem>>, vector<128x32xf32>,
    %c0_i32_8 = arith.constant 0 : i32
    %9 = arith.cmpi eq, %arg2, %c0_i32_8 : i32
    %10 = arith.extui %9 : i1 to i32
    %c0_i32_9 = arith.constant 0 : i32
    %11 = arith.cmpi ne, %10, %c0_i32_9 : i32
    scf.if %11 {
      %c0_10 = arith.constant 0 : index
      %c0_11 = arith.constant 0 : index
      %12 = vector.load %arg7[%c0_10, %c0_11] : memref<128x32xf32, #tpu.memory_space<vmem>>, vector<128x32xf32>
      %c0_12 = arith.constant 0 : index
      %c0_13 = arith.constant 0 : index
      %13 = vector.load %arg5[%c0_12, %c0_13] : memref<1x32xf32, #tpu.memory_space<vmem>>, vector<1x32xf32>
      %14 = vector.broadcast %13 : vector<1x32xf32> to vector<128x32xf32>
      %15 = arith.addf %12, %14 : vector<128x32xf32>
      %c0_14 = arith.constant 0 : index
      %c0_15 = arith.constant 0 : index
      %16 = vector.load %arg6[%c0_14, %c0_15] : memref<128x32xf32, #tpu.memory_space<vmem>>, vector<128x32xf32>
      tpu.vector_store %arg6[%c0_14, %c0_15], %15 {strides = array<i32>} : memref<128x32xf32, #tpu.memory_space<vmem>>, vector<128x32xf32>,
    } else {
    }
    return
  }
  func.func @transform_0(%arg0: i32, %arg1: i32, %arg2: i32) -> (i32, i32) {
    %c0_i32 = arith.constant 0 : i32
    return %arg0, %arg2 : i32, i32
  }
  func.func @transform_1(%arg0: i32, %arg1: i32, %arg2: i32) -> (i32, i32) {
    %c0_i32 = arith.constant 0 : i32
    %0 = arith.addi %arg1, %c0_i32 : i32
    %c0_i32_0 = arith.constant 0 : i32
    return %arg2, %0 : i32, i32
  }
  func.func @transform_2(%arg0: i32, %arg1: i32, %arg2: i32) -> (i32, i32) {
    %c0_i32 = arith.constant 0 : i32
    %0 = arith.addi %arg1, %c0_i32 : i32
    %c0_i32_0 = arith.constant 0 : i32
    %c0_i32_1 = arith.constant 0 : i32
    return %c0_i32_0, %0 : i32, i32
  }
  func.func @transform_3(%arg0: i32, %arg1: i32, %arg2: i32) -> (i32, i32) {
    %c0_i32 = arith.constant 0 : i32
    return %arg0, %arg1 : i32, i32
  }
}

module attributes {stable_mosaic.version = 11 : i64} {
  func.func @_attn_kernel(%arg0: i32, %arg1: i32, %arg2: i32, %arg3: memref<1x64x32xf32, #tpu.memory_space<vmem>>, %arg4: memref<1x64x32xf32, #tpu.memory_space<vmem>>, %arg5: memref<1x64x32xf32, #tpu.memory_space<vmem>>, %arg6: memref<1x64x32xf32, #tpu.memory_space<vmem>>, %arg7: memref<4x64x1xf32, #tpu.memory_space<vmem>>, %arg8: memref<4x64x1xf32, #tpu.memory_space<vmem>>, %arg9: memref<64x32xf32, #tpu.memory_space<vmem>>) attributes {dimension_semantics = [#tpu.dimension_semantics<parallel>, #tpu.dimension_semantics<parallel>, #tpu.dimension_semantics<arbitrary>], iteration_bounds = array<i64: 2, 1, 1>, scalar_prefetch = 0 : i64, scratch_operands = 3 : i64, tpu.core_type = #tpu.core_type<tc>, window_params = [{transform_indices = @transform_0, window_bounds = array<i64: 1, 64, 32>}, {transform_indices = @transform_1, window_bounds = array<i64: 1, 64, 32>}, {transform_indices = @transform_2, window_bounds = array<i64: 1, 64, 32>}, {transform_indices = @transform_3, window_bounds = array<i64: 1, 64, 32>}]} {
    %c0_i32 = arith.constant 0 : i32
    %0 = arith.cmpi eq, %arg2, %c0_i32 : i32
    %1 = arith.extui %0 : i1 to i32
    %c0_i32_0 = arith.constant 0 : i32
    %2 = arith.cmpi ne, %1, %c0_i32_0 : i32
    scf.if %2 {
      %cst_115 = arith.constant 0xFF800000 : f32
      %154 = vector.broadcast %cst_115 : f32 to vector<4x64x1xf32>
      %c0_116 = arith.constant 0 : index
      %c0_117 = arith.constant 0 : index
      %c0_118 = arith.constant 0 : index
      %155 = vector.load %arg7[%c0_116, %c0_117, %c0_118] : memref<4x64x1xf32, #tpu.memory_space<vmem>>, vector<4x64x1xf32>
      tpu.vector_store %arg7[%c0_116, %c0_117, %c0_118], %154 {strides = array<i32>} : memref<4x64x1xf32, #tpu.memory_space<vmem>>, vector<4x64x1xf32>,
      %cst_119 = arith.constant 0.000000e+00 : f32
      %156 = vector.broadcast %cst_119 : f32 to vector<4x64x1xf32>
      %c0_120 = arith.constant 0 : index
      %c0_121 = arith.constant 0 : index
      %c0_122 = arith.constant 0 : index
      %157 = vector.load %arg8[%c0_120, %c0_121, %c0_122] : memref<4x64x1xf32, #tpu.memory_space<vmem>>, vector<4x64x1xf32>
      tpu.vector_store %arg8[%c0_120, %c0_121, %c0_122], %156 {strides = array<i32>} : memref<4x64x1xf32, #tpu.memory_space<vmem>>, vector<4x64x1xf32>,
      %cst_123 = arith.constant 0.000000e+00 : f32
      %158 = vector.broadcast %cst_123 : f32 to vector<64x32xf32>
      %c0_124 = arith.constant 0 : index
      %c0_125 = arith.constant 0 : index
      %159 = vector.load %arg9[%c0_124, %c0_125] : memref<64x32xf32, #tpu.memory_space<vmem>>, vector<64x32xf32>
      tpu.vector_store %arg9[%c0_124, %c0_125], %158 {strides = array<i32>} : memref<64x32xf32, #tpu.memory_space<vmem>>, vector<64x32xf32>,
    } else {
    }
    %c0 = arith.constant 0 : index
    %c0_1 = arith.constant 0 : index
    %c0_2 = arith.constant 0 : index
    %3 = vector.load %arg3[%c0, %c0_1, %c0_2] : memref<1x64x32xf32, #tpu.memory_space<vmem>>, vector<1x64x8xf32>
    %4 = vector.shape_cast %3 : vector<1x64x8xf32> to vector<64x8xf32>
    %cst = arith.constant 0.353553385 : f32
    %5 = vector.broadcast %cst : f32 to vector<64x8xf32>
    %6 = arith.mulf %4, %5 : vector<64x8xf32>
    %c0_3 = arith.constant 0 : index
    %c0_4 = arith.constant 0 : index
    %c0_5 = arith.constant 0 : index
    %7 = vector.load %arg4[%c0_3, %c0_4, %c0_5] : memref<1x64x32xf32, #tpu.memory_space<vmem>>, vector<1x64x8xf32>
    %8 = vector.shape_cast %7 : vector<1x64x8xf32> to vector<64x8xf32>
    %cst_6 = arith.constant dense<0.000000e+00> : vector<64x64xf32>
    %9 = tpu.matmul %6, %8, %cst_6 {dimension_numbers = #tpu.dot_dimension_numbers<[1], [1], [0], [0], [0, 0, 1, 0], [], []>} : vector<64x8xf32>, vector<64x8xf32>, vector<64x64xf32> -> vector<64x64xf32>
    %c0_7 = arith.constant 0 : index
    %c0_8 = arith.constant 0 : index
    %c0_9 = arith.constant 0 : index
    %10 = vector.load %arg7[%c0_7, %c0_8, %c0_9] : memref<4x64x1xf32, #tpu.memory_space<vmem>>, vector<1x64x1xf32>
    %11 = vector.shape_cast %10 : vector<1x64x1xf32> to vector<64x1xf32>
    %cst_10 = arith.constant dense<0xFF800000> : vector<64xf32>
    %12 = vector.multi_reduction <maximumf>, %9, %cst_10 [1] : vector<64x64xf32> to vector<64xf32>
    %13 = vector.shape_cast %12 : vector<64xf32> to vector<64x1xf32>
    %14 = arith.maximumf %11, %13 : vector<64x1xf32>
    %15 = arith.subf %11, %14 : vector<64x1xf32>
    %16 = math.exp %15 : vector<64x1xf32>
    %17 = vector.broadcast %14 : vector<64x1xf32> to vector<64x64xf32>
    %18 = arith.subf %9, %17 : vector<64x64xf32>
    %19 = math.exp %18 : vector<64x64xf32>
    %c0_11 = arith.constant 0 : index
    %c0_12 = arith.constant 0 : index
    %c0_13 = arith.constant 0 : index
    %20 = vector.load %arg8[%c0_11, %c0_12, %c0_13] : memref<4x64x1xf32, #tpu.memory_space<vmem>>, vector<1x64x1xf32>
    %21 = vector.shape_cast %20 : vector<1x64x1xf32> to vector<64x1xf32>
    %22 = arith.mulf %16, %21 : vector<64x1xf32>
    %cst_14 = arith.constant dense<0.000000e+00> : vector<64xf32>
    %23 = vector.multi_reduction <add>, %19, %cst_14 [1] : vector<64x64xf32> to vector<64xf32>
    %24 = vector.shape_cast %23 : vector<64xf32> to vector<64x1xf32>
    %25 = arith.addf %22, %24 : vector<64x1xf32>
    %c0_15 = arith.constant 0 : index
    %c0_16 = arith.constant 0 : index
    %c0_17 = arith.constant 0 : index
    %26 = vector.load %arg8[%c0_15, %c0_16, %c0_17] : memref<4x64x1xf32, #tpu.memory_space<vmem>>, vector<1x64x1xf32>
    %27 = vector.shape_cast %26 : vector<1x64x1xf32> to vector<64x1xf32>
    %28 = vector.shape_cast %25 : vector<64x1xf32> to vector<1x64x1xf32>
    tpu.vector_store %arg8[%c0_15, %c0_16, %c0_17], %28 {strides = array<i32>} : memref<4x64x1xf32, #tpu.memory_space<vmem>>, vector<1x64x1xf32>,
    %c0_18 = arith.constant 0 : index
    %c0_19 = arith.constant 0 : index
    %29 = vector.load %arg9[%c0_18, %c0_19] : memref<64x32xf32, #tpu.memory_space<vmem>>, vector<64x8xf32>
    %30 = vector.broadcast %16 : vector<64x1xf32> to vector<64x8xf32>
    %31 = arith.mulf %30, %29 : vector<64x8xf32>
    %c0_20 = arith.constant 0 : index
    %c0_21 = arith.constant 0 : index
    %c0_22 = arith.constant 0 : index
    %32 = vector.load %arg5[%c0_20, %c0_21, %c0_22] : memref<1x64x32xf32, #tpu.memory_space<vmem>>, vector<1x64x8xf32>
    %33 = vector.shape_cast %32 : vector<1x64x8xf32> to vector<64x8xf32>
    %cst_23 = arith.constant dense<0.000000e+00> : vector<64x8xf32>
    %34 = tpu.matmul %19, %33, %cst_23 {dimension_numbers = #tpu.dot_dimension_numbers<[1], [0], [0], [1], [0, 0, 1, 1], [], []>} : vector<64x64xf32>, vector<64x8xf32>, vector<64x8xf32> -> vector<64x8xf32>
    %35 = arith.addf %31, %34 : vector<64x8xf32>
    %c0_24 = arith.constant 0 : index
    %c0_25 = arith.constant 0 : index
    %36 = vector.load %arg9[%c0_24, %c0_25] : memref<64x32xf32, #tpu.memory_space<vmem>>, vector<64x8xf32>
    tpu.vector_store %arg9[%c0_24, %c0_25], %35 {strides = array<i32>} : memref<64x32xf32, #tpu.memory_space<vmem>>, vector<64x8xf32>,
    %c0_26 = arith.constant 0 : index
    %c0_27 = arith.constant 0 : index
    %c0_28 = arith.constant 0 : index
    %37 = vector.load %arg7[%c0_26, %c0_27, %c0_28] : memref<4x64x1xf32, #tpu.memory_space<vmem>>, vector<1x64x1xf32>
    %38 = vector.shape_cast %37 : vector<1x64x1xf32> to vector<64x1xf32>
    %39 = vector.shape_cast %14 : vector<64x1xf32> to vector<1x64x1xf32>
    tpu.vector_store %arg7[%c0_26, %c0_27, %c0_28], %39 {strides = array<i32>} : memref<4x64x1xf32, #tpu.memory_space<vmem>>, vector<1x64x1xf32>,
    %c0_29 = arith.constant 0 : index
    %c0_30 = arith.constant 0 : index
    %c8 = arith.constant 8 : index
    %40 = vector.load %arg3[%c0_29, %c0_30, %c8] : memref<1x64x32xf32, #tpu.memory_space<vmem>>, vector<1x64x8xf32>
    %41 = vector.shape_cast %40 : vector<1x64x8xf32> to vector<64x8xf32>
    %cst_31 = arith.constant 0.353553385 : f32
    %42 = vector.broadcast %cst_31 : f32 to vector<64x8xf32>
    %43 = arith.mulf %41, %42 : vector<64x8xf32>
    %c0_32 = arith.constant 0 : index
    %c0_33 = arith.constant 0 : index
    %c8_34 = arith.constant 8 : index
    %44 = vector.load %arg4[%c0_32, %c0_33, %c8_34] : memref<1x64x32xf32, #tpu.memory_space<vmem>>, vector<1x64x8xf32>
    %45 = vector.shape_cast %44 : vector<1x64x8xf32> to vector<64x8xf32>
    %cst_35 = arith.constant dense<0.000000e+00> : vector<64x64xf32>
    %46 = tpu.matmul %43, %45, %cst_35 {dimension_numbers = #tpu.dot_dimension_numbers<[1], [1], [0], [0], [0, 0, 1, 0], [], []>} : vector<64x8xf32>, vector<64x8xf32>, vector<64x64xf32> -> vector<64x64xf32>
    %c1 = arith.constant 1 : index
    %c0_36 = arith.constant 0 : index
    %c0_37 = arith.constant 0 : index
    %47 = vector.load %arg7[%c1, %c0_36, %c0_37] : memref<4x64x1xf32, #tpu.memory_space<vmem>>, vector<1x64x1xf32>
    %48 = vector.shape_cast %47 : vector<1x64x1xf32> to vector<64x1xf32>
    %cst_38 = arith.constant dense<0xFF800000> : vector<64xf32>
    %49 = vector.multi_reduction <maximumf>, %46, %cst_38 [1] : vector<64x64xf32> to vector<64xf32>
    %50 = vector.shape_cast %49 : vector<64xf32> to vector<64x1xf32>
    %51 = arith.maximumf %48, %50 : vector<64x1xf32>
    %52 = arith.subf %48, %51 : vector<64x1xf32>
    %53 = math.exp %52 : vector<64x1xf32>
    %54 = vector.broadcast %51 : vector<64x1xf32> to vector<64x64xf32>
    %55 = arith.subf %46, %54 : vector<64x64xf32>
    %56 = math.exp %55 : vector<64x64xf32>
    %c1_39 = arith.constant 1 : index
    %c0_40 = arith.constant 0 : index
    %c0_41 = arith.constant 0 : index
    %57 = vector.load %arg8[%c1_39, %c0_40, %c0_41] : memref<4x64x1xf32, #tpu.memory_space<vmem>>, vector<1x64x1xf32>
    %58 = vector.shape_cast %57 : vector<1x64x1xf32> to vector<64x1xf32>
    %59 = arith.mulf %53, %58 : vector<64x1xf32>
    %cst_42 = arith.constant dense<0.000000e+00> : vector<64xf32>
    %60 = vector.multi_reduction <add>, %56, %cst_42 [1] : vector<64x64xf32> to vector<64xf32>
    %61 = vector.shape_cast %60 : vector<64xf32> to vector<64x1xf32>
    %62 = arith.addf %59, %61 : vector<64x1xf32>
    %c1_43 = arith.constant 1 : index
    %c0_44 = arith.constant 0 : index
    %c0_45 = arith.constant 0 : index
    %63 = vector.load %arg8[%c1_43, %c0_44, %c0_45] : memref<4x64x1xf32, #tpu.memory_space<vmem>>, vector<1x64x1xf32>
    %64 = vector.shape_cast %63 : vector<1x64x1xf32> to vector<64x1xf32>
    %65 = vector.shape_cast %62 : vector<64x1xf32> to vector<1x64x1xf32>
    tpu.vector_store %arg8[%c1_43, %c0_44, %c0_45], %65 {strides = array<i32>} : memref<4x64x1xf32, #tpu.memory_space<vmem>>, vector<1x64x1xf32>,
    %c0_46 = arith.constant 0 : index
    %c8_47 = arith.constant 8 : index
    %66 = vector.load %arg9[%c0_46, %c8_47] : memref<64x32xf32, #tpu.memory_space<vmem>>, vector<64x8xf32>
    %67 = vector.broadcast %53 : vector<64x1xf32> to vector<64x8xf32>
    %68 = arith.mulf %67, %66 : vector<64x8xf32>
    %c0_48 = arith.constant 0 : index
    %c0_49 = arith.constant 0 : index
    %c8_50 = arith.constant 8 : index
    %69 = vector.load %arg5[%c0_48, %c0_49, %c8_50] : memref<1x64x32xf32, #tpu.memory_space<vmem>>, vector<1x64x8xf32>
    %70 = vector.shape_cast %69 : vector<1x64x8xf32> to vector<64x8xf32>
    %cst_51 = arith.constant dense<0.000000e+00> : vector<64x8xf32>
    %71 = tpu.matmul %56, %70, %cst_51 {dimension_numbers = #tpu.dot_dimension_numbers<[1], [0], [0], [1], [0, 0, 1, 1], [], []>} : vector<64x64xf32>, vector<64x8xf32>, vector<64x8xf32> -> vector<64x8xf32>
    %72 = arith.addf %68, %71 : vector<64x8xf32>
    %c0_52 = arith.constant 0 : index
    %c8_53 = arith.constant 8 : index
    %73 = vector.load %arg9[%c0_52, %c8_53] : memref<64x32xf32, #tpu.memory_space<vmem>>, vector<64x8xf32>
    tpu.vector_store %arg9[%c0_52, %c8_53], %72 {strides = array<i32>} : memref<64x32xf32, #tpu.memory_space<vmem>>, vector<64x8xf32>,
    %c1_54 = arith.constant 1 : index
    %c0_55 = arith.constant 0 : index
    %c0_56 = arith.constant 0 : index
    %74 = vector.load %arg7[%c1_54, %c0_55, %c0_56] : memref<4x64x1xf32, #tpu.memory_space<vmem>>, vector<1x64x1xf32>
    %75 = vector.shape_cast %74 : vector<1x64x1xf32> to vector<64x1xf32>
    %76 = vector.shape_cast %51 : vector<64x1xf32> to vector<1x64x1xf32>
    tpu.vector_store %arg7[%c1_54, %c0_55, %c0_56], %76 {strides = array<i32>} : memref<4x64x1xf32, #tpu.memory_space<vmem>>, vector<1x64x1xf32>,
    %c0_57 = arith.constant 0 : index
    %c0_58 = arith.constant 0 : index
    %c16 = arith.constant 16 : index
    %77 = vector.load %arg3[%c0_57, %c0_58, %c16] : memref<1x64x32xf32, #tpu.memory_space<vmem>>, vector<1x64x8xf32>
    %78 = vector.shape_cast %77 : vector<1x64x8xf32> to vector<64x8xf32>
    %cst_59 = arith.constant 0.353553385 : f32
    %79 = vector.broadcast %cst_59 : f32 to vector<64x8xf32>
    %80 = arith.mulf %78, %79 : vector<64x8xf32>
    %c0_60 = arith.constant 0 : index
    %c0_61 = arith.constant 0 : index
    %c16_62 = arith.constant 16 : index
    %81 = vector.load %arg4[%c0_60, %c0_61, %c16_62] : memref<1x64x32xf32, #tpu.memory_space<vmem>>, vector<1x64x8xf32>
    %82 = vector.shape_cast %81 : vector<1x64x8xf32> to vector<64x8xf32>
    %cst_63 = arith.constant dense<0.000000e+00> : vector<64x64xf32>
    %83 = tpu.matmul %80, %82, %cst_63 {dimension_numbers = #tpu.dot_dimension_numbers<[1], [1], [0], [0], [0, 0, 1, 0], [], []>} : vector<64x8xf32>, vector<64x8xf32>, vector<64x64xf32> -> vector<64x64xf32>
    %c2 = arith.constant 2 : index
    %c0_64 = arith.constant 0 : index
    %c0_65 = arith.constant 0 : index
    %84 = vector.load %arg7[%c2, %c0_64, %c0_65] : memref<4x64x1xf32, #tpu.memory_space<vmem>>, vector<1x64x1xf32>
    %85 = vector.shape_cast %84 : vector<1x64x1xf32> to vector<64x1xf32>
    %cst_66 = arith.constant dense<0xFF800000> : vector<64xf32>
    %86 = vector.multi_reduction <maximumf>, %83, %cst_66 [1] : vector<64x64xf32> to vector<64xf32>
    %87 = vector.shape_cast %86 : vector<64xf32> to vector<64x1xf32>
    %88 = arith.maximumf %85, %87 : vector<64x1xf32>
    %89 = arith.subf %85, %88 : vector<64x1xf32>
    %90 = math.exp %89 : vector<64x1xf32>
    %91 = vector.broadcast %88 : vector<64x1xf32> to vector<64x64xf32>
    %92 = arith.subf %83, %91 : vector<64x64xf32>
    %93 = math.exp %92 : vector<64x64xf32>
    %c2_67 = arith.constant 2 : index
    %c0_68 = arith.constant 0 : index
    %c0_69 = arith.constant 0 : index
    %94 = vector.load %arg8[%c2_67, %c0_68, %c0_69] : memref<4x64x1xf32, #tpu.memory_space<vmem>>, vector<1x64x1xf32>
    %95 = vector.shape_cast %94 : vector<1x64x1xf32> to vector<64x1xf32>
    %96 = arith.mulf %90, %95 : vector<64x1xf32>
    %cst_70 = arith.constant dense<0.000000e+00> : vector<64xf32>
    %97 = vector.multi_reduction <add>, %93, %cst_70 [1] : vector<64x64xf32> to vector<64xf32>
    %98 = vector.shape_cast %97 : vector<64xf32> to vector<64x1xf32>
    %99 = arith.addf %96, %98 : vector<64x1xf32>
    %c2_71 = arith.constant 2 : index
    %c0_72 = arith.constant 0 : index
    %c0_73 = arith.constant 0 : index
    %100 = vector.load %arg8[%c2_71, %c0_72, %c0_73] : memref<4x64x1xf32, #tpu.memory_space<vmem>>, vector<1x64x1xf32>
    %101 = vector.shape_cast %100 : vector<1x64x1xf32> to vector<64x1xf32>
    %102 = vector.shape_cast %99 : vector<64x1xf32> to vector<1x64x1xf32>
    tpu.vector_store %arg8[%c2_71, %c0_72, %c0_73], %102 {strides = array<i32>} : memref<4x64x1xf32, #tpu.memory_space<vmem>>, vector<1x64x1xf32>,
    %c0_74 = arith.constant 0 : index
    %c16_75 = arith.constant 16 : index
    %103 = vector.load %arg9[%c0_74, %c16_75] : memref<64x32xf32, #tpu.memory_space<vmem>>, vector<64x8xf32>
    %104 = vector.broadcast %90 : vector<64x1xf32> to vector<64x8xf32>
    %105 = arith.mulf %104, %103 : vector<64x8xf32>
    %c0_76 = arith.constant 0 : index
    %c0_77 = arith.constant 0 : index
    %c16_78 = arith.constant 16 : index
    %106 = vector.load %arg5[%c0_76, %c0_77, %c16_78] : memref<1x64x32xf32, #tpu.memory_space<vmem>>, vector<1x64x8xf32>
    %107 = vector.shape_cast %106 : vector<1x64x8xf32> to vector<64x8xf32>
    %cst_79 = arith.constant dense<0.000000e+00> : vector<64x8xf32>
    %108 = tpu.matmul %93, %107, %cst_79 {dimension_numbers = #tpu.dot_dimension_numbers<[1], [0], [0], [1], [0, 0, 1, 1], [], []>} : vector<64x64xf32>, vector<64x8xf32>, vector<64x8xf32> -> vector<64x8xf32>
    %109 = arith.addf %105, %108 : vector<64x8xf32>
    %c0_80 = arith.constant 0 : index
    %c16_81 = arith.constant 16 : index
    %110 = vector.load %arg9[%c0_80, %c16_81] : memref<64x32xf32, #tpu.memory_space<vmem>>, vector<64x8xf32>
    tpu.vector_store %arg9[%c0_80, %c16_81], %109 {strides = array<i32>} : memref<64x32xf32, #tpu.memory_space<vmem>>, vector<64x8xf32>,
    %c2_82 = arith.constant 2 : index
    %c0_83 = arith.constant 0 : index
    %c0_84 = arith.constant 0 : index
    %111 = vector.load %arg7[%c2_82, %c0_83, %c0_84] : memref<4x64x1xf32, #tpu.memory_space<vmem>>, vector<1x64x1xf32>
    %112 = vector.shape_cast %111 : vector<1x64x1xf32> to vector<64x1xf32>
    %113 = vector.shape_cast %88 : vector<64x1xf32> to vector<1x64x1xf32>
    tpu.vector_store %arg7[%c2_82, %c0_83, %c0_84], %113 {strides = array<i32>} : memref<4x64x1xf32, #tpu.memory_space<vmem>>, vector<1x64x1xf32>,
    %c0_85 = arith.constant 0 : index
    %c0_86 = arith.constant 0 : index
    %c24 = arith.constant 24 : index
    %114 = vector.load %arg3[%c0_85, %c0_86, %c24] : memref<1x64x32xf32, #tpu.memory_space<vmem>>, vector<1x64x8xf32>
    %115 = vector.shape_cast %114 : vector<1x64x8xf32> to vector<64x8xf32>
    %cst_87 = arith.constant 0.353553385 : f32
    %116 = vector.broadcast %cst_87 : f32 to vector<64x8xf32>
    %117 = arith.mulf %115, %116 : vector<64x8xf32>
    %c0_88 = arith.constant 0 : index
    %c0_89 = arith.constant 0 : index
    %c24_90 = arith.constant 24 : index
    %118 = vector.load %arg4[%c0_88, %c0_89, %c24_90] : memref<1x64x32xf32, #tpu.memory_space<vmem>>, vector<1x64x8xf32>
    %119 = vector.shape_cast %118 : vector<1x64x8xf32> to vector<64x8xf32>
    %cst_91 = arith.constant dense<0.000000e+00> : vector<64x64xf32>
    %120 = tpu.matmul %117, %119, %cst_91 {dimension_numbers = #tpu.dot_dimension_numbers<[1], [1], [0], [0], [0, 0, 1, 0], [], []>} : vector<64x8xf32>, vector<64x8xf32>, vector<64x64xf32> -> vector<64x64xf32>
    %c3 = arith.constant 3 : index
    %c0_92 = arith.constant 0 : index
    %c0_93 = arith.constant 0 : index
    %121 = vector.load %arg7[%c3, %c0_92, %c0_93] : memref<4x64x1xf32, #tpu.memory_space<vmem>>, vector<1x64x1xf32>
    %122 = vector.shape_cast %121 : vector<1x64x1xf32> to vector<64x1xf32>
    %cst_94 = arith.constant dense<0xFF800000> : vector<64xf32>
    %123 = vector.multi_reduction <maximumf>, %120, %cst_94 [1] : vector<64x64xf32> to vector<64xf32>
    %124 = vector.shape_cast %123 : vector<64xf32> to vector<64x1xf32>
    %125 = arith.maximumf %122, %124 : vector<64x1xf32>
    %126 = arith.subf %122, %125 : vector<64x1xf32>
    %127 = math.exp %126 : vector<64x1xf32>
    %128 = vector.broadcast %125 : vector<64x1xf32> to vector<64x64xf32>
    %129 = arith.subf %120, %128 : vector<64x64xf32>
    %130 = math.exp %129 : vector<64x64xf32>
    %c3_95 = arith.constant 3 : index
    %c0_96 = arith.constant 0 : index
    %c0_97 = arith.constant 0 : index
    %131 = vector.load %arg8[%c3_95, %c0_96, %c0_97] : memref<4x64x1xf32, #tpu.memory_space<vmem>>, vector<1x64x1xf32>
    %132 = vector.shape_cast %131 : vector<1x64x1xf32> to vector<64x1xf32>
    %133 = arith.mulf %127, %132 : vector<64x1xf32>
    %cst_98 = arith.constant dense<0.000000e+00> : vector<64xf32>
    %134 = vector.multi_reduction <add>, %130, %cst_98 [1] : vector<64x64xf32> to vector<64xf32>
    %135 = vector.shape_cast %134 : vector<64xf32> to vector<64x1xf32>
    %136 = arith.addf %133, %135 : vector<64x1xf32>
    %c3_99 = arith.constant 3 : index
    %c0_100 = arith.constant 0 : index
    %c0_101 = arith.constant 0 : index
    %137 = vector.load %arg8[%c3_99, %c0_100, %c0_101] : memref<4x64x1xf32, #tpu.memory_space<vmem>>, vector<1x64x1xf32>
    %138 = vector.shape_cast %137 : vector<1x64x1xf32> to vector<64x1xf32>
    %139 = vector.shape_cast %136 : vector<64x1xf32> to vector<1x64x1xf32>
    tpu.vector_store %arg8[%c3_99, %c0_100, %c0_101], %139 {strides = array<i32>} : memref<4x64x1xf32, #tpu.memory_space<vmem>>, vector<1x64x1xf32>,
    %c0_102 = arith.constant 0 : index
    %c24_103 = arith.constant 24 : index
    %140 = vector.load %arg9[%c0_102, %c24_103] : memref<64x32xf32, #tpu.memory_space<vmem>>, vector<64x8xf32>
    %141 = vector.broadcast %127 : vector<64x1xf32> to vector<64x8xf32>
    %142 = arith.mulf %141, %140 : vector<64x8xf32>
    %c0_104 = arith.constant 0 : index
    %c0_105 = arith.constant 0 : index
    %c24_106 = arith.constant 24 : index
    %143 = vector.load %arg5[%c0_104, %c0_105, %c24_106] : memref<1x64x32xf32, #tpu.memory_space<vmem>>, vector<1x64x8xf32>
    %144 = vector.shape_cast %143 : vector<1x64x8xf32> to vector<64x8xf32>
    %cst_107 = arith.constant dense<0.000000e+00> : vector<64x8xf32>
    %145 = tpu.matmul %130, %144, %cst_107 {dimension_numbers = #tpu.dot_dimension_numbers<[1], [0], [0], [1], [0, 0, 1, 1], [], []>} : vector<64x64xf32>, vector<64x8xf32>, vector<64x8xf32> -> vector<64x8xf32>
    %146 = arith.addf %142, %145 : vector<64x8xf32>
    %c0_108 = arith.constant 0 : index
    %c24_109 = arith.constant 24 : index
    %147 = vector.load %arg9[%c0_108, %c24_109] : memref<64x32xf32, #tpu.memory_space<vmem>>, vector<64x8xf32>
    tpu.vector_store %arg9[%c0_108, %c24_109], %146 {strides = array<i32>} : memref<64x32xf32, #tpu.memory_space<vmem>>, vector<64x8xf32>,
    %c3_110 = arith.constant 3 : index
    %c0_111 = arith.constant 0 : index
    %c0_112 = arith.constant 0 : index
    %148 = vector.load %arg7[%c3_110, %c0_111, %c0_112] : memref<4x64x1xf32, #tpu.memory_space<vmem>>, vector<1x64x1xf32>
    %149 = vector.shape_cast %148 : vector<1x64x1xf32> to vector<64x1xf32>
    %150 = vector.shape_cast %125 : vector<64x1xf32> to vector<1x64x1xf32>
    tpu.vector_store %arg7[%c3_110, %c0_111, %c0_112], %150 {strides = array<i32>} : memref<4x64x1xf32, #tpu.memory_space<vmem>>, vector<1x64x1xf32>,
    %c0_i32_113 = arith.constant 0 : i32
    %151 = arith.cmpi eq, %arg2, %c0_i32_113 : i32
    %152 = arith.extui %151 : i1 to i32
    %c0_i32_114 = arith.constant 0 : i32
    %153 = arith.cmpi ne, %152, %c0_i32_114 : i32
    scf.if %153 {
      %c0_115 = arith.constant 0 : index
      %c0_116 = arith.constant 0 : index
      %c0_117 = arith.constant 0 : index
      %154 = vector.load %arg8[%c0_115, %c0_116, %c0_117] : memref<4x64x1xf32, #tpu.memory_space<vmem>>, vector<1x64x1xf32>
      %155 = vector.shape_cast %154 : vector<1x64x1xf32> to vector<64x1xf32>
      %156 = tpu.reciprocal %155 {approx = true} : vector<64x1xf32> -> vector<64x1xf32>
      %c0_118 = arith.constant 0 : index
      %c0_119 = arith.constant 0 : index
      %157 = vector.load %arg9[%c0_118, %c0_119] : memref<64x32xf32, #tpu.memory_space<vmem>>, vector<64x8xf32>
      %158 = vector.broadcast %156 : vector<64x1xf32> to vector<64x8xf32>
      %159 = arith.mulf %157, %158 : vector<64x8xf32>
      %c0_120 = arith.constant 0 : index
      %c0_121 = arith.constant 0 : index
      %c0_122 = arith.constant 0 : index
      %160 = vector.load %arg6[%c0_120, %c0_121, %c0_122] : memref<1x64x32xf32, #tpu.memory_space<vmem>>, vector<1x64x8xf32>
      %161 = vector.shape_cast %160 : vector<1x64x8xf32> to vector<64x8xf32>
      %162 = vector.shape_cast %159 : vector<64x8xf32> to vector<1x64x8xf32>
      tpu.vector_store %arg6[%c0_120, %c0_121, %c0_122], %162 {strides = array<i32>} : memref<1x64x32xf32, #tpu.memory_space<vmem>>, vector<1x64x8xf32>,
      %c1_123 = arith.constant 1 : index
      %c0_124 = arith.constant 0 : index
      %c0_125 = arith.constant 0 : index
      %163 = vector.load %arg8[%c1_123, %c0_124, %c0_125] : memref<4x64x1xf32, #tpu.memory_space<vmem>>, vector<1x64x1xf32>
      %164 = vector.shape_cast %163 : vector<1x64x1xf32> to vector<64x1xf32>
      %165 = tpu.reciprocal %164 {approx = true} : vector<64x1xf32> -> vector<64x1xf32>
      %c0_126 = arith.constant 0 : index
      %c8_127 = arith.constant 8 : index
      %166 = vector.load %arg9[%c0_126, %c8_127] : memref<64x32xf32, #tpu.memory_space<vmem>>, vector<64x8xf32>
      %167 = vector.broadcast %165 : vector<64x1xf32> to vector<64x8xf32>
      %168 = arith.mulf %166, %167 : vector<64x8xf32>
      %c0_128 = arith.constant 0 : index
      %c0_129 = arith.constant 0 : index
      %c8_130 = arith.constant 8 : index
      %169 = vector.load %arg6[%c0_128, %c0_129, %c8_130] : memref<1x64x32xf32, #tpu.memory_space<vmem>>, vector<1x64x8xf32>
      %170 = vector.shape_cast %169 : vector<1x64x8xf32> to vector<64x8xf32>
      %171 = vector.shape_cast %168 : vector<64x8xf32> to vector<1x64x8xf32>
      tpu.vector_store %arg6[%c0_128, %c0_129, %c8_130], %171 {strides = array<i32>} : memref<1x64x32xf32, #tpu.memory_space<vmem>>, vector<1x64x8xf32>,
      %c2_131 = arith.constant 2 : index
      %c0_132 = arith.constant 0 : index
      %c0_133 = arith.constant 0 : index
      %172 = vector.load %arg8[%c2_131, %c0_132, %c0_133] : memref<4x64x1xf32, #tpu.memory_space<vmem>>, vector<1x64x1xf32>
      %173 = vector.shape_cast %172 : vector<1x64x1xf32> to vector<64x1xf32>
      %174 = tpu.reciprocal %173 {approx = true} : vector<64x1xf32> -> vector<64x1xf32>
      %c0_134 = arith.constant 0 : index
      %c16_135 = arith.constant 16 : index
      %175 = vector.load %arg9[%c0_134, %c16_135] : memref<64x32xf32, #tpu.memory_space<vmem>>, vector<64x8xf32>
      %176 = vector.broadcast %174 : vector<64x1xf32> to vector<64x8xf32>
      %177 = arith.mulf %175, %176 : vector<64x8xf32>
      %c0_136 = arith.constant 0 : index
      %c0_137 = arith.constant 0 : index
      %c16_138 = arith.constant 16 : index
      %178 = vector.load %arg6[%c0_136, %c0_137, %c16_138] : memref<1x64x32xf32, #tpu.memory_space<vmem>>, vector<1x64x8xf32>
      %179 = vector.shape_cast %178 : vector<1x64x8xf32> to vector<64x8xf32>
      %180 = vector.shape_cast %177 : vector<64x8xf32> to vector<1x64x8xf32>
      tpu.vector_store %arg6[%c0_136, %c0_137, %c16_138], %180 {strides = array<i32>} : memref<1x64x32xf32, #tpu.memory_space<vmem>>, vector<1x64x8xf32>,
      %c3_139 = arith.constant 3 : index
      %c0_140 = arith.constant 0 : index
      %c0_141 = arith.constant 0 : index
      %181 = vector.load %arg8[%c3_139, %c0_140, %c0_141] : memref<4x64x1xf32, #tpu.memory_space<vmem>>, vector<1x64x1xf32>
      %182 = vector.shape_cast %181 : vector<1x64x1xf32> to vector<64x1xf32>
      %183 = tpu.reciprocal %182 {approx = true} : vector<64x1xf32> -> vector<64x1xf32>
      %c0_142 = arith.constant 0 : index
      %c24_143 = arith.constant 24 : index
      %184 = vector.load %arg9[%c0_142, %c24_143] : memref<64x32xf32, #tpu.memory_space<vmem>>, vector<64x8xf32>
      %185 = vector.broadcast %183 : vector<64x1xf32> to vector<64x8xf32>
      %186 = arith.mulf %184, %185 : vector<64x8xf32>
      %c0_144 = arith.constant 0 : index
      %c0_145 = arith.constant 0 : index
      %c24_146 = arith.constant 24 : index
      %187 = vector.load %arg6[%c0_144, %c0_145, %c24_146] : memref<1x64x32xf32, #tpu.memory_space<vmem>>, vector<1x64x8xf32>
      %188 = vector.shape_cast %187 : vector<1x64x8xf32> to vector<64x8xf32>
      %189 = vector.shape_cast %186 : vector<64x8xf32> to vector<1x64x8xf32>
      tpu.vector_store %arg6[%c0_144, %c0_145, %c24_146], %189 {strides = array<i32>} : memref<1x64x32xf32, #tpu.memory_space<vmem>>, vector<1x64x8xf32>,
    } else {
    }
    return
  }
  func.func @transform_0(%arg0: i32, %arg1: i32, %arg2: i32) -> (i32, i32, i32) {
    %c0_i32 = arith.constant 0 : i32
    %c0_i32_0 = arith.constant 0 : i32
    return %arg0, %arg1, %c0_i32 : i32, i32, i32
  }
  func.func @transform_1(%arg0: i32, %arg1: i32, %arg2: i32) -> (i32, i32, i32) {
    %c0_i32 = arith.constant 0 : i32
    %c0_i32_0 = arith.constant 0 : i32
    return %arg0, %arg2, %c0_i32 : i32, i32, i32
  }
  func.func @transform_2(%arg0: i32, %arg1: i32, %arg2: i32) -> (i32, i32, i32) {
    %c0_i32 = arith.constant 0 : i32
    %c0_i32_0 = arith.constant 0 : i32
    return %arg0, %arg2, %c0_i32 : i32, i32, i32
  }
  func.func @transform_3(%arg0: i32, %arg1: i32, %arg2: i32) -> (i32, i32, i32) {
    %c0_i32 = arith.constant 0 : i32
    %c0_i32_0 = arith.constant 0 : i32
    return %arg0, %arg1, %c0_i32 : i32, i32, i32
  }
}

module attributes {stable_mosaic.version = 11 : i64} {
  func.func @_linear_kernel(%arg0: i32, %arg1: i32, %arg2: i32, %arg3: memref<128x32xf32, #tpu.memory_space<vmem>>, %arg4: memref<32x32xf32, #tpu.memory_space<vmem>>, %arg5: memref<1x32xf32, #tpu.memory_space<vmem>>, %arg6: memref<128x32xf32, #tpu.memory_space<vmem>>, %arg7: memref<128x32xf32, #tpu.memory_space<vmem>>) attributes {dimension_semantics = [#tpu.dimension_semantics<parallel>, #tpu.dimension_semantics<parallel>, #tpu.dimension_semantics<arbitrary>], iteration_bounds = array<i64: 1, 1, 1>, scalar_prefetch = 0 : i64, scratch_operands = 1 : i64, tpu.core_type = #tpu.core_type<tc>, window_params = [{transform_indices = @transform_0, window_bounds = array<i64: 128, 32>}, {transform_indices = @transform_1, window_bounds = array<i64: 32, 32>}, {transform_indices = @transform_2, window_bounds = array<i64: 1, 32>}, {transform_indices = @transform_3, window_bounds = array<i64: 128, 32>}]} {
    %c0_i32 = arith.constant 0 : i32
    %0 = arith.cmpi eq, %arg2, %c0_i32 : i32
    %1 = arith.extui %0 : i1 to i32
    %c0_i32_0 = arith.constant 0 : i32
    %2 = arith.cmpi ne, %1, %c0_i32_0 : i32
    scf.if %2 {
      %cst_10 = arith.constant 0.000000e+00 : f32
      %12 = vector.broadcast %cst_10 : f32 to vector<128x32xf32>
      %c0_11 = arith.constant 0 : index
      %c0_12 = arith.constant 0 : index
      %13 = vector.load %arg7[%c0_11, %c0_12] : memref<128x32xf32, #tpu.memory_space<vmem>>, vector<128x32xf32>
      tpu.vector_store %arg7[%c0_11, %c0_12], %12 {strides = array<i32>} : memref<128x32xf32, #tpu.memory_space<vmem>>, vector<128x32xf32>,
    } else {
    }
    %c0 = arith.constant 0 : index
    %c0_1 = arith.constant 0 : index
    %3 = vector.load %arg7[%c0, %c0_1] : memref<128x32xf32, #tpu.memory_space<vmem>>, vector<128x32xf32>
    %c0_2 = arith.constant 0 : index
    %c0_3 = arith.constant 0 : index
    %4 = vector.load %arg3[%c0_2, %c0_3] : memref<128x32xf32, #tpu.memory_space<vmem>>, vector<128x32xf32>
    %c0_4 = arith.constant 0 : index
    %c0_5 = arith.constant 0 : index
    %5 = vector.load %arg4[%c0_4, %c0_5] : memref<32x32xf32, #tpu.memory_space<vmem>>, vector<32x32xf32>
    %cst = arith.constant dense<0.000000e+00> : vector<128x32xf32>
    %6 = tpu.matmul %4, %5, %cst {dimension_numbers = #tpu.dot_dimension_numbers<[1], [0], [0], [1], [0, 0, 1, 1], [], []>} : vector<128x32xf32>, vector<32x32xf32>, vector<128x32xf32> -> vector<128x32xf32>
    %7 = arith.addf %3, %6 : vector<128x32xf32>
    %c0_6 = arith.constant 0 : index
    %c0_7 = arith.constant 0 : index
    %8 = vector.load %arg7[%c0_6, %c0_7] : memref<128x32xf32, #tpu.memory_space<vmem>>, vector<128x32xf32>
    tpu.vector_store %arg7[%c0_6, %c0_7], %7 {strides = array<i32>} : memref<128x32xf32, #tpu.memory_space<vmem>>, vector<128x32xf32>,
    %c0_i32_8 = arith.constant 0 : i32
    %9 = arith.cmpi eq, %arg2, %c0_i32_8 : i32
    %10 = arith.extui %9 : i1 to i32
    %c0_i32_9 = arith.constant 0 : i32
    %11 = arith.cmpi ne, %10, %c0_i32_9 : i32
    scf.if %11 {
      %c0_10 = arith.constant 0 : index
      %c0_11 = arith.constant 0 : index
      %12 = vector.load %arg7[%c0_10, %c0_11] : memref<128x32xf32, #tpu.memory_space<vmem>>, vector<128x32xf32>
      %c0_12 = arith.constant 0 : index
      %c0_13 = arith.constant 0 : index
      %13 = vector.load %arg5[%c0_12, %c0_13] : memref<1x32xf32, #tpu.memory_space<vmem>>, vector<1x32xf32>
      %14 = vector.broadcast %13 : vector<1x32xf32> to vector<128x32xf32>
      %15 = arith.addf %12, %14 : vector<128x32xf32>
      %c0_14 = arith.constant 0 : index
      %c0_15 = arith.constant 0 : index
      %16 = vector.load %arg6[%c0_14, %c0_15] : memref<128x32xf32, #tpu.memory_space<vmem>>, vector<128x32xf32>
      tpu.vector_store %arg6[%c0_14, %c0_15], %15 {strides = array<i32>} : memref<128x32xf32, #tpu.memory_space<vmem>>, vector<128x32xf32>,
    } else {
    }
    return
  }
  func.func @transform_0(%arg0: i32, %arg1: i32, %arg2: i32) -> (i32, i32) {
    %c0_i32 = arith.constant 0 : i32
    return %arg0, %arg2 : i32, i32
  }
  func.func @transform_1(%arg0: i32, %arg1: i32, %arg2: i32) -> (i32, i32) {
    %c0_i32 = arith.constant 0 : i32
    %0 = arith.addi %arg1, %c0_i32 : i32
    %c0_i32_0 = arith.constant 0 : i32
    return %arg2, %0 : i32, i32
  }
  func.func @transform_2(%arg0: i32, %arg1: i32, %arg2: i32) -> (i32, i32) {
    %c0_i32 = arith.constant 0 : i32
    %0 = arith.addi %arg1, %c0_i32 : i32
    %c0_i32_0 = arith.constant 0 : i32
    %c0_i32_1 = arith.constant 0 : i32
    return %c0_i32_0, %0 : i32, i32
  }
  func.func @transform_3(%arg0: i32, %arg1: i32, %arg2: i32) -> (i32, i32) {
    %c0_i32 = arith.constant 0 : i32
    return %arg0, %arg1 : i32, i32
  }
}

</mosaic_0001>

<bundles_post_ra>
// kernel: attention_forward.7
= control target key start
LH: loop header
LB: loop body
LE: loop exit
PB: predicated region body
PF: predicated region fallthrough
CT: control target
= control target key end

     0   :  { %vm18_vm0 = vcmask 261120   ;;  %v306_v3 = vmov 0.0   ;;  %s520_s1 = inlined_call_operand.vmem [shape: f32[32,32], index: 1, kind: input, shape index: {}]   ;;  %s521_s0 = inlined_call_operand.vmem [shape: f32[128,32], index: 0, kind: input, shape index: {}]   ;;  %s522_s2 = inlined_call_operand.vmem [shape: f32[1,32], index: 2, kind: input, shape index: {}]   ;;  %s523_s3 = inlined_call_operand.vmem [shape: f32[128,32], index: 3, kind: output, shape index: {}]  }
   0x1   :  { %v70_v0 = vld [vmem:[%s520_s1 + $0x18] sm:$0xff]  ;;  %v69_v1 = vld [vmem:[%s520_s1 + $0x10] sm:$0xff]  ;;  %v68_v2 = vld [vmem:[%s520_s1 + $0x8] sm:$0xff]  ;;  %19 = vst.msk [vmem:[#allocation2] sm:$0xff] %vm18_vm0, %v306_v3 }
   0x2   :  { %293 = vmatpush.msra.mxu2 %v70_v0  ;;  %294 = vmatpush.msra.mxu3 %v70_v0  ;;  %v67_v4 = vld [vmem:[%s520_s1] sm:$0xff]  ;;  %20 = vst.msk [vmem:[#allocation2 + $0x8] sm:$0xff] %vm18_vm0, %v306_v3  ;;  %v60_v9 = vld [vmem:[%s521_s0 + $0x48] sm:$0xff]  ;;  %v61_v13 = vld [vmem:[%s521_s0 + $0x50] sm:$0xff] }
   0x3   :  { %132 = vmatpush.msra.mxu0 %v70_v0  ;;  %292 = vmatpush.msra.mxu1 %v70_v0  ;;  %v59_v5 = vld [vmem:[%s521_s0 + $0x40] sm:$0xff]  ;;  %21 = vst.msk [vmem:[#allocation2 + $0x10] sm:$0xff] %vm18_vm0, %v306_v3  ;;  %v64_v10 = vld [vmem:[%s521_s0 + $0x68] sm:$0xff]  ;;  %v65_v14 = vld [vmem:[%s521_s0 + $0x70] sm:$0xff] }
   0x4   :  { %296 = vmatpush.msra.mxu2 %v69_v1  ;;  %297 = vmatpush.msra.mxu3 %v69_v1  ;;  %v63_v6 = vld [vmem:[%s521_s0 + $0x60] sm:$0xff]  ;;  %22 = vst.msk [vmem:[#allocation2 + $0x18] sm:$0xff] %vm18_vm0, %v306_v3  ;;  %v52_v11 = vld [vmem:[%s521_s0 + $0x8] sm:$0xff]  ;;  %v53_v15 = vld [vmem:[%s521_s0 + $0x10] sm:$0xff] }
   0x5   :  { %133 = vmatpush.msra.mxu0 %v69_v1  ;;  %295 = vmatpush.msra.mxu1 %v69_v1  ;;  %v51_v7 = vld [vmem:[%s521_s0] sm:$0xff]  ;;  %23 = vst.msk [vmem:[#allocation2 + $0x20] sm:$0xff] %vm18_vm0, %v306_v3  ;;  %v56_v12 = vld [vmem:[%s521_s0 + $0x28] sm:$0xff]  ;;  %v57_v16 = vld [vmem:[%s521_s0 + $0x30] sm:$0xff] }
   0x6   :  { %299 = vmatpush.msra.mxu2 %v68_v2  ;;  %300 = vmatpush.msra.mxu3 %v68_v2  ;;  %v55_v8 = vld [vmem:[%s521_s0 + $0x20] sm:$0xff]  ;;  %24 = vst.msk [vmem:[#allocation2 + $0x28] sm:$0xff] %vm18_vm0, %v306_v3  ;;  %v62_v17 = vld [vmem:[%s521_s0 + $0x58] sm:$0xff] }
   0x7   :  { %134 = vmatpush.msra.mxu0 %v68_v2  ;;  %298 = vmatpush.msra.mxu1 %v68_v2  ;;  %25 = vst.msk [vmem:[#allocation2 + $0x30] sm:$0xff] %vm18_vm0, %v306_v3  ;;  %v66_v18 = vld [vmem:[%s521_s0 + $0x78] sm:$0xff]  ;;  %v424_v35 = vld [vmem:[%s522_s2] ss:$0 sm:$0xff] }
   0x8   :  { %302 = vmatpush.msra.mxu2 %v67_v4  ;;  %303 = vmatpush.msra.mxu3 %v67_v4  ;;  %26 = vst.msk [vmem:[#allocation2 + $0x38] sm:$0xff] %vm18_vm0, %v306_v3  ;;  %v54_v19 = vld [vmem:[%s521_s0 + $0x18] sm:$0xff]  ;;  %v35_v21 = vld [vmem:[#allocation2] sm:$0xff] }
   0x9   :  { %284 = vmatmul.msk.f32.vlgmr.msra.gmra.mxu2 %vm18_vm0, %v59_v5  ;;  %288 = vmatmul.msk.f32.vlgmr.msra.gmra.mxu3 %vm18_vm0, %v63_v6  ;;  %27 = vst.msk [vmem:[#allocation2 + $0x40] sm:$0xff] %vm18_vm0, %v306_v3  ;;  %v58_v20 = vld [vmem:[%s521_s0 + $0x38] sm:$0xff]  ;;  %v36_v33 = vld [vmem:[#allocation2 + $0x8] sm:$0xff] }
   0xa   :  { %135 = vmatpush.msra.mxu0 %v67_v4  ;;  %301 = vmatpush.msra.mxu1 %v67_v4  ;;  %28 = vst.msk [vmem:[#allocation2 + $0x48] sm:$0xff] %vm18_vm0, %v306_v3  ;;  %v37_v51 = vld [vmem:[#allocation2 + $0x10] sm:$0xff] }
   0xb   :  { %276 = vmatmul.msk.f32.vlgmr.msra.gmra.mxu0 %vm18_vm0, %v51_v7  ;;  %280 = vmatmul.msk.f32.vlgmr.msra.gmra.mxu1 %vm18_vm0, %v55_v8  ;;  %29 = vst.msk [vmem:[#allocation2 + $0x50] sm:$0xff] %vm18_vm0, %v306_v3  ;;  %v38_v7 = vld [vmem:[#allocation2 + $0x18] sm:$0xff] }
   0xc   :  { %30 = vst.msk [vmem:[#allocation2 + $0x58] sm:$0xff] %vm18_vm0, %v306_v3  ;;  %v39_v22 = vld [vmem:[#allocation2 + $0x20] sm:$0xff] }
   0xd   :  { %31 = vst.msk [vmem:[#allocation2 + $0x60] sm:$0xff] %vm18_vm0, %v306_v3  ;;  %v40_v34 = vld [vmem:[#allocation2 + $0x28] sm:$0xff] }
   0xe   :  { %32 = vst.msk [vmem:[#allocation2 + $0x68] sm:$0xff] %vm18_vm0, %v306_v3  ;;  %v41_v52 = vld [vmem:[#allocation2 + $0x30] sm:$0xff] }
   0xf   :  { %33 = vst.msk [vmem:[#allocation2 + $0x70] sm:$0xff] %vm18_vm0, %v306_v3  ;;  %v42_v8 = vld [vmem:[#allocation2 + $0x38] sm:$0xff] }
  0x10   :  { %34 = vst.msk [vmem:[#allocation2 + $0x78] sm:$0xff] %vm18_vm0, %v306_v3  ;;  %v43_v27 = vld [vmem:[#allocation2 + $0x40] sm:$0xff] }
  0x11   :  { %285 = vmatmul.msk.f32.gmra.mxu2 %vm18_vm0, %v60_v9  ;;  %289 = vmatmul.msk.f32.gmra.mxu3 %vm18_vm0, %v64_v10  ;;  %v44_v41 = vld [vmem:[#allocation2 + $0x48] sm:$0xff] }
  0x12   :  { %v45_v61 = vld [vmem:[#allocation2 + $0x50] sm:$0xff] }
  0x13   :  { %277 = vmatmul.msk.f32.gmra.mxu0 %vm18_vm0, %v52_v11  ;;  %281 = vmatmul.msk.f32.gmra.mxu1 %vm18_vm0, %v56_v12 }
  0x14   :  { %v47_v28 = vld [vmem:[#allocation2 + $0x60] sm:$0xff] }
  0x15   :  { %v48_v42 = vld [vmem:[#allocation2 + $0x68] sm:$0xff] }
  0x16   :  { %v49_v62 = vld [vmem:[#allocation2 + $0x70] sm:$0xff] }
  0x19   :  { %286 = vmatmul.msk.f32.gmra.mxu2 %vm18_vm0, %v61_v13  ;;  %290 = vmatmul.msk.f32.gmra.mxu3 %vm18_vm0, %v65_v14 }
  0x1b   :  { %278 = vmatmul.msk.f32.gmra.mxu0 %vm18_vm0, %v53_v15  ;;  %282 = vmatmul.msk.f32.gmra.mxu1 %vm18_vm0, %v57_v16 }
  0x21   :  { %287 = vmatmul.msk.f32.gmra.mxu2 %vm18_vm0, %v62_v17  ;;  %291 = vmatmul.msk.f32.gmra.mxu3 %vm18_vm0, %v66_v18  ;;  %v46_v17 = vld [vmem:[#allocation2 + $0x58] sm:$0xff] }
  0x22   :  { %v50_v18 = vld [vmem:[#allocation2 + $0x78] sm:$0xff] }
  0x23   :  { %279 = vmatmul.msk.f32.gmra.mxu0 %vm18_vm0, %v54_v19  ;;  %283 = vmatmul.msk.f32.gmra.mxu1 %vm18_vm0, %v58_v20 }
  0x88   :  { %v137_v23 = vpop.f32.mrf.mxu0  ;;  %v149_v24 = vpop.f32.mrf.mxu1 }
  0x89   :  { %v185_v25 = vadd.f32 %v137_v23, %v35_v21  ;;  %v189_v26 = vadd.f32 %v149_v24, %v39_v22 }
  0x8b   :  { %201 = vst.msk [vmem:[#allocation2] sm:$0xff] %vm18_vm0, %v185_v25 }
  0x8c   :  { %205 = vst.msk [vmem:[#allocation2 + $0x20] sm:$0xff] %vm18_vm0, %v189_v26  ;;  %v161_v29 = vpop.f32.mrf.mxu2  ;;  %v173_v30 = vpop.f32.mrf.mxu3 }
  0x8d   :  { %v193_v31 = vadd.f32 %v161_v29, %v43_v27  ;;  %v197_v32 = vadd.f32 %v173_v30, %v47_v28 }
  0x8f   :  { %209 = vst.msk [vmem:[#allocation2 + $0x40] sm:$0xff] %vm18_vm0, %v193_v31 }
  0x90   :  { %213 = vst.msk [vmem:[#allocation2 + $0x60] sm:$0xff] %vm18_vm0, %v197_v32  ;;  %v140_v36 = vpop.f32.mrf.mxu0  ;;  %v152_v37 = vpop.f32.mrf.mxu1 }
  0x91   :  { %v186_v38 = vadd.f32 %v140_v36, %v36_v33  ;;  %v190_v39 = vadd.f32 %v152_v37, %v40_v34 }
  0x92   :  { %v220_v40 = vld [vmem:[#allocation2] sm:$0xff] }
  0x93   :  { %v240_v43 = vadd.f32 %v424_v35, %v220_v40  ;;  %v224_v44 = vld [vmem:[#allocation2 + $0x20] sm:$0xff]  ;;  %202 = vst.msk [vmem:[#allocation2 + $0x8] sm:$0xff] %vm18_vm0, %v186_v38 }
  0x94   :  { %v244_v45 = vadd.f32 %v424_v35, %v224_v44  ;;  %206 = vst.msk [vmem:[#allocation2 + $0x28] sm:$0xff] %vm18_vm0, %v190_v39  ;;  %v164_v46 = vpop.f32.mrf.mxu2  ;;  %v176_v47 = vpop.f32.mrf.mxu3 }
  0x95   :  { %256 = vst.msk [vmem:[%s523_s3] sm:$0xff] %vm18_vm0, %v240_v43  ;;  %v194_v48 = vadd.f32 %v164_v46, %v44_v41  ;;  %v198_v49 = vadd.f32 %v176_v47, %v48_v42 }
  0x96   :  { %260 = vst.msk [vmem:[%s523_s3 + $0x20] sm:$0xff] %vm18_vm0, %v244_v45  ;;  %v228_v50 = vld [vmem:[#allocation2 + $0x40] sm:$0xff] }
  0x97   :  { %v248_v53 = vadd.f32 %v424_v35, %v228_v50  ;;  %v232_v54 = vld [vmem:[#allocation2 + $0x60] sm:$0xff]  ;;  %210 = vst.msk [vmem:[#allocation2 + $0x48] sm:$0xff] %vm18_vm0, %v194_v48 }
  0x98   :  { %v252_v55 = vadd.f32 %v424_v35, %v232_v54  ;;  %214 = vst.msk [vmem:[#allocation2 + $0x68] sm:$0xff] %vm18_vm0, %v198_v49  ;;  %v143_v56 = vpop.f32.mrf.mxu0  ;;  %v155_v57 = vpop.f32.mrf.mxu1 }
  0x99   :  { %264 = vst.msk [vmem:[%s523_s3 + $0x40] sm:$0xff] %vm18_vm0, %v248_v53  ;;  %v187_v58 = vadd.f32 %v143_v56, %v37_v51  ;;  %v191_v59 = vadd.f32 %v155_v57, %v41_v52 }
  0x9a   :  { %268 = vst.msk [vmem:[%s523_s3 + $0x60] sm:$0xff] %vm18_vm0, %v252_v55  ;;  %v221_v60 = vld [vmem:[#allocation2 + $0x8] sm:$0xff] }
  0x9b   :  { %v241_v63 = vadd.f32 %v424_v35, %v221_v60  ;;  %v225_v0 = vld [vmem:[#allocation2 + $0x28] sm:$0xff]  ;;  %203 = vst.msk [vmem:[#allocation2 + $0x10] sm:$0xff] %vm18_vm0, %v187_v58 }
  0x9c   :  { %v245_v1 = vadd.f32 %v424_v35, %v225_v0  ;;  %207 = vst.msk [vmem:[#allocation2 + $0x30] sm:$0xff] %vm18_vm0, %v191_v59  ;;  %v167_v2 = vpop.f32.mrf.mxu2  ;;  %v179_v3 = vpop.f32.mrf.mxu3 }
  0x9d   :  { %257 = vst.msk [vmem:[%s523_s3 + $0x8] sm:$0xff] %vm18_vm0, %v241_v63  ;;  %v195_v4 = vadd.f32 %v167_v2, %v45_v61  ;;  %v199_v5 = vadd.f32 %v179_v3, %v49_v62 }
  0x9e   :  { %261 = vst.msk [vmem:[%s523_s3 + $0x28] sm:$0xff] %vm18_vm0, %v245_v1  ;;  %v229_v6 = vld [vmem:[#allocation2 + $0x48] sm:$0xff] }
  0x9f   :  { %v249_v9 = vadd.f32 %v424_v35, %v229_v6  ;;  %v233_v10 = vld [vmem:[#allocation2 + $0x68] sm:$0xff]  ;;  %211 = vst.msk [vmem:[#allocation2 + $0x50] sm:$0xff] %vm18_vm0, %v195_v4 }
  0xa0   :  { %v253_v11 = vadd.f32 %v424_v35, %v233_v10  ;;  %215 = vst.msk [vmem:[#allocation2 + $0x70] sm:$0xff] %vm18_vm0, %v199_v5  ;;  %v146_v12 = vpop.f32.mrf.mxu0  ;;  %v158_v13 = vpop.f32.mrf.mxu1 }
  0xa1   :  { %265 = vst.msk [vmem:[%s523_s3 + $0x48] sm:$0xff] %vm18_vm0, %v249_v9  ;;  %v188_v14 = vadd.f32 %v146_v12, %v38_v7  ;;  %v192_v15 = vadd.f32 %v158_v13, %v42_v8 }
  0xa2   :  { %269 = vst.msk [vmem:[%s523_s3 + $0x68] sm:$0xff] %vm18_vm0, %v253_v11  ;;  %v222_v16 = vld [vmem:[#allocation2 + $0x10] sm:$0xff] }
  0xa3   :  { %v242_v19 = vadd.f32 %v424_v35, %v222_v16  ;;  %v226_v20 = vld [vmem:[#allocation2 + $0x30] sm:$0xff]  ;;  %204 = vst.msk [vmem:[#allocation2 + $0x18] sm:$0xff] %vm18_vm0, %v188_v14 }
  0xa4   :  { %v246_v21 = vadd.f32 %v424_v35, %v226_v20  ;;  %208 = vst.msk [vmem:[#allocation2 + $0x38] sm:$0xff] %vm18_vm0, %v192_v15  ;;  %v170_v22 = vpop.f32.mrf.mxu2  ;;  %v182_v23 = vpop.f32.mrf.mxu3 }
  0xa5   :  { %258 = vst.msk [vmem:[%s523_s3 + $0x10] sm:$0xff] %vm18_vm0, %v242_v19  ;;  %v196_v24 = vadd.f32 %v170_v22, %v46_v17  ;;  %v200_v25 = vadd.f32 %v182_v23, %v50_v18 }
  0xa6   :  { %262 = vst.msk [vmem:[%s523_s3 + $0x30] sm:$0xff] %vm18_vm0, %v246_v21  ;;  %v230_v26 = vld [vmem:[#allocation2 + $0x50] sm:$0xff] }
  0xa7   :  { %v250_v27 = vadd.f32 %v424_v35, %v230_v26  ;;  %v234_v28 = vld [vmem:[#allocation2 + $0x70] sm:$0xff]  ;;  %212 = vst.msk [vmem:[#allocation2 + $0x58] sm:$0xff] %vm18_vm0, %v196_v24 }
  0xa8   :  { %v254_v29 = vadd.f32 %v424_v35, %v234_v28  ;;  %216 = vst.msk [vmem:[#allocation2 + $0x78] sm:$0xff] %vm18_vm0, %v200_v25 }
  0xa9   :  { %266 = vst.msk [vmem:[%s523_s3 + $0x50] sm:$0xff] %vm18_vm0, %v250_v27 }
  0xaa   :  { %270 = vst.msk [vmem:[%s523_s3 + $0x70] sm:$0xff] %vm18_vm0, %v254_v29  ;;  %v223_v30 = vld [vmem:[#allocation2 + $0x18] sm:$0xff] }
  0xab   :  { %v243_v31 = vadd.f32 %v424_v35, %v223_v30  ;;  %v227_v32 = vld [vmem:[#allocation2 + $0x38] sm:$0xff] }
  0xac   :  { %v247_v33 = vadd.f32 %v424_v35, %v227_v32 }
  0xad   :  { %259 = vst.msk [vmem:[%s523_s3 + $0x18] sm:$0xff] %vm18_vm0, %v243_v31 }
  0xae   :  { %263 = vst.msk [vmem:[%s523_s3 + $0x38] sm:$0xff] %vm18_vm0, %v247_v33  ;;  %v231_v34 = vld [vmem:[#allocation2 + $0x58] sm:$0xff] }
  0xaf   :  { %v251_v36 = vadd.f32 %v424_v35, %v231_v34  ;;  %v235_v37 = vld [vmem:[#allocation2 + $0x78] sm:$0xff] }
  0xb0   :  { %v255_v38 = vadd.f32 %v424_v35, %v235_v37 }
  0xb1   :  { %267 = vst.msk [vmem:[%s523_s3 + $0x58] sm:$0xff] %vm18_vm0, %v251_v36 }
  0xb2   :  { %271 = vst.msk [vmem:[%s523_s3 + $0x78] sm:$0xff] %vm18_vm0, %v255_v38 }

// kernel: attention_forward.9
= control target key start
LH: loop header
LB: loop body
LE: loop exit
PB: predicated region body
PF: predicated region fallthrough
CT: control target
= control target key end

     0   :  { %vm19_vm0 = vcmask 261120   ;;  %v350_v3 = vmov 0.0   ;;  %s522_s0 = inlined_call_operand.vmem [shape: f32[128,32], index: 0, kind: input, shape index: {}]   ;;  %s523_s1 = inlined_call_operand.vmem [shape: f32[32,32], index: 1, kind: input, shape index: {}]   ;;  %s524_s2 = inlined_call_operand.vmem [shape: f32[1,32], index: 2, kind: input, shape index: {}]   ;;  %s525_s3 = inlined_call_operand.hbm [shape: f32[128,32], index: 3, kind: output, shape index: {}]  }
   0x1   :  { %v71_v0 = vld [vmem:[%s523_s1 + $0x18] sm:$0xff]  ;;  %v70_v1 = vld [vmem:[%s523_s1 + $0x10] sm:$0xff]  ;;  %v69_v2 = vld [vmem:[%s523_s1 + $0x8] sm:$0xff]  ;;  %20 = vst.msk [vmem:[#allocation2] sm:$0xff] %vm19_vm0, %v350_v3 }
   0x2   :  { %308 = vmatpush.msra.mxu2 %v71_v0  ;;  %309 = vmatpush.msra.mxu3 %v71_v0  ;;  %v68_v4 = vld [vmem:[%s523_s1] sm:$0xff]  ;;  %21 = vst.msk [vmem:[#allocation2 + $0x8] sm:$0xff] %vm19_vm0, %v350_v3 }
   0x3   :  { %133 = vmatpush.msra.mxu0 %v71_v0  ;;  %307 = vmatpush.msra.mxu1 %v71_v0  ;;  %v60_v5 = vld [vmem:[%s522_s0 + $0x40] sm:$0xff]  ;;  %22 = vst.msk [vmem:[#allocation2 + $0x10] sm:$0xff] %vm19_vm0, %v350_v3 }
   0x4   :  { %311 = vmatpush.msra.mxu2 %v70_v1  ;;  %312 = vmatpush.msra.mxu3 %v70_v1  ;;  %v64_v6 = vld [vmem:[%s522_s0 + $0x60] sm:$0xff]  ;;  %23 = vst.msk [vmem:[#allocation2 + $0x18] sm:$0xff] %vm19_vm0, %v350_v3 }
   0x5   :  { %134 = vmatpush.msra.mxu0 %v70_v1  ;;  %310 = vmatpush.msra.mxu1 %v70_v1  ;;  %v52_v7 = vld [vmem:[%s522_s0] sm:$0xff]  ;;  %24 = vst.msk [vmem:[#allocation2 + $0x20] sm:$0xff] %vm19_vm0, %v350_v3 }
   0x6   :  { %314 = vmatpush.msra.mxu2 %v69_v2  ;;  %315 = vmatpush.msra.mxu3 %v69_v2  ;;  %v56_v8 = vld [vmem:[%s522_s0 + $0x20] sm:$0xff] }
   0x7   :  { %135 = vmatpush.msra.mxu0 %v69_v2  ;;  %313 = vmatpush.msra.mxu1 %v69_v2 }
   0x8   :  { %317 = vmatpush.msra.mxu2 %v68_v4  ;;  %318 = vmatpush.msra.mxu3 %v68_v4 }
   0x9   :  { %8 = vsyncpa [#allocation4], 0  ;;  %299 = vmatmul.msk.f32.vlgmr.msra.gmra.mxu2 %vm19_vm0, %v60_v5  ;;  %303 = vmatmul.msk.f32.vlgmr.msra.gmra.mxu3 %vm19_vm0, %v64_v6  ;;  %25 = vst.msk [vmem:[#allocation2 + $0x28] sm:$0xff] %vm19_vm0, %v350_v3  ;;  %v61_v9 = vld [vmem:[%s522_s0 + $0x48] sm:$0xff]  ;;  %v62_v13 = vld [vmem:[%s522_s0 + $0x50] sm:$0xff]  ;;  %s279_s27 = sshll.u32 %s525_s3, 4  ;;  %s280_s27 = int_to_ptr.hbm [resolvable:$true] %s279_s27 }
   0xa   :  { %136 = vmatpush.msra.mxu0 %v68_v4  ;;  %316 = vmatpush.msra.mxu1 %v68_v4  ;;  %26 = vst.msk [vmem:[#allocation2 + $0x30] sm:$0xff] %vm19_vm0, %v350_v3  ;;  %v65_v10 = vld [vmem:[%s522_s0 + $0x68] sm:$0xff]  ;;  %v66_v14 = vld [vmem:[%s522_s0 + $0x70] sm:$0xff]  ;;  %v63_v17 = vld [vmem:[%s522_s0 + $0x58] sm:$0xff]  ;;  %s352_s28 = smov 128   ;;  %s353_s29 = smov 8  }
   0xb   :  { %291 = vmatmul.msk.f32.vlgmr.msra.gmra.mxu0 %vm19_vm0, %v52_v7  ;;  %295 = vmatmul.msk.f32.vlgmr.msra.gmra.mxu1 %vm19_vm0, %v56_v8  ;;  %27 = vst.msk [vmem:[#allocation2 + $0x38] sm:$0xff] %vm19_vm0, %v350_v3  ;;  %v53_v11 = vld [vmem:[%s522_s0 + $0x8] sm:$0xff]  ;;  %v54_v15 = vld [vmem:[%s522_s0 + $0x10] sm:$0xff]  ;;  %v67_v18 = vld [vmem:[%s522_s0 + $0x78] sm:$0xff] }
   0xc   :  { %28 = vst.msk [vmem:[#allocation2 + $0x40] sm:$0xff] %vm19_vm0, %v350_v3  ;;  %v57_v12 = vld [vmem:[%s522_s0 + $0x28] sm:$0xff]  ;;  %v58_v16 = vld [vmem:[%s522_s0 + $0x30] sm:$0xff]  ;;  %v55_v19 = vld [vmem:[%s522_s0 + $0x18] sm:$0xff] }
   0xd   :  { %29 = vst.msk [vmem:[#allocation2 + $0x48] sm:$0xff] %vm19_vm0, %v350_v3  ;;  %v59_v20 = vld [vmem:[%s522_s0 + $0x38] sm:$0xff]  ;;  %v36_v21 = vld [vmem:[#allocation2] sm:$0xff]  ;;  %v37_v33 = vld [vmem:[#allocation2 + $0x8] sm:$0xff] }
   0xe   :  { %30 = vst.msk [vmem:[#allocation2 + $0x50] sm:$0xff] %vm19_vm0, %v350_v3  ;;  %v40_v22 = vld [vmem:[#allocation2 + $0x20] sm:$0xff]  ;;  %v38_v51 = vld [vmem:[#allocation2 + $0x10] sm:$0xff]  ;;  %v39_v7 = vld [vmem:[#allocation2 + $0x18] sm:$0xff] }
   0xf   :  { %31 = vst.msk [vmem:[#allocation2 + $0x58] sm:$0xff] %vm19_vm0, %v350_v3  ;;  %v471_v35 = vld [vmem:[%s524_s2] ss:$0 sm:$0xff]  ;;  %s351_s2 = smov [#allocation3]  }
  0x10   :  { %32 = vst.msk [vmem:[#allocation2 + $0x60] sm:$0xff] %vm19_vm0, %v350_v3  ;;  %v41_v34 = vld [vmem:[#allocation2 + $0x28] sm:$0xff]  ;;  %s277_s24 = sshll.u32 %s351_s2, 4  ;;  %s278_s24 = int_to_ptr.vmem [resolvable:$true] %s277_s24 }
  0x11   :  { %300 = vmatmul.msk.f32.gmra.mxu2 %vm19_vm0, %v61_v9  ;;  %304 = vmatmul.msk.f32.gmra.mxu3 %vm19_vm0, %v65_v10  ;;  %33 = vst.msk [vmem:[#allocation2 + $0x68] sm:$0xff] %vm19_vm0, %v350_v3  ;;  %v42_v52 = vld [vmem:[#allocation2 + $0x30] sm:$0xff] }
  0x12   :  { %34 = vst.msk [vmem:[#allocation2 + $0x70] sm:$0xff] %vm19_vm0, %v350_v3  ;;  %v43_v8 = vld [vmem:[#allocation2 + $0x38] sm:$0xff] }
  0x13   :  { %292 = vmatmul.msk.f32.gmra.mxu0 %vm19_vm0, %v53_v11  ;;  %296 = vmatmul.msk.f32.gmra.mxu1 %vm19_vm0, %v57_v12  ;;  %35 = vst.msk [vmem:[#allocation2 + $0x78] sm:$0xff] %vm19_vm0, %v350_v3  ;;  %v44_v27 = vld [vmem:[#allocation2 + $0x40] sm:$0xff] }
  0x14   :  { %v45_v41 = vld [vmem:[#allocation2 + $0x48] sm:$0xff] }
  0x15   :  { %v46_v61 = vld [vmem:[#allocation2 + $0x50] sm:$0xff] }
  0x17   :  { %v48_v28 = vld [vmem:[#allocation2 + $0x60] sm:$0xff] }
  0x18   :  { %v49_v42 = vld [vmem:[#allocation2 + $0x68] sm:$0xff] }
  0x19   :  { %301 = vmatmul.msk.f32.gmra.mxu2 %vm19_vm0, %v62_v13  ;;  %305 = vmatmul.msk.f32.gmra.mxu3 %vm19_vm0, %v66_v14  ;;  %v50_v62 = vld [vmem:[#allocation2 + $0x70] sm:$0xff] }
  0x1b   :  { %293 = vmatmul.msk.f32.gmra.mxu0 %vm19_vm0, %v54_v15  ;;  %297 = vmatmul.msk.f32.gmra.mxu1 %vm19_vm0, %v58_v16 }
  0x21   :  { %302 = vmatmul.msk.f32.gmra.mxu2 %vm19_vm0, %v63_v17  ;;  %306 = vmatmul.msk.f32.gmra.mxu3 %vm19_vm0, %v67_v18  ;;  %v47_v17 = vld [vmem:[#allocation2 + $0x58] sm:$0xff] }
  0x22   :  { %v51_v18 = vld [vmem:[#allocation2 + $0x78] sm:$0xff] }
  0x23   :  { %294 = vmatmul.msk.f32.gmra.mxu0 %vm19_vm0, %v55_v19  ;;  %298 = vmatmul.msk.f32.gmra.mxu1 %vm19_vm0, %v59_v20 }
  0x88   :  { %v138_v23 = vpop.f32.mrf.mxu0  ;;  %v150_v24 = vpop.f32.mrf.mxu1 }
  0x89   :  { %v186_v25 = vadd.f32 %v138_v23, %v36_v21  ;;  %v190_v26 = vadd.f32 %v150_v24, %v40_v22 }
  0x8b   :  { %202 = vst.msk [vmem:[#allocation2] sm:$0xff] %vm19_vm0, %v186_v25 }
  0x8c   :  { %206 = vst.msk [vmem:[#allocation2 + $0x20] sm:$0xff] %vm19_vm0, %v190_v26  ;;  %v162_v29 = vpop.f32.mrf.mxu2  ;;  %v174_v30 = vpop.f32.mrf.mxu3 }
  0x8d   :  { %v194_v31 = vadd.f32 %v162_v29, %v44_v27  ;;  %v198_v32 = vadd.f32 %v174_v30, %v48_v28 }
  0x8f   :  { %210 = vst.msk [vmem:[#allocation2 + $0x40] sm:$0xff] %vm19_vm0, %v194_v31 }
  0x90   :  { %214 = vst.msk [vmem:[#allocation2 + $0x60] sm:$0xff] %vm19_vm0, %v198_v32  ;;  %v141_v36 = vpop.f32.mrf.mxu0  ;;  %v153_v37 = vpop.f32.mrf.mxu1 }
  0x91   :  { %v187_v38 = vadd.f32 %v141_v36, %v37_v33  ;;  %v191_v39 = vadd.f32 %v153_v37, %v41_v34 }
  0x92   :  { %v221_v40 = vld [vmem:[#allocation2] sm:$0xff] }
  0x93   :  { %v241_v43 = vadd.f32 %v471_v35, %v221_v40  ;;  %v225_v44 = vld [vmem:[#allocation2 + $0x20] sm:$0xff]  ;;  %203 = vst.msk [vmem:[#allocation2 + $0x8] sm:$0xff] %vm19_vm0, %v187_v38 }
  0x94   :  { %v245_v45 = vadd.f32 %v471_v35, %v225_v44  ;;  %207 = vst.msk [vmem:[#allocation2 + $0x28] sm:$0xff] %vm19_vm0, %v191_v39  ;;  %v165_v46 = vpop.f32.mrf.mxu2  ;;  %v177_v47 = vpop.f32.mrf.mxu3 }
  0x95   :  { %257 = vst.msk [vmem:[#allocation3] sm:$0xff] %vm19_vm0, %v241_v43  ;;  %v195_v48 = vadd.f32 %v165_v46, %v45_v41  ;;  %v199_v49 = vadd.f32 %v177_v47, %v49_v42 }
  0x96   :  { %261 = vst.msk [vmem:[#allocation3 + $0x20] sm:$0xff] %vm19_vm0, %v245_v45  ;;  %v229_v50 = vld [vmem:[#allocation2 + $0x40] sm:$0xff] }
  0x97   :  { %v249_v53 = vadd.f32 %v471_v35, %v229_v50  ;;  %v233_v54 = vld [vmem:[#allocation2 + $0x60] sm:$0xff]  ;;  %211 = vst.msk [vmem:[#allocation2 + $0x48] sm:$0xff] %vm19_vm0, %v195_v48 }
  0x98   :  { %v253_v55 = vadd.f32 %v471_v35, %v233_v54  ;;  %215 = vst.msk [vmem:[#allocation2 + $0x68] sm:$0xff] %vm19_vm0, %v199_v49  ;;  %v144_v56 = vpop.f32.mrf.mxu0  ;;  %v156_v57 = vpop.f32.mrf.mxu1 }
  0x99   :  { %265 = vst.msk [vmem:[#allocation3 + $0x40] sm:$0xff] %vm19_vm0, %v249_v53  ;;  %v188_v58 = vadd.f32 %v144_v56, %v38_v51  ;;  %v192_v59 = vadd.f32 %v156_v57, %v42_v52 }
  0x9a   :  { %269 = vst.msk [vmem:[#allocation3 + $0x60] sm:$0xff] %vm19_vm0, %v253_v55  ;;  %v222_v60 = vld [vmem:[#allocation2 + $0x8] sm:$0xff] }
  0x9b   :  { %v242_v63 = vadd.f32 %v471_v35, %v222_v60  ;;  %v226_v0 = vld [vmem:[#allocation2 + $0x28] sm:$0xff]  ;;  %204 = vst.msk [vmem:[#allocation2 + $0x10] sm:$0xff] %vm19_vm0, %v188_v58 }
  0x9c   :  { %v246_v1 = vadd.f32 %v471_v35, %v226_v0  ;;  %208 = vst.msk [vmem:[#allocation2 + $0x30] sm:$0xff] %vm19_vm0, %v192_v59  ;;  %v168_v2 = vpop.f32.mrf.mxu2  ;;  %v180_v3 = vpop.f32.mrf.mxu3 }
  0x9d   :  { %258 = vst.msk [vmem:[#allocation3 + $0x8] sm:$0xff] %vm19_vm0, %v242_v63  ;;  %v196_v4 = vadd.f32 %v168_v2, %v46_v61  ;;  %v200_v5 = vadd.f32 %v180_v3, %v50_v62 }
  0x9e   :  { %262 = vst.msk [vmem:[#allocation3 + $0x28] sm:$0xff] %vm19_vm0, %v246_v1  ;;  %v230_v6 = vld [vmem:[#allocation2 + $0x48] sm:$0xff] }
  0x9f   :  { %v250_v9 = vadd.f32 %v471_v35, %v230_v6  ;;  %v234_v10 = vld [vmem:[#allocation2 + $0x68] sm:$0xff]  ;;  %212 = vst.msk [vmem:[#allocation2 + $0x50] sm:$0xff] %vm19_vm0, %v196_v4 }
  0xa0   :  { %v254_v11 = vadd.f32 %v471_v35, %v234_v10  ;;  %216 = vst.msk [vmem:[#allocation2 + $0x70] sm:$0xff] %vm19_vm0, %v200_v5  ;;  %v147_v12 = vpop.f32.mrf.mxu0  ;;  %v159_v13 = vpop.f32.mrf.mxu1 }
  0xa1   :  { %266 = vst.msk [vmem:[#allocation3 + $0x48] sm:$0xff] %vm19_vm0, %v250_v9  ;;  %v189_v14 = vadd.f32 %v147_v12, %v39_v7  ;;  %v193_v15 = vadd.f32 %v159_v13, %v43_v8 }
  0xa2   :  { %270 = vst.msk [vmem:[#allocation3 + $0x68] sm:$0xff] %vm19_vm0, %v254_v11  ;;  %v223_v16 = vld [vmem:[#allocation2 + $0x10] sm:$0xff] }
  0xa3   :  { %v243_v19 = vadd.f32 %v471_v35, %v223_v16  ;;  %v227_v20 = vld [vmem:[#allocation2 + $0x30] sm:$0xff]  ;;  %205 = vst.msk [vmem:[#allocation2 + $0x18] sm:$0xff] %vm19_vm0, %v189_v14 }
  0xa4   :  { %v247_v21 = vadd.f32 %v471_v35, %v227_v20  ;;  %209 = vst.msk [vmem:[#allocation2 + $0x38] sm:$0xff] %vm19_vm0, %v193_v15  ;;  %v171_v22 = vpop.f32.mrf.mxu2  ;;  %v183_v23 = vpop.f32.mrf.mxu3 }
  0xa5   :  { %259 = vst.msk [vmem:[#allocation3 + $0x10] sm:$0xff] %vm19_vm0, %v243_v19  ;;  %v197_v24 = vadd.f32 %v171_v22, %v47_v17  ;;  %v201_v25 = vadd.f32 %v183_v23, %v51_v18 }
  0xa6   :  { %263 = vst.msk [vmem:[#allocation3 + $0x30] sm:$0xff] %vm19_vm0, %v247_v21  ;;  %v231_v26 = vld [vmem:[#allocation2 + $0x50] sm:$0xff] }
  0xa7   :  { %v251_v27 = vadd.f32 %v471_v35, %v231_v26  ;;  %v235_v28 = vld [vmem:[#allocation2 + $0x70] sm:$0xff]  ;;  %213 = vst.msk [vmem:[#allocation2 + $0x58] sm:$0xff] %vm19_vm0, %v197_v24 }
  0xa8   :  { %v255_v29 = vadd.f32 %v471_v35, %v235_v28  ;;  %217 = vst.msk [vmem:[#allocation2 + $0x78] sm:$0xff] %vm19_vm0, %v201_v25 }
  0xa9   :  { %267 = vst.msk [vmem:[#allocation3 + $0x50] sm:$0xff] %vm19_vm0, %v251_v27 }
  0xaa   :  { %271 = vst.msk [vmem:[#allocation3 + $0x70] sm:$0xff] %vm19_vm0, %v255_v29  ;;  %v224_v30 = vld [vmem:[#allocation2 + $0x18] sm:$0xff] }
  0xab   :  { %v244_v31 = vadd.f32 %v471_v35, %v224_v30  ;;  %v228_v32 = vld [vmem:[#allocation2 + $0x38] sm:$0xff] }
  0xac   :  { %v248_v33 = vadd.f32 %v471_v35, %v228_v32 }
  0xad   :  { %260 = vst.msk [vmem:[#allocation3 + $0x18] sm:$0xff] %vm19_vm0, %v244_v31 }
  0xae   :  { %264 = vst.msk [vmem:[#allocation3 + $0x38] sm:$0xff] %vm19_vm0, %v248_v33  ;;  %v232_v34 = vld [vmem:[#allocation2 + $0x58] sm:$0xff] }
  0xaf   :  { %v252_v36 = vadd.f32 %v471_v35, %v232_v34  ;;  %v236_v37 = vld [vmem:[#allocation2 + $0x78] sm:$0xff] }
  0xb0   :  { %v256_v38 = vadd.f32 %v471_v35, %v236_v37 }
  0xb1   :  { %268 = vst.msk [vmem:[#allocation3 + $0x58] sm:$0xff] %vm19_vm0, %v252_v36 }
  0xb2   :  { %272 = vst.msk [vmem:[#allocation3 + $0x78] sm:$0xff] %vm19_vm0, %v256_v38 }
  0xb3   :  { %285 = dma.vmem_to_hbm [thread:$0]  %s278_s24, 2048, %s280_s27, [#allocation4], %s352_s28, %s352_s28, %s353_s29  }
  0xb4   :  { %348 = dma.done.wait [#allocation4], 2048  }
  0xb5   :  { %349 = vsyncadd [#allocation4], 4294965248 }
  0xb6   :  { %290 = vsyncpa [#allocation4], 1 }

// kernel: attention_forward.8
= control target key start
LH: loop header
LB: loop body
LE: loop exit
PB: predicated region body
PF: predicated region fallthrough
CT: control target
= control target key end

     0   :  { %s3388_s12 = smov 0   ;;  %s3390_s13 = smov 0   ;;  %s4979_s0 = inlined_call_operand.vmem [shape: f32[2,64,32], index: 0, kind: input, shape index: {}]   ;;  %s4980_s1 = inlined_call_operand.vmem [shape: f32[2,64,32], index: 1, kind: input, shape index: {}]   ;;  %s4981_s2 = inlined_call_operand.vmem [shape: f32[2,64,32], index: 2, kind: input, shape index: {}]   ;;  %s4982_s3 = inlined_call_operand.vmem [shape: f32[2,64,32], index: 3, kind: output, shape index: {}]  }
   0x1   :  { %s3392_s14 = smov 0  }
   0x2 LB: > { %s32_s15 = sadd.s32 1, %s3353_s13  ;;  %p2920_p0 = scmp.ge.s32.totalorder %s3357_s14, 1  ;;  %s3357_s14 = sphi %s3392_s14, %s13_s14   ;;  %s3353_s13 = sphi %s3390_s13, %s4990_s13   ;;  %s3349_s12 = sphi %s3388_s12, %s4989_s12  }
   0x3   : > { %p34_p1 = scmp.ge.s32.totalorder %s32_s15, 2  ;;  %p199_p2 = scmp.lt.s32.totalorder %s3357_s14, 3 }
   0x5   : > { %s4992_s15 = smov (%p34_p1, %s32_s15), 0  ;;  %p200_p3 = pnand %p2920_p0, %p199_p2 }
   0x7   : > { %203 = sbr.rel (%p200_p3) target bundleno = 2001 (0x7d1), region = 32 }
   0xc   : > { %p250_p4 = scmp.lt.s32.totalorder %s3349_s12, 1  ;;  %vm391_vm0 = vcmask 64512   ;;  %s3359_s20 = smov 120   ;;  %vm489_vm1 = vcmask 523264   ;;  %vm293_vm2 = vcmask 7168   ;;  %vm358_vm3 = vcmask 261120  }
   0xd   : > { %s3360_s27 = smov 112   ;;  %s3361_s28 = smov 104   ;;  %vm1352_vm4 = vcmask 130112   ;;  %vm1901_vm5 = vcmask 195712   ;;  %vm2450_vm6 = vcmask 261312  }
   0xe   : > { %s4994_s12 = smov (!%p250_p4, %s3349_s12), 1  ;;  %s3365_s29 = smov 8  }
   0xf   : > { %s3406_s16 = sshll.u32 %s4994_s12, 6  ;;  %s3366_s30 = smov 24  }
  0x10   : > { %s257_s19 = scalar_lea.vmem %s4979_s0, %s3406_s16  ;;  %s3426_s23 = scalar_lea.vmem %s4980_s1, %s3406_s16 }
  0x11   : > { %v822_v0 = vld [vmem:[%s257_s19 + $0x10] sm:$0xff]  ;;  %v821_v1 = vld [vmem:[%s257_s19 + $0x8] sm:$0xff]  ;;  %v820_v2 = vld [vmem:[%s257_s19] sm:$0xff]  ;;  %s3466_s26 = scalar_lea.vmem %s4981_s2, %s3406_s16  ;;  %s3367_s4 = smov 16  }
  0x12   : > { %v3412_v3 = vmul.f32 0.35355338, %v822_v0  ;;  %v3414_v4 = vmul.f32 0.35355338, %v821_v1  ;;  %v3416_v5 = vmul.f32 0.35355338, %v820_v2  ;;  %s4849_s7 = scalar_lea.vmem %s4982_s3, %s3406_s16 }
  0x13   : > { %v825_v6 = vld [vmem:[%s257_s19 + $0x28] sm:$0xff]  ;;  %v824_v7 = vld [vmem:[%s257_s19 + $0x20] sm:$0xff]  ;;  %v3431_v8 = vld [vmem:[%s3426_s23 + $0x38] sm:$0xff] }
  0x14   : > { %856 = vrot.lane.b32.xlu0 %v3412_v3, %s3359_s20  ;;  %854 = vrot.lane.b32.xlu1 %v3414_v4, %s3359_s20  ;;  %v823_v9 = vld [vmem:[%s257_s19 + $0x18] sm:$0xff]  ;;  %v3436_v10 = vld [vmem:[%s3426_s23 + $0x30] sm:$0xff]  ;;  %v3438_v11 = vmul.f32 0.35355338, %v825_v6  ;;  %v3440_v12 = vmul.f32 0.35355338, %v824_v7 }
  0x15   : > { %852 = vrot.lane.b32.xlu2 %v3416_v5, %s3359_s20  ;;  %2929 = vmatpush.xpose.msk.msra.mxu0 %vm391_vm0, %v3431_v8  ;;  %v3442_v13 = vmul.f32 0.35355338, %v823_v9  ;;  %v3447_v14 = vld [vmem:[%s3426_s23 + $0x28] sm:$0xff]  ;;  %v827_v15 = vld [vmem:[%s257_s19 + $0x38] sm:$0xff]  ;;  %v826_v16 = vld [vmem:[%s257_s19 + $0x30] sm:$0xff] }
  0x16   : > { %v3458_v17 = vld [vmem:[%s3426_s23 + $0x20] sm:$0xff]  ;;  %v3460_v18 = vmul.f32 0.35355338, %v827_v15  ;;  %v3471_v20 = vmul.f32 0.35355338, %v826_v16  ;;  %v1214_v21 = vld [vmem:[%s3466_s26 + $0x38] sm:$0xff] }
  0x17   : > { %v3469_v19 = vld [vmem:[%s3426_s23] sm:$0xff]  ;;  %763 = vmatpush.msra.mxu1 %v1214_v21  ;;  %v1213_v22 = vld [vmem:[%s3466_s26 + $0x30] sm:$0xff]  ;;  %v839_v23 = vld [vmem:[%s3426_s23 + $0x18] sm:$0xff] }
  0x18   : > { %v1212_v24 = vld [vmem:[%s3466_s26 + $0x28] sm:$0xff]  ;;  %v1211_v25 = vld [vmem:[%s3466_s26 + $0x20] sm:$0xff]  ;;  %v3488_v26 = vld [vmem:[%s3426_s23 + $0x10] sm:$0xff]  ;;  %v3095_v34 = vpack.i.bf16 %v1214_v21, %v1213_v22 }
  0x19   : > { %2930 = vmatpush.xpose.msk.msra.mxu0 %vm391_vm0, %v3436_v10  ;;  %764 = vmatpush.msra.mxu1 %v1213_v22  ;;  %v837_v27 = vld [vmem:[%s3426_s23 + $0x8] sm:$0xff]  ;;  %v1210_v28 = vld [vmem:[%s3466_s26 + $0x18] sm:$0xff]  ;;  %v1209_v29 = vld [vmem:[%s3466_s26 + $0x10] sm:$0xff]  ;;  %v3090_v32 = vpack.i.bf16 %v1212_v24, %v1211_v25 }
  0x1a   : > { %v1208_v30 = vld [vmem:[%s3466_s26 + $0x8] sm:$0xff]  ;;  %v1207_v31 = vld [vmem:[%s3466_s26] sm:$0xff]  ;;  %v3085_v35 = vpack.i.bf16 %v1210_v28, %v1209_v29 }
  0x1b   : > { %765 = vmatpush.msra.mxu1 %v1212_v24  ;;  %v3080_v33 = vpack.i.bf16 %v1208_v30, %v1207_v31 }
  0x1c   : > { %862 = vrot.lane.b32.xlu0 %v3438_v11, %s3359_s20  ;;  %860 = vrot.lane.b32.xlu1 %v3440_v12, %s3359_s20 }
  0x1d   : > { %858 = vrot.lane.b32.xlu2 %v3442_v13, %s3359_s20  ;;  %2931 = vmatpush.xpose.msk.msra.mxu0 %vm391_vm0, %v3447_v14 }
  0x1e   : > { %766 = vmatpush.msra.mxu1 %v1211_v25 }
  0x20   : > { %767 = vmatpush.msra.mxu1 %v1210_v28 }
  0x21   : > { %2932 = vmatpush.xpose.msk.msra.mxu0 %vm391_vm0, %v3458_v17 }
  0x22   : > { %768 = vmatpush.msra.mxu1 %v1209_v29 }
  0x24   : > { %876 = vrot.lane.b32.xlu0 %v3469_v19, %s3359_s20  ;;  %866 = vrot.lane.b32.xlu1 %v3460_v18, %s3359_s20 }
  0x25   : > { %864 = vrot.lane.b32.xlu2 %v3471_v20, %s3359_s20  ;;  %2933 = vmatpush.xpose.msk.msra.mxu0 %vm391_vm0, %v839_v23 }
  0x26   : > { %769 = vmatpush.msra.mxu1 %v1208_v30 }
  0x28   : > { %770 = vmatpush.msra.mxu1 %v1207_v31 }
  0x29   : > { %2934 = vmatpush.xpose.msk.msra.mxu0 %vm391_vm0, %v3488_v26 }
  0x2c   : > { %882 = vrot.lane.b32.xlu0 %v839_v23, %s3359_s20  ;;  %880 = vrot.lane.b32.xlu1 %v3488_v26, %s3359_s20 }
  0x2d   : > { %878 = vrot.lane.b32.xlu2 %v837_v27, %s3359_s20  ;;  %2935 = vmatpush.xpose.msk.msra.mxu0 %vm391_vm0, %v837_v27 }
  0x31   : > { %2936 = vmatpush.xpose.msk.msra.mxu0 %vm391_vm0, %v3469_v19 }
  0x34   : > { %888 = vrot.lane.b32.xlu0 %v3436_v10, %s3359_s20  ;;  %886 = vrot.lane.b32.xlu1 %v3447_v14, %s3359_s20 }
  0x35   : > { %884 = vrot.lane.b32.xlu2 %v3458_v17, %s3359_s20  ;;  %2937 = vmatmul.msk.f32.vlgmr.msra.gmra.mxu0 %vm391_vm0, %v3416_v5 }
  0x3c   : > { %3091 = vrot.lane.b32.xlu0 %v3090_v32, %s3359_s20  ;;  %3081 = vrot.lane.b32.xlu1 %v3080_v33, %s3359_s20 }
  0x3d   : > { %890 = vrot.lane.b32.xlu2 %v3431_v8, %s3359_s20  ;;  %2938 = vmatmul.msk.f32.gmra.mxu0 %vm391_vm0, %v3414_v4 }
  0x44   : > { %1405 = vrot.lane.b32.xlu0 %v3412_v3, %s3360_s27  ;;  %3096 = vrot.lane.b32.xlu1 %v3095_v34, %s3359_s20 }
  0x45   : > { %3086 = vrot.lane.b32.xlu2 %v3085_v35, %s3359_s20  ;;  %2939 = vmatmul.msk.f32.gmra.mxu0 %vm391_vm0, %v3412_v3 }
  0x4c   : > { %1411 = vrot.lane.b32.xlu0 %v3438_v11, %s3360_s27  ;;  %1401 = vrot.lane.b32.xlu1 %v3416_v5, %s3360_s27 }
  0x4d   : > { %1403 = vrot.lane.b32.xlu2 %v3414_v4, %s3360_s27  ;;  %2940 = vmatmul.msk.f32.gmra.mxu0 %vm391_vm0, %v3442_v13 }
  0x54   : > { %1425 = vrot.lane.b32.xlu0 %v3469_v19, %s3360_s27  ;;  %1407 = vrot.lane.b32.xlu1 %v3442_v13, %s3360_s27 }
  0x55   : > { %1409 = vrot.lane.b32.xlu2 %v3440_v12, %s3360_s27  ;;  %2941 = vmatmul.msk.f32.gmra.mxu0 %vm391_vm0, %v3440_v12 }
  0x5c   : > { %1431 = vrot.lane.b32.xlu0 %v839_v23, %s3360_s27  ;;  %1413 = vrot.lane.b32.xlu1 %v3471_v20, %s3360_s27 }
  0x5d   : > { %1415 = vrot.lane.b32.xlu2 %v3460_v18, %s3360_s27  ;;  %2942 = vmatmul.msk.f32.gmra.mxu0 %vm391_vm0, %v3438_v11 }
  0x64   : > { %1437 = vrot.lane.b32.xlu0 %v3436_v10, %s3360_s27  ;;  %1427 = vrot.lane.b32.xlu1 %v837_v27, %s3360_s27 }
  0x65   : > { %1429 = vrot.lane.b32.xlu2 %v3488_v26, %s3360_s27  ;;  %2943 = vmatmul.msk.f32.gmra.mxu0 %vm391_vm0, %v3471_v20 }
  0x6c   : > { %1986 = vrot.lane.b32.xlu0 %v3436_v10, %s3361_s28  ;;  %1433 = vrot.lane.b32.xlu1 %v3458_v17, %s3360_s27 }
  0x6d   : > { %1435 = vrot.lane.b32.xlu2 %v3447_v14, %s3360_s27  ;;  %2944 = vmatmul.msk.f32.gmra.mxu0 %vm391_vm0, %v3460_v18 }
  0x6f   : > { %v3562_v36 = vpop.permute.xlu2 %852 }
  0x74   : > { %1980 = vrot.lane.b32.xlu0 %v839_v23, %s3361_s28  ;;  %1439 = vrot.lane.b32.xlu1 %v3431_v8, %s3360_s27 }
  0x75   : > { %1988 = vrot.lane.b32.xlu2 %v3431_v8, %s3361_s28 }
  0x77   : > { %v3569_v37 = vpop.permute.xlu2 %858 }
  0x7c   : > { %1976 = vrot.lane.b32.xlu0 %v837_v27, %s3361_s28  ;;  %1984 = vrot.lane.b32.xlu1 %v3447_v14, %s3361_s28 }
  0x7d   : > { %1982 = vrot.lane.b32.xlu2 %v3458_v17, %s3361_s28 }
  0x7f   : > { %v3576_v38 = vpop.permute.xlu2 %864 }
  0x84   : > { %3106 = vrot.lane.b32.xlu0 %v3085_v35, %s3360_s27  ;;  %1978 = vrot.lane.b32.xlu1 %v3488_v26, %s3361_s28 }
  0x85   : > { %3101 = vrot.lane.b32.xlu2 %v3080_v33, %s3360_s27 }
  0x86   : > { %v3582_v39 = vpop.permute.xlu0 %856  ;;  %v3584_v40 = vpop.permute.xlu1 %854 }
  0x87   : > { %v879_v41 = vpop.permute.xlu2 %878 }
  0x8c   : > { %3111 = vrot.lane.b32.xlu0 %v3090_v32, %s3360_s27  ;;  %1974 = vrot.lane.b32.xlu1 %v3469_v19, %s3361_s28 }
  0x8d   : > { %1950 = vrot.lane.b32.xlu2 %v3416_v5, %s3361_s28 }
  0x8e   : > { %v3591_v42 = vpop.permute.xlu0 %862  ;;  %v3593_v43 = vpop.permute.xlu1 %860 }
  0x8f   : > { %v885_v44 = vpop.permute.xlu2 %884 }
  0x94   : > { %1958 = vrot.lane.b32.xlu0 %v3440_v12, %s3361_s28  ;;  %1952 = vrot.lane.b32.xlu1 %v3414_v4, %s3361_s28 }
  0x95   : > { %1954 = vrot.lane.b32.xlu2 %v3412_v3, %s3361_s28 }
  0x96   : > { %v877_v45 = vpop.permute.xlu0 %876  ;;  %v3601_v46 = vpop.permute.xlu1 %866 }
  0x97   : > { %v891_v47 = vpop.permute.xlu2 %890 }
  0x98   : > { %2953 = vmatpush.xpose.msk.msra.mxu2 %vm391_vm0, %v891_v47 }
  0x9c   : > { %1964 = vrot.lane.b32.xlu0 %v3460_v18, %s3361_s28  ;;  %1956 = vrot.lane.b32.xlu1 %v3442_v13, %s3361_s28 }
  0x9d   : > { %3116 = vrot.lane.b32.xlu2 %v3095_v34, %s3360_s27 }
  0x9e   : > { %v883_v48 = vpop.permute.xlu0 %882  ;;  %v881_v49 = vpop.permute.xlu1 %880 }
  0x9f   : > { %v3087_v50 = vpop.permute.xlu2 %3086 }
  0xa0   : > { %v3089_v5 = vunpack.i.h.bf16 %v3087_v50  ;;  %v3088_v8 = vunpack.i.l.bf16 %v3087_v50  ;;  %v3362_v50 = vmov -inf  }
  0xa1   : > { %294 = vst.msk [vmem:[#allocation2] sm:$0xff] %vm293_vm2, %v3362_v50 }
  0xa2   : > { %295 = vst.msk [vmem:[#allocation2 + $0x8] sm:$0xff] %vm293_vm2, %v3362_v50 }
  0xa3   : > { %296 = vst.msk [vmem:[#allocation2 + $0x10] sm:$0xff] %vm293_vm2, %v3362_v50 }
  0xa4   : > { %297 = vst.msk [vmem:[#allocation2 + $0x18] sm:$0xff] %vm293_vm2, %v3362_v50 }
  0xa5   : > { %1960 = vrot.lane.b32.xlu2 %v3438_v11, %s3361_s28  ;;  %298 = vst.msk [vmem:[#allocation2 + $0x20] sm:$0xff] %vm293_vm2, %v3362_v50 }
  0xa6   : > { %v889_v51 = vpop.permute.xlu0 %888  ;;  %v887_v52 = vpop.permute.xlu1 %886  ;;  %299 = vst.msk [vmem:[#allocation2 + $0x28] sm:$0xff] %vm293_vm2, %v3362_v50 }
  0xa7   : > { %2954 = vmatpush.xpose.msk.msra.mxu2 %vm391_vm0, %v889_v51  ;;  %v3612_v53 = vpop.permute.xlu2 %1403  ;;  %300 = vst.msk [vmem:[#allocation2 + $0x30] sm:$0xff] %vm293_vm2, %v3362_v50 }
  0xa8   : > { %301 = vst.msk [vmem:[#allocation2 + $0x38] sm:$0xff] %vm293_vm2, %v3362_v50 }
  0xa9   : > { %302 = vst.msk [vmem:[#allocation2 + $0x40] sm:$0xff] %vm293_vm2, %v3362_v50 }
  0xaa   : > { %303 = vst.msk [vmem:[#allocation2 + $0x48] sm:$0xff] %vm293_vm2, %v3362_v50 }
  0xab   : > { %2955 = vmatpush.xpose.msk.msra.mxu2 %vm391_vm0, %v887_v52  ;;  %304 = vst.msk [vmem:[#allocation2 + $0x50] sm:$0xff] %vm293_vm2, %v3362_v50 }
  0xac   : > { %305 = vst.msk [vmem:[#allocation2 + $0x58] sm:$0xff] %vm293_vm2, %v3362_v50 }
  0xad   : > { %1962 = vrot.lane.b32.xlu2 %v3471_v20, %s3361_s28  ;;  %306 = vst.msk [vmem:[#allocation2 + $0x60] sm:$0xff] %vm293_vm2, %v3362_v50 }
  0xae   : > { %v3092_v54 = vpop.permute.xlu0 %3091  ;;  %v3082_v55 = vpop.permute.xlu1 %3081  ;;  %307 = vst.msk [vmem:[#allocation2 + $0x68] sm:$0xff] %vm293_vm2, %v3362_v50 }
  0xaf   : > { %2956 = vmatpush.xpose.msk.msra.mxu2 %vm391_vm0, %v885_v44  ;;  %v3618_v56 = vpop.permute.xlu2 %1409  ;;  %v3094_v62 = vunpack.i.h.bf16 %v3092_v54  ;;  %v3093_v63 = vunpack.i.l.bf16 %v3092_v54  ;;  %v3084_v11 = vunpack.i.h.bf16 %v3082_v55  ;;  %v3083_v12 = vunpack.i.l.bf16 %v3082_v55  ;;  %308 = vst.msk [vmem:[#allocation2 + $0x70] sm:$0xff] %vm293_vm2, %v3362_v50 }
  0xb0   : > { %309 = vst.msk [vmem:[#allocation2 + $0x78] sm:$0xff] %vm293_vm2, %v3362_v50  ;;  %v3363_v54 = vmov 0  }
  0xb1   : > { %310 = vst.msk [vmem:[#allocation2 + $0x80] sm:$0xff] %vm293_vm2, %v3362_v50  ;;  %3120 = vset.pattern.permute.xlu2 %v3363_v54  ;;  %3121 = vset.pattern.permute.xlu0 %v3363_v54 }
  0xb2   : > { %v3627_v0 = vpop.f32.mrf.mxu0  ;;  %311 = vst.msk [vmem:[#allocation2 + $0x88] sm:$0xff] %vm293_vm2, %v3362_v50  ;;  %3122 = vset.pattern.permute.xlu1 %v3363_v54 }
  0xb3   : > { %2957 = vmatpush.xpose.msk.msra.mxu2 %vm391_vm0, %v883_v48  ;;  %v490_v4 = vsel %vm489_vm1, %v3627_v0, -inf  ;;  %312 = vst.msk [vmem:[#allocation2 + $0x90] sm:$0xff] %vm293_vm2, %v3362_v50 }
  0xb4   : > { %313 = vst.msk [vmem:[#allocation2 + $0x98] sm:$0xff] %vm293_vm2, %v3362_v50 }
  0xb5   : > { %314 = vst.msk [vmem:[#allocation2 + $0xa0] sm:$0xff] %vm293_vm2, %v3362_v50 }
  0xb6   : > { %v3621_v57 = vpop.permute.xlu0 %1405  ;;  %v3097_v58 = vpop.permute.xlu1 %3096  ;;  %315 = vst.msk [vmem:[#allocation2 + $0xa8] sm:$0xff] %vm293_vm2, %v3362_v50 }
  0xb7   : > { %2958 = vmatpush.xpose.msk.msra.mxu2 %vm391_vm0, %v881_v49  ;;  %v3099_v59 = vunpack.i.h.bf16 %v3097_v58  ;;  %v3624_v60 = vpop.permute.xlu2 %1415  ;;  %v3098_v61 = vunpack.i.l.bf16 %v3097_v58  ;;  %316 = vst.msk [vmem:[#allocation2 + $0xb0] sm:$0xff] %vm293_vm2, %v3362_v50 }
  0xb8   : > { %317 = vst.msk [vmem:[#allocation2 + $0xb8] sm:$0xff] %vm293_vm2, %v3362_v50 }
  0xb9   : > { %1279 = vmatpush.msra.mxu3 %v3099_v59  ;;  %318 = vst.msk [vmem:[#allocation2 + $0xc0] sm:$0xff] %vm293_vm2, %v3362_v50 }
  0xba   : > { %v3644_v10 = vpop.f32.mrf.mxu0  ;;  %319 = vst.msk [vmem:[#allocation2 + $0xc8] sm:$0xff] %vm293_vm2, %v3362_v50 }
  0xbb   : > { %2959 = vmatpush.xpose.msk.msra.mxu2 %vm391_vm0, %v879_v41  ;;  %1280 = vmatpush.msra.mxu3 %v3098_v61  ;;  %v493_v13 = vsel %vm489_vm1, %v3644_v10, -inf  ;;  %320 = vst.msk [vmem:[#allocation2 + $0xd0] sm:$0xff] %vm293_vm2, %v3362_v50 }
  0xbc   : > { %321 = vst.msk [vmem:[#allocation2 + $0xd8] sm:$0xff] %vm293_vm2, %v3362_v50 }
  0xbd   : > { %1281 = vmatpush.msra.mxu3 %v3094_v62  ;;  %322 = vst.msk [vmem:[#allocation2 + $0xe0] sm:$0xff] %vm293_vm2, %v3362_v50 }
  0xbe   : > { %v3629_v1 = vpop.permute.xlu0 %1411  ;;  %v3631_v2 = vpop.permute.xlu1 %1401  ;;  %323 = vst.msk [vmem:[#allocation2 + $0xe8] sm:$0xff] %vm293_vm2, %v3362_v50 }
  0xbf   : > { %2960 = vmatpush.xpose.msk.msra.mxu2 %vm391_vm0, %v877_v45  ;;  %1282 = vmatpush.msra.mxu3 %v3093_v63  ;;  %v3634_v3 = vpop.permute.xlu2 %1429  ;;  %324 = vst.msk [vmem:[#allocation2 + $0xf0] sm:$0xff] %vm293_vm2, %v3362_v50  ;;  %v3364_v63 = vmov 0.0  }
  0xc0   : > { %325 = vst.msk [vmem:[#allocation2 + $0xf8] sm:$0xff] %vm293_vm2, %v3362_v50 }
  0xc1   : > { %1283 = vmatpush.msra.mxu3 %v3089_v5  ;;  %326 = vst.msk [vmem:[#allocation3] sm:$0xff] %vm293_vm2, %v3364_v63 }
  0xc2   : > { %2961 = vmatmul.msk.f32.vlgmr.msra.gmra.mxu2 %vm391_vm0, %v3562_v36  ;;  %v3654_v17 = vpop.f32.mrf.mxu0  ;;  %327 = vst.msk [vmem:[#allocation3 + $0x8] sm:$0xff] %vm293_vm2, %v3364_v63 }
  0xc3   : > { %1284 = vmatpush.msra.mxu3 %v3088_v8  ;;  %v496_v18 = vsel %vm489_vm1, %v3654_v17, -inf  ;;  %328 = vst.msk [vmem:[#allocation3 + $0x10] sm:$0xff] %vm293_vm2, %v3364_v63  ;;  %v482_v8 = vld [vmem:[#allocation2 + $0x8] sm:$0xff] }
  0xc4   : > { %329 = vst.msk [vmem:[#allocation3 + $0x18] sm:$0xff] %vm293_vm2, %v3364_v63 }
  0xc5   : > { %1285 = vmatpush.msra.mxu3 %v3084_v11  ;;  %330 = vst.msk [vmem:[#allocation3 + $0x20] sm:$0xff] %vm293_vm2, %v3364_v63 }
  0xc6   : > { %v3640_v6 = vpop.permute.xlu0 %1425  ;;  %v3642_v7 = vpop.permute.xlu1 %1407  ;;  %491 = vmax.xlane.f32.xlu0 %v490_v4  ;;  %497 = vmax.xlane.f32.xlu1 %v496_v18  ;;  %331 = vst.msk [vmem:[#allocation3 + $0x28] sm:$0xff] %vm293_vm2, %v3364_v63  ;;  %v481_v4 = vld [vmem:[#allocation2] sm:$0xff] }
  0xc7   : > { %v1436_v9 = vpop.permute.xlu2 %1435  ;;  %1286 = vmatpush.msra.mxu3 %v3083_v12  ;;  %332 = vst.msk [vmem:[#allocation3 + $0x30] sm:$0xff] %vm293_vm2, %v3364_v63 }
  0xc8   : > { %333 = vst.msk [vmem:[#allocation3 + $0x38] sm:$0xff] %vm293_vm2, %v3364_v63 }
  0xc9   : > { %334 = vst.msk [vmem:[#allocation3 + $0x40] sm:$0xff] %vm293_vm2, %v3364_v63 }
  0xca   : > { %2962 = vmatmul.msk.f32.gmra.mxu2 %vm391_vm0, %v3584_v40  ;;  %v3677_v28 = vpop.f32.mrf.mxu0  ;;  %335 = vst.msk [vmem:[#allocation3 + $0x48] sm:$0xff] %vm293_vm2, %v3364_v63 }
  0xcb   : > { %336 = vst.msk [vmem:[#allocation3 + $0x50] sm:$0xff] %vm293_vm2, %v3364_v63 }
  0xcc   : > { %337 = vst.msk [vmem:[#allocation3 + $0x58] sm:$0xff] %vm293_vm2, %v3364_v63 }
  0xcd   : > { %338 = vst.msk [vmem:[#allocation3 + $0x60] sm:$0xff] %vm293_vm2, %v3364_v63 }
  0xce   : > { %v1432_v14 = vpop.permute.xlu0 %1431  ;;  %v3650_v15 = vpop.permute.xlu1 %1413  ;;  %494 = vmax.xlane.f32.xlu0 %v493_v13  ;;  %339 = vst.msk [vmem:[#allocation3 + $0x68] sm:$0xff] %vm293_vm2, %v3364_v63 }
  0xcf   : > { %v3652_v16 = vpop.permute.xlu2 %1988  ;;  %340 = vst.msk [vmem:[#allocation3 + $0x70] sm:$0xff] %vm293_vm2, %v3364_v63 }
  0xd0   : > { %3001 = vmatpush.xpose.msk.msrb.mxu0 %vm391_vm0, %v3652_v16  ;;  %341 = vst.msk [vmem:[#allocation3 + $0x78] sm:$0xff] %vm293_vm2, %v3364_v63 }
  0xd1   : > { %342 = vst.msk [vmem:[#allocation3 + $0x80] sm:$0xff] %vm293_vm2, %v3364_v63 }
  0xd2   : > { %2963 = vmatmul.msk.f32.gmra.mxu2 %vm391_vm0, %v3582_v39  ;;  %v3689_v32 = vpop.f32.mrf.mxu0  ;;  %343 = vst.msk [vmem:[#allocation3 + $0x88] sm:$0xff] %vm293_vm2, %v3364_v63 }
  0xd3   : > { %v502_v33 = vsel %vm489_vm1, %v3689_v32, -inf  ;;  %344 = vst.msk [vmem:[#allocation3 + $0x90] sm:$0xff] %vm293_vm2, %v3364_v63 }
  0xd4   : > { %345 = vst.msk [vmem:[#allocation3 + $0x98] sm:$0xff] %vm293_vm2, %v3364_v63 }
  0xd5   : > { %346 = vst.msk [vmem:[#allocation3 + $0xa0] sm:$0xff] %vm293_vm2, %v3364_v63 }
  0xd6   : > { %v1438_v19 = vpop.permute.xlu0 %1437  ;;  %v1428_v20 = vpop.permute.xlu1 %1427  ;;  %503 = vmax.xlane.f32.xlu2 %v502_v33  ;;  %347 = vst.msk [vmem:[#allocation3 + $0xa8] sm:$0xff] %vm293_vm2, %v3364_v63 }
  0xd7   : > { %v3662_v21 = vpop.permute.xlu2 %1982  ;;  %348 = vst.msk [vmem:[#allocation3 + $0xb0] sm:$0xff] %vm293_vm2, %v3364_v63 }
  0xd8   : > { %349 = vst.msk [vmem:[#allocation3 + $0xb8] sm:$0xff] %vm293_vm2, %v3364_v63 }
  0xd9   : > { %350 = vst.msk [vmem:[#allocation3 + $0xc0] sm:$0xff] %vm293_vm2, %v3364_v63 }
  0xda   : > { %2964 = vmatmul.msk.f32.gmra.mxu2 %vm391_vm0, %v3569_v37  ;;  %v499_v37 = vsel %vm489_vm1, %v3677_v28, -inf  ;;  %v3705_v39 = vpop.f32.mrf.mxu0  ;;  %351 = vst.msk [vmem:[#allocation3 + $0xc8] sm:$0xff] %vm293_vm2, %v3364_v63 }
  0xdb   : > { %500 = vmax.xlane.f32.xlu1 %v499_v37  ;;  %v505_v41 = vsel %vm489_vm1, %v3705_v39, -inf  ;;  %352 = vst.msk [vmem:[#allocation3 + $0xd0] sm:$0xff] %vm293_vm2, %v3364_v63 }
  0xdc   : > { %353 = vst.msk [vmem:[#allocation3 + $0xd8] sm:$0xff] %vm293_vm2, %v3364_v63 }
  0xdd   : > { %354 = vst.msk [vmem:[#allocation3 + $0xe0] sm:$0xff] %vm293_vm2, %v3364_v63 }
  0xde   : > { %v3666_v22 = vpop.permute.xlu0 %1986  ;;  %v1434_v23 = vpop.permute.xlu1 %1433  ;;  %506 = vmax.xlane.f32.xlu2 %v505_v41  ;;  %355 = vst.msk [vmem:[#allocation3 + $0xe8] sm:$0xff] %vm293_vm2, %v3364_v63  ;;  %v484_v41 = vld [vmem:[#allocation2 + $0x18] sm:$0xff] }
  0xdf   : > { %3002 = vmatpush.xpose.msk.msrb.mxu0 %vm391_vm0, %v3666_v22  ;;  %v3670_v24 = vpop.permute.xlu2 %3101  ;;  %356 = vst.msk [vmem:[#allocation3 + $0xf0] sm:$0xff] %vm293_vm2, %v3364_v63 }
  0xe0   : > { %v3104_v61 = vunpack.i.h.bf16 %v3670_v24  ;;  %v3103_v62 = vunpack.i.l.bf16 %v3670_v24  ;;  %357 = vst.msk [vmem:[#allocation3 + $0xf8] sm:$0xff] %vm293_vm2, %v3364_v63 }
  0xe1   : > { %360 = vst.msk [vmem:[#allocation4 + $0x8] sm:$0xff] %vm358_vm3, %v3364_v63 }
  0xe2   : > { %2965 = vmatmul.msk.f32.gmra.mxu2 %vm391_vm0, %v3593_v43  ;;  %v3725_v48 = vpop.f32.mrf.mxu0  ;;  %359 = vst.msk [vmem:[#allocation4] sm:$0xff] %vm358_vm3, %v3364_v63 }
  0xe3   : > { %v508_v49 = vsel %vm489_vm1, %v3725_v48, -inf  ;;  %361 = vst.msk [vmem:[#allocation4 + $0x10] sm:$0xff] %vm358_vm3, %v3364_v63 }
  0xe4   : > { %509 = vmax.xlane.f32.xlu0 %v508_v49  ;;  %362 = vst.msk [vmem:[#allocation4 + $0x18] sm:$0xff] %vm358_vm3, %v3364_v63 }
  0xe5   : > { %363 = vst.msk [vmem:[#allocation4 + $0x20] sm:$0xff] %vm358_vm3, %v3364_v63 }
  0xe6   : > { %v3674_v25 = vpop.permute.xlu0 %1980  ;;  %v1440_v26 = vpop.permute.xlu1 %1439  ;;  %364 = vst.msk [vmem:[#allocation4 + $0x28] sm:$0xff] %vm358_vm3, %v3364_v63 }
  0xe7   : > { %2977 = vmatpush.xpose.msk.msrb.mxu1 %vm391_vm0, %v1440_v26  ;;  %v1951_v27 = vpop.permute.xlu2 %1950  ;;  %365 = vst.msk [vmem:[#allocation4 + $0x30] sm:$0xff] %vm358_vm3, %v3364_v63 }
  0xe8   : > { %366 = vst.msk [vmem:[#allocation4 + $0x38] sm:$0xff] %vm358_vm3, %v3364_v63 }
  0xea   : > { %2966 = vmatmul.msk.f32.gmra.mxu2 %vm391_vm0, %v3591_v42  ;;  %v3754_v55 = vpop.f32.mrf.mxu0 }
  0xeb   : > { %2978 = vmatpush.xpose.msk.msrb.mxu1 %vm391_vm0, %v1438_v19  ;;  %v511_v58 = vsel %vm489_vm1, %v3754_v55, -inf }
  0xec   : > { %512 = vmax.xlane.f32.xlu1 %v511_v58 }
  0xee   : > { %v3682_v29 = vpop.permute.xlu0 %1976  ;;  %v3684_v30 = vpop.permute.xlu1 %1984 }
  0xef   : > { %2979 = vmatpush.xpose.msk.msrb.mxu1 %vm391_vm0, %v1436_v9  ;;  %3003 = vmatpush.xpose.msk.msrb.mxu0 %vm391_vm0, %v3684_v30  ;;  %v1955_v31 = vpop.permute.xlu2 %1954 }
  0xf2   : > { %2967 = vmatmul.msk.f32.gmra.mxu2 %vm391_vm0, %v3576_v38 }
  0xf3   : > { %2980 = vmatpush.xpose.msk.msrb.mxu1 %vm391_vm0, %v1434_v23  ;;  %3004 = vmatpush.xpose.msk.msrb.mxu0 %vm391_vm0, %v3662_v21 }
  0xf6   : > { %v3107_v34 = vpop.permute.xlu0 %3106  ;;  %v3698_v35 = vpop.permute.xlu1 %1978 }
  0xf7   : > { %2981 = vmatpush.xpose.msk.msrb.mxu1 %vm391_vm0, %v1432_v14  ;;  %3005 = vmatpush.xpose.msk.msrb.mxu0 %vm391_vm0, %v3674_v25  ;;  %v3117_v36 = vpop.permute.xlu2 %3116  ;;  %v3108_v47 = vunpack.i.l.bf16 %v3107_v34  ;;  %v483_v14 = vld [vmem:[#allocation2 + $0x10] sm:$0xff] }
  0xf8   : > { %v3119_v38 = vunpack.i.h.bf16 %v3117_v36  ;;  %v3118_v40 = vunpack.i.l.bf16 %v3117_v36  ;;  %v3852_v36 = vld [vmem:[#allocation2 + $0x20] sm:$0xff] }
  0xfa   : > { %2968 = vmatmul.msk.f32.gmra.mxu2 %vm391_vm0, %v3601_v46  ;;  %1828 = vmatpush.msrb.mxu3 %v3119_v38  ;;  %v3109_v46 = vunpack.i.h.bf16 %v3107_v34 }
  0xfb   : > { %2982 = vmatpush.xpose.msk.msrb.mxu1 %vm391_vm0, %v3634_v3  ;;  %3006 = vmatpush.xpose.msk.msrb.mxu0 %vm391_vm0, %v3698_v35 }
  0xfc   : > { %1829 = vmatpush.msrb.mxu3 %v3118_v40 }
  0xfe   : > { %v3112_v42 = vpop.permute.xlu0 %3111  ;;  %v3718_v44 = vpop.permute.xlu1 %1974 }
  0xff   : > { %2983 = vmatpush.xpose.msk.msrb.mxu1 %vm391_vm0, %v1428_v20  ;;  %3007 = vmatpush.xpose.msk.msrb.mxu0 %vm391_vm0, %v3682_v29  ;;  %v3114_v43 = vunpack.i.h.bf16 %v3112_v42  ;;  %v3113_v45 = vunpack.i.l.bf16 %v3112_v42  ;;  %v1961_v24 = vpop.permute.xlu2 %1960 }
 0x101   : > { %1830 = vmatpush.msrb.mxu3 %v3114_v43 }
 0x103   : > { %2984 = vmatpush.xpose.msk.msrb.mxu1 %vm391_vm0, %v3640_v6  ;;  %1831 = vmatpush.msrb.mxu3 %v3113_v45 }
 0x104   : > { %3008 = vmatpush.xpose.msk.msrb.mxu0 %vm391_vm0, %v3718_v44 }
 0x105   : > { %1832 = vmatpush.msrb.mxu3 %v3109_v46  ;;  %v3863_v46 = vld [vmem:[#allocation2 + $0x28] sm:$0xff] }
 0x106   : > { %v1953_v51 = vpop.permute.xlu1 %1952  ;;  %v1959_v59 = vpop.permute.xlu0 %1958 }
 0x107   : > { %3009 = vmatmul.msk.f32.vlgmr.msrb.gmra.mxu0 %vm391_vm0, %v1951_v27  ;;  %1833 = vmatpush.msrb.mxu3 %v3108_v47  ;;  %v1963_v27 = vpop.permute.xlu2 %1962 }
 0x109   : > { %1834 = vmatpush.msrb.mxu3 %v3104_v61  ;;  %v3880_v61 = vld [vmem:[#allocation2 + $0x30] sm:$0xff] }
 0x10b   : > { %1835 = vmatpush.msrb.mxu3 %v3103_v62 }
 0x10e   : > { %v1957_v52 = vpop.permute.xlu1 %1956  ;;  %v3789_v3 = vpop.permute.xlu0 %1964 }
 0x10f   : > { %3010 = vmatmul.msk.f32.gmra.mxu0 %vm391_vm0, %v1953_v51 }
 0x117   : > { %3011 = vmatmul.msk.f32.gmra.mxu0 %vm391_vm0, %v1955_v31 }
 0x11f   : > { %3012 = vmatmul.msk.f32.gmra.mxu0 %vm391_vm0, %v1957_v52 }
 0x127   : > { %3013 = vmatmul.msk.f32.gmra.mxu0 %vm391_vm0, %v1959_v59 }
 0x12f   : > { %3014 = vmatmul.msk.f32.gmra.mxu0 %vm391_vm0, %v1961_v24 }
 0x137   : > { %3015 = vmatmul.msk.f32.gmra.mxu0 %vm391_vm0, %v1963_v27  ;;  %v3936_v27 = vld [vmem:[#allocation2 + $0x40] sm:$0xff] }
 0x139   : > { %v492_v5 = vpop.xlane.xlu0 %491  ;;  %v498_v18 = vpop.xlane.xlu1 %497 }
 0x13a   : > { %v514_v6 = vmax.f32 %v481_v4, %v492_v5  ;;  %v516_v23 = vmax.f32 %v483_v14, %v498_v18 }
 0x13c   : > { %812 = vst.msk [vmem:[#allocation2] sm:$0xff] %vm293_vm2, %v514_v6  ;;  %548 = vperm.xlu2 %3120, %v514_v6   ;;  %v522_v31 = vsub.f32 %v481_v4, %v514_v6  ;;  %v524_v51 = vsub.f32 %v483_v14, %v516_v23 }
 0x13d   : > { %814 = vst.msk [vmem:[#allocation2 + $0x10] sm:$0xff] %vm293_vm2, %v516_v23 }
 0x13e   : > { %v530_v33 = vmul.f32 1.442695, %v522_v31  ;;  %v534_v54 = vmul.f32 1.442695, %v524_v51 }
 0x141   : > { %v495_v9 = vpop.xlane.xlu0 %494 }
 0x142   : > { %v515_v11 = vmax.f32 %v482_v8, %v495_v9 }
 0x144   : > { %v523_v12 = vsub.f32 %v482_v8, %v515_v11  ;;  %813 = vst.msk [vmem:[#allocation2 + $0x8] sm:$0xff] %vm293_vm2, %v515_v11  ;;  %553 = vperm.xlu0 %3121, %v515_v11   ;;  %v3899_v8 = vld [vmem:[#allocation2 + $0x38] sm:$0xff] }
 0x145   : > { %v3829_v13 = vpop.f32.mrf.mxu2 }
 0x146   : > { %v532_v19 = vmul.f32 1.442695, %v523_v12  ;;  %v974_v20 = vsel %vm489_vm1, %v3829_v13, -inf }
 0x147   : > { %975 = vmax.xlane.f32.xlu1 %v974_v20 }
 0x148   : > { %3143 = vpow2.f32 %v532_v19 }
 0x149   : > { %3145 = vpow2.f32 %v530_v33  ;;  %v504_v37 = vpop.xlane.xlu2 %503 }
 0x14a   : > { %v3855_v38 = vmax.f32 %v3852_v36, %v504_v37  ;;  %3147 = vpow2.f32 %v534_v54 }
 0x14c   : > { %v526_v40 = vsub.f32 %v3852_v36, %v3855_v38  ;;  %816 = vst.msk [vmem:[#allocation2 + $0x20] sm:$0xff] %vm293_vm2, %v3855_v38 }
 0x14d   : > { %v3861_v42 = vpop.f32.mrf.mxu2 }
 0x14e   : > { %v3845_v26 = vpop.eup %3143  ;;  %v501_v43 = vpop.xlane.xlu1 %500  ;;  %v977_v49 = vsel %vm489_vm1, %v3861_v42, -inf }
 0x14f   : > { %682 = vperm.xlu2 %3120, %v3845_v26   ;;  %v3849_v34 = vpop.eup %3145  ;;  %v517_v45 = vmax.f32 %v484_v41, %v501_v43 }
 0x150   : > { %v3877_v59 = vpop.eup %3147 }
 0x151   : > { %v507_v47 = vpop.xlane.xlu2 %506  ;;  %815 = vst.msk [vmem:[#allocation2 + $0x18] sm:$0xff] %vm293_vm2, %v517_v45  ;;  %v525_v18 = vsub.f32 %v484_v41, %v517_v45 }
 0x152   : > { %v3868_v50 = vmax.f32 %v3863_v46, %v507_v47 }
 0x153   : > { %v536_v19 = vmul.f32 1.442695, %v525_v18 }
 0x154   : > { %817 = vst.msk [vmem:[#allocation2 + $0x28] sm:$0xff] %vm293_vm2, %v3868_v50  ;;  %v527_v37 = vsub.f32 %v3863_v46, %v3868_v50 }
 0x155   : > { %v3873_v52 = vpop.f32.mrf.mxu2 }
 0x156   : > { %v980_v58 = vsel %vm489_vm1, %v3873_v52, -inf }
 0x157   : > { %v510_v62 = vpop.xlane.xlu0 %509 }
 0x158   : > { %v3884_v4 = vmax.f32 %v3880_v61, %v510_v62 }
 0x15a   : > { %818 = vst.msk [vmem:[#allocation2 + $0x30] sm:$0xff] %vm293_vm2, %v3884_v4 }
 0x15d   : > { %v3895_v5 = vpop.f32.mrf.mxu2 }
 0x15e   : > { %v983_v6 = vsel %vm489_vm1, %v3895_v5, -inf }
 0x15f   : > { %v513_v9 = vpop.xlane.xlu1 %512 }
 0x160   : > { %677 = vperm.xlu1 %3122, %v3849_v34   ;;  %v3902_v11 = vmax.f32 %v3899_v8, %v513_v9 }
 0x162   : > { %819 = vst.msk [vmem:[#allocation2 + $0x38] sm:$0xff] %vm293_vm2, %v3902_v11 }
 0x168   : > { %558 = vperm.xlu1 %3122, %v516_v23   ;;  %v3916_v23 = vpop.f32.mrf.mxu2 }
 0x169   : > { %v986_v24 = vsel %vm489_vm1, %v3916_v23, -inf }
 0x16e   : > { %978 = vmax.xlane.f32.xlu0 %v977_v49  ;;  %v967_v49 = vld [vmem:[#allocation2 + $0x48] sm:$0xff] }
 0x170   : > { %v3943_v33 = vpop.f32.mrf.mxu2 }
 0x178   : > { %981 = vmax.xlane.f32.xlu2 %v980_v58  ;;  %v3964_v41 = vpop.f32.mrf.mxu2 }
 0x182   : > { %687 = vperm.xlu0 %3121, %v3877_v59  }
 0x190   : > { %563 = vperm.xlu2 %3120, %v517_v45   ;;  %v992_v45 = vsel %vm489_vm1, %v3964_v41, -inf }
 0x192   : > { %984 = vmax.xlane.f32.xlu1 %v983_v6  ;;  %v968_v6 = vld [vmem:[#allocation2 + $0x50] sm:$0xff] }
 0x196   : > { %v549_v12 = vpop.permute.xlu2 %548 }
 0x197   : > { %v586_v14 = vsub.f32 %v3627_v0, %v549_v12 }
 0x198   : > { %568 = vperm.xlu2 %3120, %v3855_v38  }
 0x199   : > { %v594_v63 = vmul.f32 1.442695, %v586_v14  ;;  %v528_v14 = vsub.f32 %v3880_v61, %v3884_v4 }
 0x19b   : > { %3149 = vpow2.f32 %v594_v63  ;;  %v529_v63 = vsub.f32 %v3899_v8, %v3902_v11  ;;  %v542_v18 = vmul.f32 1.442695, %v528_v14 }
 0x19c   : > { %3151 = vpow2.f32 %v536_v19 }
 0x19d   : > { %v544_v19 = vmul.f32 1.442695, %v529_v63 }
 0x1a1   : > { %v3908_v20 = vpop.eup %3149 }
 0x1a2   : > { %2945 = vmatmul.msk.f32.vlgmr.msra.gmra.mxu1 %vm489_vm1, %v3908_v20  ;;  %v3918_v0 = vpop.eup %3151 }
 0x1a3   : > { %3031 = vmatpush.xpose.msk.msra.mxu1 %vm391_vm0, %v3652_v16  ;;  %v538_v16 = vmul.f32 1.442695, %v526_v40  ;;  %v540_v40 = vmul.f32 1.442695, %v527_v37 }
 0x1a5   : > { %3153 = vpow2.f32 %v538_v16 }
 0x1a7   : > { %3032 = vmatpush.xpose.msk.msra.mxu1 %vm391_vm0, %v3666_v22 }
 0x1a9   : > { %v3973_v54 = vpop.permute.xlu2 %682 }
 0x1ab   : > { %3033 = vmatpush.xpose.msk.msra.mxu1 %vm391_vm0, %v3684_v30  ;;  %692 = vperm.xlu1 %3122, %v3918_v0  }
 0x1ac   : > { %987 = vmax.xlane.f32.xlu0 %v986_v24 }
 0x1af   : > { %3034 = vmatpush.xpose.msk.msra.mxu1 %vm391_vm0, %v3662_v21 }
 0x1b3   : > { %3035 = vmatpush.xpose.msk.msra.mxu1 %vm391_vm0, %v3674_v25  ;;  %573 = vperm.xlu1 %3122, %v3868_v50  }
 0x1b6   : > { %v554_v22 = vpop.permute.xlu0 %553 }
 0x1b7   : > { %3036 = vmatpush.xpose.msk.msra.mxu1 %vm391_vm0, %v3698_v35  ;;  %v587_v30 = vsub.f32 %v3644_v10, %v554_v22  ;;  %v3949_v10 = vpop.eup %3153 }
 0x1b9   : > { %v596_v31 = vmul.f32 1.442695, %v587_v30 }
 0x1ba   : > { %v976_v21 = vpop.xlane.xlu1 %975 }
 0x1bb   : > { %3155 = vpow2.f32 %v596_v31  ;;  %3037 = vmatpush.xpose.msk.msra.mxu1 %vm391_vm0, %v3682_v29  ;;  %v3941_v25 = vmax.f32 %v3936_v27, %v976_v21  ;;  %v989_v29 = vsel %vm489_vm1, %v3943_v33, -inf }
 0x1bc   : > { %3157 = vpow2.f32 %v540_v40 }
 0x1bd   : > { %v1006_v36 = vsub.f32 %v3936_v27, %v3941_v25  ;;  %1361 = vst.msk [vmem:[#allocation2 + $0x40] sm:$0xff] %vm293_vm2, %v3941_v25 }
 0x1bf   : > { %3038 = vmatpush.xpose.msk.msra.mxu1 %vm391_vm0, %v3718_v44 }
 0x1c0   : > { %697 = vperm.xlu0 %3121, %v3949_v10  }
 0x1c1   : > { %v3956_v35 = vpop.eup %3155  ;;  %990 = vmax.xlane.f32.xlu2 %v989_v29  ;;  %v4006_v29 = vld [vmem:[#allocation2 + $0x58] sm:$0xff] }
 0x1c2   : > { %2946 = vmatmul.msk.f32.gmra.mxu1 %vm489_vm1, %v3956_v35  ;;  %v3970_v51 = vpop.eup %3157 }
 0x1d2   : > { %v3962_v38 = vpop.permute.xlu1 %677 }
 0x1d9   : > { %578 = vperm.xlu2 %3120, %v3884_v4  }
 0x1da   : > { %v559_v44 = vpop.permute.xlu1 %558 }
 0x1db   : > { %v588_v43 = vsub.f32 %v3654_v17, %v559_v44  ;;  %v3978_v17 = vpop.f32.mrf.mxu2 }
 0x1dc   : > { %v995_v62 = vsel %vm489_vm1, %v3978_v17, -inf }
 0x1dd   : > { %v598_v47 = vmul.f32 1.442695, %v588_v43  ;;  %993 = vmax.xlane.f32.xlu1 %v992_v45  ;;  %v629_v45 = vsel %vm489_vm1, %v3956_v35, 0.0 }
 0x1df   : > { %3159 = vpow2.f32 %v598_v47 }
 0x1e0   : > { %3161 = vpow2.f32 %v542_v18 }
 0x1e1   : > { %702 = vperm.xlu2 %3120, %v3970_v51   ;;  %v979_v46 = vpop.xlane.xlu0 %978  ;;  %3163 = vpow2.f32 %v544_v19 }
 0x1e2   : > { %v999_v50 = vmax.f32 %v967_v49, %v979_v46 }
 0x1e4   : > { %1362 = vst.msk [vmem:[#allocation2 + $0x48] sm:$0xff] %vm293_vm2, %v999_v50 }
 0x1e5   : > { %v3976_v58 = vpop.eup %3159 }
 0x1e6   : > { %2947 = vmatmul.msk.f32.gmra.mxu1 %vm489_vm1, %v3976_v58  ;;  %v3995_v31 = vpop.eup %3161  ;;  %v632_v27 = vsel %vm489_vm1, %v3976_v58, 0.0 }
 0x1e7   : > { %v3998_v4 = vpop.eup %3163 }
 0x1e9   : > { %1032 = vperm.xlu2 %3120, %v3941_v25  }
 0x1ea   : > { %996 = vmax.xlane.f32.xlu0 %v995_v62 }
 0x1eb   : > { %v982_v9 = vpop.xlane.xlu2 %981 }
 0x1ec   : > { %v3985_v12 = vmax.f32 %v968_v6, %v982_v9 }
 0x1ee   : > { %1363 = vst.msk [vmem:[#allocation2 + $0x50] sm:$0xff] %vm293_vm2, %v3985_v12  ;;  %v1008_v19 = vsub.f32 %v968_v6, %v3985_v12  ;;  %v1014_v6 = vmul.f32 1.442695, %v1006_v36  ;;  %v668_v36 = vld [vmem:[#allocation4 + $0x8] sm:$0xff] }
 0x1f3   : > { %v564_v24 = vpop.permute.xlu2 %563 }
 0x1f4   : > { %v589_v16 = vsub.f32 %v3677_v28, %v564_v24  ;;  %v1007_v28 = vsub.f32 %v967_v49, %v999_v50  ;;  %v4020_v47 = vpop.permute.xlu0 %687  ;;  %v667_v49 = vld [vmem:[#allocation4] sm:$0xff] }
 0x1f5   : > { %v715_v62 = vmul.f32 %v3962_v38, %v667_v49  ;;  %v1018_v38 = vmul.f32 1.442695, %v1008_v19 }
 0x1f6   : > { %v600_v22 = vmul.f32 1.442695, %v589_v16  ;;  %583 = vperm.xlu1 %3122, %v3902_v11   ;;  %v1016_v11 = vmul.f32 1.442695, %v1007_v28 }
 0x1f8   : > { %3165 = vpow2.f32 %v600_v22  ;;  %v626_v22 = vsel %vm489_vm1, %v3908_v20, 0.0 }
 0x1fb   : > { %v569_v30 = vpop.permute.xlu2 %568 }
 0x1fc   : > { %v590_v61 = vsub.f32 %v3689_v32, %v569_v30 }
 0x1fe   : > { %v4000_v21 = vpop.eup %3165  ;;  %v602_v8 = vmul.f32 1.442695, %v590_v61  ;;  %707 = vperm.xlu1 %3122, %v3995_v31   ;;  %712 = vperm.xlu0 %3121, %v3998_v4  }
 0x1ff   : > { %2948 = vmatmul.msk.f32.gmra.mxu1 %vm489_vm1, %v4000_v21 }
 0x200   : > { %3167 = vpow2.f32 %v602_v8 }
 0x201   : > { %3169 = vpow2.f32 %v1016_v11 }
 0x205   : > { %v985_v37 = vpop.xlane.xlu1 %984 }
 0x206   : > { %v4008_v40 = vpop.eup %3167  ;;  %v1001_v32 = vmax.f32 %v4006_v29, %v985_v37  ;;  %1037 = vperm.xlu1 %3122, %v999_v50   ;;  %v4024_v50 = vld [vmem:[#allocation2 + $0x60] sm:$0xff] }
 0x207   : > { %2949 = vmatmul.msk.f32.gmra.mxu1 %vm489_vm1, %v4008_v40  ;;  %v4015_v43 = vpop.eup %3169 }
 0x208   : > { %v1009_v44 = vsub.f32 %v4006_v29, %v1001_v32  ;;  %1364 = vst.msk [vmem:[#allocation2 + $0x58] sm:$0xff] %vm293_vm2, %v1001_v32 }
 0x20e   : > { %1166 = vperm.xlu1 %3122, %v4015_v43  }
 0x212   : > { %630 = vadd.xlane.f32.xlu2 %v629_v45 }
 0x21d   : > { %v4022_v46 = vpop.permute.xlu1 %692 }
 0x21f   : > { %v772_v9 = vpop.f32.mrf.mxu1  ;;  %v988_v14 = vpop.xlane.xlu0 %987 }
 0x220   : > { %v796_v63 = vadd.f32 %v772_v9, %v715_v62  ;;  %v4028_v18 = vmax.f32 %v4024_v50, %v988_v14  ;;  %v1020_v14 = vmul.f32 1.442695, %v1009_v44 }
 0x222   : > { %804 = vst.msk [vmem:[#allocation4] sm:$0xff] %vm391_vm0, %v796_v63  ;;  %v1010_v35 = vsub.f32 %v4024_v50, %v4028_v18 }
 0x223   : > { %1365 = vst.msk [vmem:[#allocation2 + $0x60] sm:$0xff] %vm293_vm2, %v4028_v18 }
 0x225   : > { %v574_v24 = vpop.permute.xlu1 %573 }
 0x226   : > { %v591_v16 = vsub.f32 %v3705_v39, %v574_v24  ;;  %v4049_v39 = vld [vmem:[#allocation2 + $0x68] sm:$0xff] }
 0x228   : > { %v604_v30 = vmul.f32 1.442695, %v591_v16  ;;  %627 = vadd.xlane.f32.xlu0 %v626_v22  ;;  %v635_v22 = vsel %vm489_vm1, %v4000_v21, 0.0 }
 0x22a   : > { %3171 = vpow2.f32 %v604_v30  ;;  %1047 = vperm.xlu2 %3120, %v1001_v32   ;;  %v716_v32 = vmul.f32 %v3973_v54, %v668_v36  ;;  %v4075_v54 = vld [vmem:[#allocation2 + $0x70] sm:$0xff]  ;;  %v4094_v30 = vld [vmem:[#allocation2 + $0x78] sm:$0xff] }
 0x22b   : > { %3173 = vpow2.f32 %v1018_v38 }
 0x22c   : > { %3175 = vpow2.f32 %v1014_v6 }
 0x230   : > { %v4039_v61 = vpop.eup %3171 }
 0x231   : > { %v4041_v8 = vpop.eup %3173  ;;  %2950 = vmatmul.msk.f32.gmra.mxu1 %vm489_vm1, %v4039_v61 }
 0x232   : > { %1171 = vperm.xlu2 %3120, %v4041_v8   ;;  %v4060_v25 = vpop.eup %3175 }
 0x234   : > { %v991_v20 = vpop.xlane.xlu2 %990 }
 0x235   : > { %v4052_v28 = vmax.f32 %v4049_v39, %v991_v20 }
 0x237   : > { %v1011_v11 = vsub.f32 %v4049_v39, %v4052_v28  ;;  %1366 = vst.msk [vmem:[#allocation2 + $0x68] sm:$0xff] %vm293_vm2, %v4052_v28 }
 0x238   : > { %633 = vadd.xlane.f32.xlu1 %v632_v27  ;;  %v669_v27 = vld [vmem:[#allocation4 + $0x10] sm:$0xff] }
 0x23c   : > { %v579_v29 = vpop.permute.xlu2 %578  ;;  %1161 = vperm.xlu0 %3121, %v4060_v25  }
 0x23d   : > { %v592_v37 = vsub.f32 %v3725_v48, %v579_v29  ;;  %v717_v29 = vmul.f32 %v4020_v47, %v669_v27  ;;  %v638_v27 = vsel %vm489_vm1, %v4008_v40, 0.0 }
 0x23f   : > { %v606_v45 = vmul.f32 1.442695, %v592_v37  ;;  %v775_v49 = vpop.f32.mrf.mxu1 }
 0x240   : > { %v797_v62 = vadd.f32 %v775_v49, %v716_v32 }
 0x241   : > { %3177 = vpow2.f32 %v606_v45 }
 0x242   : > { %805 = vst.msk [vmem:[#allocation4 + $0x8] sm:$0xff] %vm391_vm0, %v797_v62  ;;  %3179 = vpow2.f32 %v1020_v14 }
 0x244   : > { %v4066_v9 = vpop.permute.xlu2 %702  ;;  %1042 = vperm.xlu0 %3121, %v3985_v12  }
 0x247   : > { %v4069_v58 = vpop.eup %3177 }
 0x248   : > { %2951 = vmatmul.msk.f32.gmra.mxu1 %vm489_vm1, %v4069_v58  ;;  %v4081_v12 = vpop.eup %3179 }
 0x24c   : > { %v1033_v63 = vpop.permute.xlu2 %1032  ;;  %1052 = vperm.xlu0 %3121, %v4028_v18   ;;  %v610_v18 = vld [vmem:[#allocation3] sm:$0xff] }
 0x24d   : > { %v1070_v48 = vsub.f32 %v3829_v13, %v1033_v63  ;;  %v698_v13 = vpop.permute.xlu0 %697  ;;  %v670_v63 = vld [vmem:[#allocation4 + $0x18] sm:$0xff] }
 0x24f   : > { %v1078_v19 = vmul.f32 1.442695, %v1070_v48 }
 0x250   : > { %v994_v24 = vpop.xlane.xlu1 %993 }
 0x251   : > { %3181 = vpow2.f32 %v1078_v19  ;;  %v4078_v16 = vmax.f32 %v4075_v54, %v994_v24  ;;  %1057 = vperm.xlu1 %3122, %v4052_v28   ;;  %v641_v19 = vsel %vm489_vm1, %v4039_v61, 0.0  ;;  %v644_v28 = vsel %vm489_vm1, %v4069_v58, 0.0  ;;  %v672_v58 = vld [vmem:[#allocation4 + $0x28] sm:$0xff] }
 0x253   : > { %v1012_v44 = vsub.f32 %v4075_v54, %v4078_v16  ;;  %1367 = vst.msk [vmem:[#allocation2 + $0x70] sm:$0xff] %vm293_vm2, %v4078_v16 }
 0x254   : > { %1176 = vperm.xlu0 %3121, %v4081_v12  }
 0x257   : > { %v4088_v38 = vpop.eup %3181 }
 0x258   : > { %2969 = vmatmul.msk.f32.vlgmr.msra.gmra.mxu3 %vm489_vm1, %v4088_v38 }
 0x25b   : > { %636 = vadd.xlane.f32.xlu2 %v635_v22 }
 0x25d   : > { %v997_v6 = vpop.xlane.xlu0 %996 }
 0x25e   : > { %v4097_v20 = vmax.f32 %v4094_v30, %v997_v6 }
 0x260   : > { %v1013_v36 = vsub.f32 %v4094_v30, %v4097_v20  ;;  %1368 = vst.msk [vmem:[#allocation2 + $0x78] sm:$0xff] %vm293_vm2, %v4097_v20 }
 0x263   : > { %v778_v37 = vpop.f32.mrf.mxu1 }
 0x264   : > { %v798_v32 = vadd.f32 %v778_v37, %v717_v29  ;;  %v611_v29 = vld [vmem:[#allocation3 + $0x8] sm:$0xff] }
 0x266   : > { %806 = vst.msk [vmem:[#allocation4 + $0x10] sm:$0xff] %vm391_vm0, %v798_v32 }
 0x268   : > { %v584_v21 = vpop.permute.xlu1 %583 }
 0x269   : > { %v593_v45 = vsub.f32 %v3754_v55, %v584_v21  ;;  %v718_v55 = vmul.f32 %v4022_v46, %v670_v63  ;;  %v612_v63 = vld [vmem:[#allocation3 + $0x10] sm:$0xff] }
 0x26b   : > { %v608_v49 = vmul.f32 1.442695, %v593_v45  ;;  %v1022_v45 = vmul.f32 1.442695, %v1010_v35  ;;  %v4149_v35 = vpop.f32.mrf.mxu0 }
 0x26d   : > { %3183 = vpow2.f32 %v608_v49 }
 0x270   : > { %v4106_v62 = vpop.permute.xlu1 %707  ;;  %v4144_v50 = vpop.permute.xlu0 %712 }
 0x273   : > { %v4108_v14 = vpop.eup %3183  ;;  %1062 = vperm.xlu2 %3120, %v4078_v16   ;;  %v4158_v49 = vpop.f32.mrf.mxu0 }
 0x274   : > { %2952 = vmatmul.msk.f32.gmra.mxu1 %vm489_vm1, %v4108_v14 }
 0x278   : > { %v1038_v47 = vpop.permute.xlu1 %1037 }
 0x279   : > { %v1071_v48 = vsub.f32 %v3861_v42, %v1038_v47  ;;  %v671_v42 = vld [vmem:[#allocation4 + $0x20] sm:$0xff]  ;;  %v620_v47 = vmul.f32 %v3877_v59, %v612_v63 }
 0x27a   : > { %v719_v61 = vmul.f32 %v698_v13, %v671_v42  ;;  %v1024_v13 = vmul.f32 1.442695, %v1011_v11 }
 0x27b   : > { %v1080_v24 = vmul.f32 1.442695, %v1071_v48  ;;  %642 = vadd.xlane.f32.xlu1 %v641_v19 }
 0x27c   : > { %v781_v22 = vpop.f32.mrf.mxu1  ;;  %2985 = vmatmul.msk.f32.vlgmr.msrb.gmra.mxu1 %vm391_vm0, %v3631_v2  ;;  %v619_v2 = vmul.f32 %v3845_v26, %v611_v29 }
 0x27d   : > { %3185 = vpow2.f32 %v1080_v24  ;;  %v799_v6 = vadd.f32 %v781_v22, %v718_v55  ;;  %v720_v55 = vmul.f32 %v4066_v9, %v672_v58 }
 0x27e   : > { %639 = vadd.xlane.f32.xlu0 %v638_v27  ;;  %3187 = vpow2.f32 %v1022_v45  ;;  %v2075_v27 = vsel %vm489_vm1, %v4158_v49, -inf }
 0x27f   : > { %807 = vst.msk [vmem:[#allocation4 + $0x18] sm:$0xff] %vm391_vm0, %v799_v6  ;;  %3189 = vpow2.f32 %v1024_v13 }
 0x283   : > { %v4122_v37 = vpop.eup %3185 }
 0x284   : > { %v784_v46 = vpop.f32.mrf.mxu1  ;;  %2970 = vmatmul.msk.f32.gmra.mxu3 %vm489_vm1, %v4122_v37  ;;  %2986 = vmatmul.msk.f32.gmra.mxu1 %vm391_vm0, %v3612_v53  ;;  %v4139_v53 = vpop.eup %3187 }
 0x285   : > { %v800_v32 = vadd.f32 %v784_v46, %v719_v61  ;;  %v631_v21 = vpop.xlane.xlu2 %630  ;;  %v4142_v26 = vpop.eup %3189  ;;  %v673_v61 = vld [vmem:[#allocation4 + $0x30] sm:$0xff] }
 0x286   : > { %v651_v40 = vadd.f32 %v631_v21, %v619_v2  ;;  %v721_v46 = vmul.f32 %v4106_v62, %v673_v61 }
 0x287   : > { %808 = vst.msk [vmem:[#allocation4 + $0x20] sm:$0xff] %vm391_vm0, %v800_v32 }
 0x288   : > { %660 = vst.msk [vmem:[#allocation3 + $0x8] sm:$0xff] %vm293_vm2, %v651_v40 }
 0x28c   : > { %2987 = vmatmul.msk.f32.gmra.mxu1 %vm391_vm0, %v3621_v57  ;;  %v618_v57 = vmul.f32 %v3849_v34, %v610_v18  ;;  %v1026_v34 = vmul.f32 1.442695, %v1012_v44 }
 0x28d   : > { %v1048_v44 = vpop.permute.xlu2 %1047 }
 0x28e   : > { %3191 = vpow2.f32 %v1026_v34  ;;  %v1073_v6 = vsub.f32 %v3895_v5, %v1048_v44 }
 0x290   : > { %v1084_v42 = vmul.f32 1.442695, %v1073_v6 }
 0x292   : > { %1181 = vperm.xlu0 %3121, %v4139_v53  }
 0x294   : > { %1186 = vperm.xlu1 %3122, %v4142_v26   ;;  %2988 = vmatmul.msk.f32.gmra.mxu1 %vm391_vm0, %v3642_v7  ;;  %v4160_v7 = vpop.permute.xlu1 %1166  ;;  %v4177_v16 = vpop.eup %3191 }
 0x295   : > { %v4202_v21 = vpop.permute.xlu2 %1171 }
 0x29a   : > { %1067 = vperm.xlu0 %3121, %v4097_v20  }
 0x29b   : > { %v628_v39 = vpop.xlane.xlu0 %627 }
 0x29c   : > { %v650_v11 = vadd.f32 %v628_v39, %v618_v57  ;;  %645 = vadd.xlane.f32.xlu2 %v644_v28  ;;  %2989 = vmatmul.msk.f32.gmra.mxu1 %vm391_vm0, %v3618_v56  ;;  %v4170_v56 = vpop.f32.mrf.mxu0  ;;  %v1111_v39 = vsel %vm489_vm1, %v4088_v38, 0.0 }
 0x29e   : > { %659 = vst.msk [vmem:[#allocation3] sm:$0xff] %vm293_vm2, %v650_v11 }
 0x2a4   : > { %2990 = vmatmul.msk.f32.gmra.mxu1 %vm391_vm0, %v3629_v1  ;;  %v4183_v9 = vpop.f32.mrf.mxu0 }
 0x2ab   : > { %v634_v48 = vpop.xlane.xlu1 %633 }
 0x2ac   : > { %v652_v19 = vadd.f32 %v634_v48, %v620_v47  ;;  %2991 = vmatmul.msk.f32.gmra.mxu1 %vm391_vm0, %v3650_v15 }
 0x2ae   : > { %661 = vst.msk [vmem:[#allocation3 + $0x10] sm:$0xff] %vm293_vm2, %v652_v19  ;;  %v4174_v1 = vpop.permute.xlu0 %1161  ;;  %v787_v24 = vpop.f32.mrf.mxu1  ;;  %v615_v19 = vld [vmem:[#allocation3 + $0x28] sm:$0xff] }
 0x2af   : > { %v801_v54 = vadd.f32 %v787_v24, %v720_v55  ;;  %v1114_v55 = vsel %vm489_vm1, %v4122_v37, 0.0  ;;  %v674_v24 = vld [vmem:[#allocation4 + $0x38] sm:$0xff] }
 0x2b1   : > { %809 = vst.msk [vmem:[#allocation4 + $0x28] sm:$0xff] %vm391_vm0, %v801_v54  ;;  %v623_v54 = vmul.f32 %v3970_v51, %v615_v19  ;;  %v2072_v51 = vsel %vm489_vm1, %v4149_v35, -inf  ;;  %v1095_v19 = vld [vmem:[#allocation3 + $0x40] sm:$0xff] }
 0x2b4   : > { %1191 = vperm.xlu2 %3120, %v4177_v16   ;;  %2992 = vmatmul.msk.f32.gmra.mxu1 %vm391_vm0, %v3624_v60 }
 0x2b6   : > { %v1043_v15 = vpop.permute.xlu0 %1042 }
 0x2b7   : > { %v1072_v59 = vsub.f32 %v3873_v52, %v1043_v15  ;;  %v4192_v52 = vpop.f32.mrf.mxu0  ;;  %v614_v15 = vld [vmem:[#allocation3 + $0x20] sm:$0xff] }
 0x2b8   : > { %v2084_v32 = vsel %vm489_vm1, %v4192_v52, -inf  ;;  %v622_v6 = vmul.f32 %v3949_v10, %v614_v15  ;;  %v616_v10 = vld [vmem:[#allocation3 + $0x30] sm:$0xff] }
 0x2b9   : > { %v1082_v22 = vmul.f32 1.442695, %v1072_v59 }
 0x2bb   : > { %3193 = vpow2.f32 %v1082_v22  ;;  %v722_v22 = vmul.f32 %v4144_v50, %v674_v24  ;;  %v2081_v50 = vsel %vm489_vm1, %v4183_v9, -inf  ;;  %v1103_v24 = vmul.f32 %v4060_v25, %v1095_v19 }
 0x2bc   : > { %3016 = vmatmul.msk.f32.vlgmr.msra.gmra.mxu1 %vm391_vm0, %v3789_v3  ;;  %3195 = vpow2.f32 %v1084_v42  ;;  %v647_v3 = vsel %vm489_vm1, %v4108_v14, 0.0  ;;  %v1028_v14 = vmul.f32 1.442695, %v1013_v36  ;;  %v2078_v36 = vsel %vm489_vm1, %v4170_v56, -inf }
 0x2be   : > { %2076 = vmax.xlane.f32.xlu1 %v2075_v27  ;;  %v1053_v29 = vpop.permute.xlu0 %1052 }
 0x2bf   : > { %v1074_v5 = vsub.f32 %v3916_v23, %v1053_v29  ;;  %v613_v23 = vld [vmem:[#allocation3 + $0x18] sm:$0xff]  ;;  %v4233_v47 = vpop.f32.mrf.mxu0 }
 0x2c0   : > { %v621_v57 = vmul.f32 %v3918_v0, %v613_v23 }
 0x2c1   : > { %v4190_v60 = vpop.eup %3193  ;;  %v1086_v45 = vmul.f32 1.442695, %v1074_v5 }
 0x2c2   : > { %2971 = vmatmul.msk.f32.gmra.mxu3 %vm489_vm1, %v4190_v60  ;;  %v4205_v18 = vpop.eup %3195 }
 0x2c3   : > { %v1058_v13 = vpop.permute.xlu1 %1057  ;;  %3197 = vpow2.f32 %v1086_v45 }
 0x2c4   : > { %648 = vadd.xlane.f32.xlu0 %v647_v3  ;;  %v1075_v62 = vsub.f32 %v3943_v33, %v1058_v13  ;;  %3199 = vpow2.f32 %v1028_v14  ;;  %v4272_v14 = vld [vmem:[#allocation2 + $0xc8] sm:$0xff] }
 0x2c5   : > { %v790_v2 = vpop.f32.mrf.mxu1 }
 0x2c6   : > { %v802_v40 = vadd.f32 %v790_v2, %v721_v46  ;;  %2085 = vmax.xlane.f32.xlu1 %v2084_v32  ;;  %v1088_v11 = vmul.f32 1.442695, %v1075_v62  ;;  %v4239_v48 = vpop.permute.xlu0 %1176  ;;  %v624_v2 = vmul.f32 %v3995_v31, %v616_v10 }
 0x2c7   : > { %v4256_v46 = vpop.f32.mrf.mxu0 }
 0x2c8   : > { %810 = vst.msk [vmem:[#allocation4 + $0x30] sm:$0xff] %vm391_vm0, %v802_v40  ;;  %3201 = vpow2.f32 %v1088_v11  ;;  %v2090_v13 = vsel %vm489_vm1, %v4256_v46, -inf }
 0x2c9   : > { %v4216_v34 = vpop.eup %3197 }
 0x2ca   : > { %2972 = vmatmul.msk.f32.gmra.mxu3 %vm489_vm1, %v4205_v18  ;;  %v4221_v30 = vpop.eup %3199 }
 0x2ce   : > { %v637_v28 = vpop.xlane.xlu2 %636  ;;  %1112 = vadd.xlane.f32.xlu1 %v1111_v39  ;;  %v4225_v38 = vpop.eup %3201 }
 0x2cf   : > { %v653_v63 = vadd.f32 %v637_v28, %v621_v57  ;;  %v617_v28 = vld [vmem:[#allocation3 + $0x38] sm:$0xff] }
 0x2d1   : > { %662 = vst.msk [vmem:[#allocation3 + $0x18] sm:$0xff] %vm293_vm2, %v653_v63  ;;  %v625_v63 = vmul.f32 %v3998_v4, %v617_v28 }
 0x2d2   : > { %2973 = vmatmul.msk.f32.gmra.mxu3 %vm489_vm1, %v4216_v34 }
 0x2d6   : > { %v1063_v33 = vpop.permute.xlu2 %1062 }
 0x2d7   : > { %v1076_v0 = vsub.f32 %v3964_v41, %v1063_v33  ;;  %v2087_v41 = vsel %vm489_vm1, %v4233_v47, -inf }
 0x2d8   : > { %1196 = vperm.xlu0 %3121, %v4221_v30  }
 0x2d9   : > { %v1090_v20 = vmul.f32 1.442695, %v1076_v0  ;;  %v4285_v0 = vld [vmem:[#allocation2 + $0xe0] sm:$0xff] }
 0x2da   : > { %2974 = vmatmul.msk.f32.gmra.mxu3 %vm489_vm1, %v4225_v38 }
 0x2db   : > { %3203 = vpow2.f32 %v1090_v20 }
 0x2dd   : > { %2079 = vmax.xlane.f32.xlu2 %v2078_v36 }
 0x2e1   : > { %v4231_v58 = vpop.eup %3203 }
 0x2e2   : > { %2975 = vmatmul.msk.f32.gmra.mxu3 %vm489_vm1, %v4231_v58 }
 0x2e5   : > { %2088 = vmax.xlane.f32.xlu2 %v2087_v41 }
 0x2ed   : > { %1115 = vadd.xlane.f32.xlu2 %v1114_v55 }
 0x2ee   : > { %v643_v59 = vpop.xlane.xlu1 %642 }
 0x2ef   : > { %v655_v44 = vadd.f32 %v643_v59, %v623_v54 }
 0x2f1   : > { %664 = vst.msk [vmem:[#allocation3 + $0x28] sm:$0xff] %vm293_vm2, %v655_v44  ;;  %v640_v27 = vpop.xlane.xlu0 %639  ;;  %v793_v42 = vpop.f32.mrf.mxu1  ;;  %v4301_v44 = vld [vmem:[#allocation2 + $0xd0] sm:$0xff] }
 0x2f2   : > { %v654_v29 = vadd.f32 %v640_v27, %v622_v6  ;;  %v803_v61 = vadd.f32 %v793_v42, %v722_v22  ;;  %v4313_v42 = vld [vmem:[#allocation2 + $0xe8] sm:$0xff] }
 0x2f4   : > { %663 = vst.msk [vmem:[#allocation3 + $0x20] sm:$0xff] %vm293_vm2, %v654_v29 }
 0x2f5   : > { %811 = vst.msk [vmem:[#allocation4 + $0x38] sm:$0xff] %vm391_vm0, %v803_v61 }
 0x2f9   : > { %v4270_v62 = vpop.f32.mrf.mxu1 }
 0x302   : > { %2073 = vmax.xlane.f32.xlu0 %v2072_v51  ;;  %v1096_v51 = vld [vmem:[#allocation3 + $0x48] sm:$0xff] }
 0x304   : > { %v4251_v37 = vpop.permute.xlu0 %1181 }
 0x306   : > { %v4268_v31 = vpop.permute.xlu1 %1186 }
 0x30a   : > { %2082 = vmax.xlane.f32.xlu0 %v2081_v50  ;;  %v1126_v50 = vsel %vm489_vm1, %v4225_v38, 0.0 }
 0x30c   : > { %v1068_v5 = vpop.permute.xlu0 %1067 }
 0x30d   : > { %v1077_v3 = vsub.f32 %v3978_v17, %v1068_v5  ;;  %v1117_v17 = vsel %vm489_vm1, %v4190_v60, 0.0  ;;  %v4282_v60 = vpop.f32.mrf.mxu1  ;;  %v1104_v5 = vmul.f32 %v4015_v43, %v1096_v51 }
 0x30f   : > { %v1092_v32 = vmul.f32 1.442695, %v1077_v3  ;;  %v646_v40 = vpop.xlane.xlu2 %645 }
 0x310   : > { %v656_v45 = vadd.f32 %v646_v40, %v624_v2 }
 0x311   : > { %3205 = vpow2.f32 %v1092_v32  ;;  %v1526_v32 = vsel %vm489_vm1, %v4282_v60, -inf }
 0x312   : > { %665 = vst.msk [vmem:[#allocation3 + $0x30] sm:$0xff] %vm293_vm2, %v656_v45  ;;  %2091 = vmax.xlane.f32.xlu0 %v2090_v13 }
 0x315   : > { %v4293_v55 = vpop.f32.mrf.mxu1 }
 0x317   : > { %v4262_v23 = vpop.eup %3205  ;;  %v4297_v15 = vpop.permute.xlu2 %1191 }
 0x318   : > { %2976 = vmatmul.msk.f32.gmra.mxu3 %vm489_vm1, %v4262_v23 }
 0x31a   : > { %1118 = vadd.xlane.f32.xlu0 %v1117_v17  ;;  %v4336_v17 = vld [vmem:[#allocation2 + $0xc0] sm:$0xff] }
 0x31d   : > { %v4299_v59 = vpop.f32.mrf.mxu1 }
 0x325   : > { %v4311_v25 = vpop.f32.mrf.mxu1 }
 0x326   : > { %v1535_v38 = vsel %vm489_vm1, %v4311_v25, -inf }
 0x32d   : > { %v4322_v10 = vpop.f32.mrf.mxu1 }
 0x331   : > { %v2077_v57 = vpop.xlane.xlu1 %2076 }
 0x332   : > { %v4275_v39 = vmax.f32 %v4272_v14, %v2077_v57 }
 0x334   : > { %2460 = vst.msk [vmem:[#allocation2 + $0xc8] sm:$0xff] %vm293_vm2, %v4275_v39  ;;  %2135 = vperm.xlu0 %3121, %v4275_v39  }
 0x335   : > { %v4328_v40 = vpop.f32.mrf.mxu1 }
 0x337   : > { %v649_v33 = vpop.xlane.xlu0 %648 }
 0x338   : > { %v657_v20 = vadd.f32 %v649_v33, %v625_v63  ;;  %v4348_v33 = vld [vmem:[#allocation2 + $0xd8] sm:$0xff] }
 0x339   : > { %v2086_v36 = vpop.xlane.xlu1 %2085 }
 0x33a   : > { %666 = vst.msk [vmem:[#allocation3 + $0x38] sm:$0xff] %vm293_vm2, %v657_v20  ;;  %v4289_v41 = vmax.f32 %v4285_v0, %v2086_v36  ;;  %v1120_v20 = vsel %vm489_vm1, %v4205_v18, 0.0  ;;  %v1097_v18 = vld [vmem:[#allocation3 + $0x50] sm:$0xff] }
 0x33b   : > { %v1105_v51 = vmul.f32 %v4041_v8, %v1097_v18  ;;  %v1132_v8 = vsel %vm489_vm1, %v4262_v23, 0.0  ;;  %v1541_v23 = vsel %vm489_vm1, %v4328_v40, -inf }
 0x33c   : > { %2463 = vst.msk [vmem:[#allocation2 + $0xe0] sm:$0xff] %vm293_vm2, %v4289_v41 }
 0x33d   : > { %v4334_v13 = vpop.f32.mrf.mxu1 }
 0x33e   : > { %v1544_v57 = vsel %vm489_vm1, %v4334_v13, -inf }
 0x341   : > { %v1113_v54 = vpop.xlane.xlu1 %1112 }
 0x342   : > { %v1135_v4 = vadd.f32 %v1113_v54, %v1103_v24  ;;  %v4357_v24 = vld [vmem:[#allocation2 + $0xf0] sm:$0xff]  ;;  %v1129_v54 = vsel %vm489_vm1, %v4231_v58, 0.0  ;;  %v1538_v58 = vsel %vm489_vm1, %v4322_v10, -inf }
 0x344   : > { %1143 = vst.msk [vmem:[#allocation3 + $0x40] sm:$0xff] %vm293_vm2, %v1135_v4 }
 0x34a   : > { %v4330_v45 = vpop.permute.xlu0 %1196 }
 0x350   : > { %v2080_v22 = vpop.xlane.xlu2 %2079 }
 0x351   : > { %v4304_v6 = vmax.f32 %v4301_v44, %v2080_v22 }
 0x353   : > { %2461 = vst.msk [vmem:[#allocation2 + $0xd0] sm:$0xff] %vm293_vm2, %v4304_v6  ;;  %2140 = vperm.xlu1 %3122, %v4304_v6  }
 0x358   : > { %v2089_v29 = vpop.xlane.xlu2 %2088 }
 0x359   : > { %v4316_v61 = vmax.f32 %v4313_v42, %v2089_v29  ;;  %v1529_v29 = vsel %vm489_vm1, %v4293_v55, -inf }
 0x35b   : > { %2464 = vst.msk [vmem:[#allocation2 + $0xe8] sm:$0xff] %vm293_vm2, %v4316_v61 }
 0x35e   : > { %1127 = vadd.xlane.f32.xlu0 %v1126_v50 }
 0x360   : > { %v1116_v3 = vpop.xlane.xlu2 %1115 }
 0x361   : > { %v1136_v2 = vadd.f32 %v1116_v3, %v1104_v5  ;;  %v1288_v3 = vpop.f32.mrf.mxu3 }
 0x363   : > { %1144 = vst.msk [vmem:[#allocation3 + $0x48] sm:$0xff] %vm293_vm2, %v1136_v2  ;;  %v1123_v2 = vsel %vm489_vm1, %v4216_v34, 0.0 }
 0x366   : > { %1527 = vmax.xlane.f32.xlu0 %v1526_v32 }
 0x369   : > { %v1291_v32 = vpop.f32.mrf.mxu3 }
 0x36e   : > { %1536 = vmax.xlane.f32.xlu0 %v1535_v38 }
 0x375   : > { %v2074_v43 = vpop.xlane.xlu0 %2073 }
 0x376   : > { %v4341_v28 = vmax.f32 %v4336_v17, %v2074_v43  ;;  %1545 = vmax.xlane.f32.xlu0 %v1544_v57 }
 0x378   : > { %2459 = vst.msk [vmem:[#allocation2 + $0xc0] sm:$0xff] %vm293_vm2, %v4341_v28  ;;  %2130 = vperm.xlu2 %3120, %v4341_v28  }
 0x37d   : > { %1121 = vadd.xlane.f32.xlu1 %v1120_v20  ;;  %v2083_v36 = vpop.xlane.xlu0 %2082  ;;  %v4377_v20 = vpop.f32.mrf.mxu3 }
 0x37e   : > { %v4353_v19 = vmax.f32 %v4348_v33, %v2083_v36  ;;  %v1523_v36 = vsel %vm489_vm1, %v4270_v62, -inf }
 0x380   : > { %2462 = vst.msk [vmem:[#allocation2 + $0xd8] sm:$0xff] %vm293_vm2, %v4353_v19 }
 0x385   : > { %1130 = vadd.xlane.f32.xlu1 %v1129_v54  ;;  %v2092_v4 = vpop.xlane.xlu0 %2091 }
 0x386   : > { %v4362_v22 = vmax.f32 %v4357_v24, %v2092_v4  ;;  %v4385_v4 = vpop.f32.mrf.mxu3 }
 0x388   : > { %2465 = vst.msk [vmem:[#allocation2 + $0xf0] sm:$0xff] %vm293_vm2, %v4362_v22 }
 0x38d   : > { %1530 = vmax.xlane.f32.xlu1 %v1529_v29  ;;  %v1119_v50 = vpop.xlane.xlu0 %1118 }
 0x38e   : > { %v1137_v5 = vadd.f32 %v1119_v50, %v1105_v51  ;;  %v1300_v18 = vpop.f32.mrf.mxu3  ;;  %v1100_v51 = vld [vmem:[#allocation3 + $0x68] sm:$0xff] }
 0x38f   : > { %v1108_v50 = vmul.f32 %v4142_v26, %v1100_v51 }
 0x390   : > { %1145 = vst.msk [vmem:[#allocation3 + $0x50] sm:$0xff] %vm293_vm2, %v1137_v5 }
 0x395   : > { %1539 = vmax.xlane.f32.xlu1 %v1538_v58 }
 0x396   : > { %v4392_v29 = vpop.f32.mrf.mxu3 }
 0x3a1   : > { %1124 = vadd.xlane.f32.xlu2 %v1123_v2 }
 0x3a6   : > { %v2136_v38 = vpop.permute.xlu0 %2135 }
 0x3a7   : > { %v2169_v43 = vsub.f32 %v4158_v49, %v2136_v38  ;;  %v1532_v49 = vsel %vm489_vm1, %v4299_v59, -inf }
 0x3a9   : > { %v2178_v57 = vmul.f32 1.442695, %v2169_v43  ;;  %1133 = vadd.xlane.f32.xlu2 %v1132_v8  ;;  %v4398_v8 = vpop.f32.mrf.mxu3 }
 0x3ab   : > { %3207 = vpow2.f32 %v2178_v57 }
 0x3b1   : > { %v4381_v54 = vpop.eup %3207  ;;  %1524 = vmax.xlane.f32.xlu2 %v1523_v36 }
 0x3b2   : > { %4984 = vst [vmem:[#allocation5_spill] sm:$0xff] %v4381_v54  ;;  %v2212_v34 = vsel %vm489_vm1, %v4381_v54, 0.0 }
 0x3b3   : > { %2213 = vadd.xlane.f32.xlu0 %v2212_v34 }
 0x3b9   : > { %1533 = vmax.xlane.f32.xlu2 %v1532_v49  ;;  %v4411_v49 = vld [vmem:[#allocation2 + $0xa0] sm:$0xff] }
 0x3c1   : > { %1542 = vmax.xlane.f32.xlu2 %v1541_v23 }
 0x3c7   : > { %1322 = vrot.lane.b32.xlu0 %v1291_v32, %s3365_s29  ;;  %v1516_v32 = vld [vmem:[#allocation2 + $0x88] sm:$0xff] }
 0x3cf   : > { %2145 = vperm.xlu0 %3121, %v4353_v19  }
 0x3d1   : > { %v1128_v5 = vpop.xlane.xlu0 %1127 }
 0x3d2   : > { %v1140_v58 = vadd.f32 %v1128_v5, %v1108_v50  ;;  %v2131_v2 = vpop.permute.xlu2 %2130  ;;  %v4422_v50 = vld [vmem:[#allocation2 + $0xb8] sm:$0xff]  ;;  %v2141_v5 = vpop.permute.xlu1 %2140 }
 0x3d3   : > { %v2168_v38 = vsub.f32 %v4149_v35, %v2131_v2  ;;  %v1309_v35 = vpop.f32.mrf.mxu3 }
 0x3d4   : > { %1148 = vst.msk [vmem:[#allocation3 + $0x68] sm:$0xff] %vm293_vm2, %v1140_v58 }
 0x3d5   : > { %v2176_v43 = vmul.f32 1.442695, %v2168_v38  ;;  %v1098_v38 = vld [vmem:[#allocation3 + $0x58] sm:$0xff] }
 0x3d7   : > { %3209 = vpow2.f32 %v2176_v43  ;;  %1328 = vrot.lane.b32.xlu0 %v1300_v18, %s3365_s29  ;;  %v4416_v18 = vpop.f32.mrf.mxu1  ;;  %v1106_v43 = vmul.f32 %v4081_v12, %v1098_v38  ;;  %v1517_v12 = vld [vmem:[#allocation2 + $0x90] sm:$0xff] }
 0x3d8   : > { %v2093_v51 = vsel %vm489_vm1, %v4416_v18, -inf }
 0x3d9   : > { %1320 = vrot.lane.b32.xlu2 %v1288_v3, %s3365_s29  ;;  %v1528_v57 = vpop.xlane.xlu0 %1527 }
 0x3da   : > { %v4402_v36 = vmax.f32 %v1516_v32, %v1528_v57  ;;  %v2170_v57 = vsub.f32 %v4170_v56, %v2141_v5 }
 0x3dc   : > { %1911 = vst.msk [vmem:[#allocation2 + $0x88] sm:$0xff] %vm293_vm2, %v4402_v36  ;;  %v1556_v11 = vsub.f32 %v1516_v32, %v4402_v36 }
 0x3dd   : > { %v4406_v26 = vpop.eup %3209 }
 0x3de   : > { %v2209_v34 = vsel %vm489_vm1, %v4406_v26, 0.0  ;;  %v1565_v38 = vmul.f32 1.442695, %v1556_v11  ;;  %v1099_v11 = vld [vmem:[#allocation3 + $0x60] sm:$0xff] }
 0x3df   : > { %2210 = vadd.xlane.f32.xlu1 %v2209_v34  ;;  %1334 = vrot.lane.b32.xlu0 %v1309_v35, %s3365_s29 }
 0x3e1   : > { %v1537_v23 = vpop.xlane.xlu0 %1536 }
 0x3e2   : > { %v4414_v3 = vmax.f32 %v4411_v49, %v1537_v23  ;;  %v2180_v23 = vmul.f32 1.442695, %v2170_v57  ;;  %v1107_v57 = vmul.f32 %v4139_v53, %v1099_v11  ;;  %v4462_v53 = vld [vmem:[#allocation2 + $0x80] sm:$0xff]  ;;  %v2194_v11 = vld [vmem:[#allocation3 + $0xc8] sm:$0xff] }
 0x3e4   : > { %1914 = vst.msk [vmem:[#allocation2 + $0xa0] sm:$0xff] %vm293_vm2, %v4414_v3  ;;  %3211 = vpow2.f32 %v2180_v23  ;;  %v4985_v23 = vsub.f32 %v4272_v14, %v4275_v39 }
 0x3e5   : > { %3213 = vpow2.f32 %v1565_v38 }
 0x3e7   : > { %2094 = vmax.xlane.f32.xlu1 %v2093_v51  ;;  %v1101_v51 = vld [vmem:[#allocation3 + $0x70] sm:$0xff] }
 0x3e8   : > { %v1109_v27 = vmul.f32 %v4177_v16, %v1101_v51  ;;  %v4440_v16 = vld [vmem:[#allocation2 + $0xa8] sm:$0xff]  ;;  %v2114_v51 = vmul.f32 1.442695, %v4985_v23 }
 0x3e9   : > { %v1546_v58 = vpop.xlane.xlu0 %1545 }
 0x3ea   : > { %v4425_v2 = vmax.f32 %v4422_v50, %v1546_v58  ;;  %v4435_v54 = vpop.eup %3211  ;;  %3215 = vpow2.f32 %v2114_v51 }
 0x3eb   : > { %v4445_v32 = vpop.eup %3213 }
 0x3ec   : > { %1917 = vst.msk [vmem:[#allocation2 + $0xb8] sm:$0xff] %vm293_vm2, %v4425_v2 }
 0x3f0   : > { %v1122_v35 = vpop.xlane.xlu1 %1121 }
 0x3f1   : > { %v1138_v34 = vadd.f32 %v1122_v35, %v1106_v43  ;;  %v2215_v43 = vsel %vm489_vm1, %v4435_v54, 0.0 }
 0x3f3   : > { %1146 = vst.msk [vmem:[#allocation3 + $0x58] sm:$0xff] %vm293_vm2, %v1138_v34 }
 0x3f8   : > { %v1131_v63 = vpop.xlane.xlu1 %1130 }
 0x3f9   : > { %v1141_v58 = vadd.f32 %v1131_v63, %v1109_v27 }
 0x3fb   : > { %1149 = vst.msk [vmem:[#allocation3 + $0x70] sm:$0xff] %vm293_vm2, %v1141_v58  ;;  %v1102_v58 = vld [vmem:[#allocation3 + $0x78] sm:$0xff] }
 0x3fc   : > { %v1110_v38 = vmul.f32 %v4221_v30, %v1102_v58  ;;  %v4483_v58 = vld [vmem:[#allocation2 + $0xb0] sm:$0xff] }
 0x400   : > { %v1531_v56 = vpop.xlane.xlu1 %1530 }
 0x401   : > { %v1549_v5 = vmax.f32 %v1517_v12, %v1531_v56 }
 0x402   : > { %2216 = vadd.xlane.f32.xlu2 %v2215_v43 }
 0x403   : > { %1912 = vst.msk [vmem:[#allocation2 + $0x90] sm:$0xff] %vm293_vm2, %v1549_v5  ;;  %1591 = vperm.xlu0 %3121, %v1549_v5  }
 0x408   : > { %v1540_v27 = vpop.xlane.xlu1 %1539 }
 0x409   : > { %v4443_v63 = vmax.f32 %v4440_v16, %v1540_v27  ;;  %v4458_v27 = vpop.eup %3215 }
 0x40b   : > { %1915 = vst.msk [vmem:[#allocation2 + $0xa8] sm:$0xff] %vm293_vm2, %v4443_v63  ;;  %1715 = vperm.xlu0 %3121, %v4445_v32  }
 0x414   : > { %v1125_v35 = vpop.xlane.xlu2 %1124 }
 0x415   : > { %v1139_v34 = vadd.f32 %v1125_v35, %v1107_v57  ;;  %v2202_v57 = vmul.f32 %v4458_v27, %v2194_v11 }
 0x417   : > { %1147 = vst.msk [vmem:[#allocation3 + $0x60] sm:$0xff] %vm293_vm2, %v1139_v34 }
 0x41a   : > { %2150 = vperm.xlu2 %3120, %v4289_v41  }
 0x41c   : > { %v1134_v56 = vpop.xlane.xlu2 %1133 }
 0x41d   : > { %v1142_v43 = vadd.f32 %v1134_v56, %v1110_v38  ;;  %v1557_v38 = vsub.f32 %v1517_v12, %v1549_v5 }
 0x41f   : > { %1150 = vst.msk [vmem:[#allocation3 + $0x78] sm:$0xff] %vm293_vm2, %v1142_v43  ;;  %v1152_v43 = vld [vmem:[#allocation4 + $0x8] sm:$0xff]  ;;  %v1567_v11 = vmul.f32 1.442695, %v1557_v38 }
 0x421   : > { %3217 = vpow2.f32 %v1567_v11 }
 0x422   : > { %1326 = vrot.lane.b32.xlu2 %v4385_v4, %s3365_s29  ;;  %v4473_v4 = vld [vmem:[#allocation2 + $0x98] sm:$0xff] }
 0x424   : > { %v1525_v14 = vpop.xlane.xlu2 %1524 }
 0x425   : > { %v4465_v39 = vmax.f32 %v4462_v53, %v1525_v14  ;;  %v1200_v14 = vmul.f32 %v4160_v7, %v1152_v43 }
 0x426   : > { %v2214_v30 = vpop.xlane.xlu0 %2213 }
 0x427   : > { %1910 = vst.msk [vmem:[#allocation2 + $0x80] sm:$0xff] %vm293_vm2, %v4465_v39  ;;  %v2234_v35 = vadd.f32 %v2214_v30, %v2202_v57  ;;  %v1151_v30 = vld [vmem:[#allocation4] sm:$0xff] }
 0x429   : > { %2242 = vst.msk [vmem:[#allocation3 + $0xc8] sm:$0xff] %vm293_vm2, %v2234_v35 }
 0x42a   : > { %1332 = vrot.lane.b32.xlu2 %v4398_v8, %s3365_s29 }
 0x42c   : > { %v1534_v34 = vpop.xlane.xlu2 %1533 }
 0x42d   : > { %v4476_v23 = vmax.f32 %v4473_v4, %v1534_v34  ;;  %v4495_v34 = vpop.eup %3217 }
 0x42f   : > { %v1558_v51 = vsub.f32 %v4473_v4, %v4476_v23  ;;  %1913 = vst.msk [vmem:[#allocation2 + $0x98] sm:$0xff] %vm293_vm2, %v4476_v23  ;;  %v2107_v4 = vsub.f32 %v4348_v33, %v4353_v19 }
 0x432   : > { %1586 = vperm.xlu2 %3120, %v4402_v36   ;;  %v1199_v36 = vmul.f32 %v4174_v1, %v1151_v30  ;;  %v1155_v1 = vld [vmem:[#allocation4 + $0x20] sm:$0xff] }
 0x433   : > { %v1203_v11 = vmul.f32 %v4251_v37, %v1155_v1 }
 0x434   : > { %v1543_v56 = vpop.xlane.xlu2 %1542 }
 0x435   : > { %v4486_v8 = vmax.f32 %v4483_v58, %v1543_v56  ;;  %v4986_v56 = vsub.f32 %v4336_v17, %v4341_v28  ;;  %v2193_v17 = vld [vmem:[#allocation3 + $0xc0] sm:$0xff]  ;;  %v1158_v28 = vld [vmem:[#allocation4 + $0x38] sm:$0xff] }
 0x437   : > { %1916 = vst.msk [vmem:[#allocation2 + $0xb0] sm:$0xff] %vm293_vm2, %v4486_v8  ;;  %v2112_v43 = vmul.f32 1.442695, %v4986_v56 }
 0x439   : > { %v1323_v57 = vpop.permute.xlu0 %1322 }
 0x43a   : > { %v1345_v35 = vadd.f32 %v1323_v57, %v1200_v14  ;;  %1596 = vperm.xlu2 %3120, %v4476_v23   ;;  %v2118_v23 = vmul.f32 1.442695, %v2107_v4 }
 0x43c   : > { %1354 = vst.msk [vmem:[#allocation4 + $0x8] sm:$0xff] %vm1352_vm4, %v1345_v35  ;;  %v1321_v12 = vpop.permute.xlu2 %1320 }
 0x43d   : > { %v1344_v5 = vadd.f32 %v1321_v12, %v1199_v36  ;;  %v1206_v12 = vmul.f32 %v4330_v45, %v1158_v28  ;;  %v4987_v45 = vsub.f32 %v4301_v44, %v4304_v6 }
 0x43f   : > { %1353 = vst.msk [vmem:[#allocation4] sm:$0xff] %vm1352_vm4, %v1344_v5 }
 0x441   : > { %v2146_v38 = vpop.permute.xlu0 %2145 }
 0x442   : > { %v2171_v7 = vsub.f32 %v4183_v9, %v2146_v38  ;;  %1720 = vperm.xlu2 %3120, %v4495_v34  }
 0x444   : > { %v2182_v14 = vmul.f32 1.442695, %v2171_v7 }
 0x446   : > { %3219 = vpow2.f32 %v2182_v14 }
 0x447   : > { %3221 = vpow2.f32 %v2112_v43  ;;  %v4514_v43 = vld [vmem:[#allocation2 + $0xf8] sm:$0xff] }
 0x449   : > { %v1329_v57 = vpop.permute.xlu0 %1328 }
 0x44a   : > { %v1348_v30 = vadd.f32 %v1329_v57, %v1203_v11  ;;  %v2116_v11 = vmul.f32 1.442695, %v4987_v45  ;;  %v1555_v57 = vsub.f32 %v4462_v53, %v4465_v39  ;;  %v1154_v53 = vld [vmem:[#allocation4 + $0x18] sm:$0xff] }
 0x44c   : > { %v4503_v35 = vpop.eup %3219  ;;  %1357 = vst.msk [vmem:[#allocation4 + $0x20] sm:$0xff] %vm1352_vm4, %v1348_v30  ;;  %3223 = vpow2.f32 %v2116_v11 }
 0x44d   : > { %v2218_v9 = vsel %vm489_vm1, %v4503_v35, 0.0  ;;  %v4508_v36 = vpop.eup %3221 }
 0x44e   : > { %2219 = vadd.xlane.f32.xlu1 %v2218_v9  ;;  %v2201_v37 = vmul.f32 %v4508_v36, %v2193_v17  ;;  %v2195_v9 = vld [vmem:[#allocation3 + $0xd0] sm:$0xff]  ;;  %v1563_v17 = vmul.f32 1.442695, %v1555_v57 }
 0x450   : > { %3225 = vpow2.f32 %v1563_v17  ;;  %v2309_v17 = vld [vmem:[%s3466_s26 + $0x20] sm:$0xff] }
 0x451   : > { %v1335_v5 = vpop.permute.xlu0 %1334 }
 0x452   : > { %v1351_v38 = vadd.f32 %v1335_v5, %v1206_v12  ;;  %v2211_v7 = vpop.xlane.xlu1 %2210  ;;  %v4530_v30 = vpop.eup %3223 }
 0x453   : > { %v2233_v56 = vadd.f32 %v2211_v7, %v2201_v37  ;;  %v2203_v28 = vmul.f32 %v4530_v30, %v2195_v9  ;;  %v1202_v37 = vmul.f32 %v4239_v48, %v1154_v53  ;;  %v1569_v48 = vmul.f32 1.442695, %v1558_v51 }
 0x454   : > { %1360 = vst.msk [vmem:[#allocation4 + $0x38] sm:$0xff] %vm1352_vm4, %v1351_v38 }
 0x455   : > { %2241 = vst.msk [vmem:[#allocation3 + $0xc0] sm:$0xff] %vm293_vm2, %v2233_v56 }
 0x456   : > { %v4535_v6 = vpop.eup %3225 }
 0x45a   : > { %v2095_v14 = vpop.xlane.xlu1 %2094 }
 0x45b   : > { %v4517_v1 = vmax.f32 %v4514_v43, %v2095_v14 }
 0x45d   : > { %2466 = vst.msk [vmem:[#allocation2 + $0xf8] sm:$0xff] %vm293_vm2, %v4517_v1 }
 0x467   : > { %1324 = vrot.lane.b32.xlu1 %v4377_v20, %s3365_s29 }
 0x46f   : > { %1330 = vrot.lane.b32.xlu1 %v4392_v29, %s3365_s29 }
 0x475   : > { %v2217_v12 = vpop.xlane.xlu2 %2216  ;;  %v1592_v4 = vpop.permute.xlu0 %1591 }
 0x476   : > { %v2235_v5 = vadd.f32 %v2217_v12, %v2203_v28  ;;  %v2310_v28 = vld [vmem:[%s3466_s26 + $0x28] sm:$0xff] }
 0x477   : > { %1581 = vperm.xlu1 %3122, %v4465_v39   ;;  %v3128_v12 = vpack.i.bf16 %v2309_v17, %v2310_v28 }
 0x478   : > { %2243 = vst.msk [vmem:[#allocation3 + $0xd0] sm:$0xff] %vm293_vm2, %v2235_v5 }
 0x47d   : > { %v2151_v44 = vpop.permute.xlu2 %2150 }
 0x47e   : > { %v2172_v20 = vsub.f32 %v4192_v52, %v2151_v44  ;;  %v1157_v52 = vld [vmem:[#allocation4 + $0x30] sm:$0xff]  ;;  %v2305_v44 = vld [vmem:[%s3466_s26] sm:$0xff] }
 0x47f   : > { %1710 = vperm.xlu1 %3122, %v4535_v6   ;;  %v1205_v14 = vmul.f32 %v4297_v15, %v1157_v52  ;;  %v1561_v15 = vsub.f32 %v4483_v58, %v4486_v8  ;;  %v2196_v58 = vld [vmem:[#allocation3 + $0xd8] sm:$0xff]  ;;  %v1156_v52 = vld [vmem:[#allocation4 + $0x28] sm:$0xff] }
 0x480   : > { %v2184_v29 = vmul.f32 1.442695, %v2172_v20  ;;  %v2306_v20 = vld [vmem:[%s3466_s26 + $0x8] sm:$0xff] }
 0x481   : > { %v1575_v9 = vmul.f32 1.442695, %v1561_v15  ;;  %v3138_v53 = vpack.i.bf16 %v2305_v44, %v2306_v20  ;;  %v1621_v44 = vsub.f32 %v4293_v55, %v1592_v4  ;;  %v4585_v20 = vpop.permute.xlu0 %1715 }
 0x482   : > { %3227 = vpow2.f32 %v2184_v29 }
 0x483   : > { %3229 = vpow2.f32 %v1569_v48 }
 0x484   : > { %3231 = vpow2.f32 %v1575_v9  ;;  %v2108_v9 = vsub.f32 %v4285_v0, %v4289_v41 }
 0x485   : > { %v1327_v38 = vpop.permute.xlu2 %1326  ;;  %3233 = vpow2.f32 %v2118_v23 }
 0x486   : > { %v1347_v7 = vadd.f32 %v1327_v38, %v1202_v37  ;;  %v1153_v37 = vld [vmem:[#allocation4 + $0x10] sm:$0xff]  ;;  %v2120_v28 = vmul.f32 1.442695, %v2108_v9 }
 0x487   : > { %2155 = vperm.xlu1 %3122, %v4316_v61   ;;  %v1201_v38 = vmul.f32 %v4202_v21, %v1153_v37 }
 0x488   : > { %v4541_v39 = vpop.eup %3227  ;;  %1356 = vst.msk [vmem:[#allocation4 + $0x18] sm:$0xff] %vm1352_vm4, %v1347_v7 }
 0x489   : > { %v2221_v56 = vsel %vm489_vm1, %v4541_v39, 0.0  ;;  %v4552_v57 = vpop.eup %3229 }
 0x48a   : > { %2222 = vadd.xlane.f32.xlu0 %v2221_v56  ;;  %v4561_v51 = vpop.eup %3231 }
 0x48b   : > { %v4566_v5 = vpop.eup %3233 }
 0x48c   : > { %v2204_v29 = vmul.f32 %v4566_v5, %v2196_v58 }
 0x48d   : > { %v1333_v45 = vpop.permute.xlu2 %1332 }
 0x48e   : > { %v1350_v11 = vadd.f32 %v1333_v45, %v1205_v14  ;;  %v1204_v14 = vmul.f32 %v4268_v31, %v1156_v52 }
 0x48f   : > { %1601 = vperm.xlu1 %3122, %v4414_v3  }
 0x490   : > { %1359 = vst.msk [vmem:[#allocation4 + $0x30] sm:$0xff] %vm1352_vm4, %v1350_v11 }
 0x495   : > { %v1587_v23 = vpop.permute.xlu2 %1586 }
 0x496   : > { %v1620_v17 = vsub.f32 %v4282_v60, %v1587_v23  ;;  %v1631_v60 = vmul.f32 1.442695, %v1621_v44 }
 0x498   : > { %v1629_v31 = vmul.f32 1.442695, %v1620_v17 }
 0x49e   : > { %1725 = vperm.xlu0 %3121, %v4552_v57  }
 0x4a6   : > { %1606 = vperm.xlu0 %3121, %v4443_v63  }
 0x4ae   : > { %2160 = vperm.xlu0 %3121, %v4362_v22  }
 0x4b6   : > { %1740 = vperm.xlu0 %3121, %v4561_v51  }
 0x4be   : > { %3129 = vrot.lane.b32.xlu0 %v3128_v12, %s3361_s28 }
 0x4c1   : > { %v2220_v33 = vpop.xlane.xlu1 %2219 }
 0x4c2   : > { %v2236_v19 = vadd.f32 %v2220_v33, %v2204_v29  ;;  %v2197_v29 = vld [vmem:[#allocation3 + $0xe0] sm:$0xff] }
 0x4c4   : > { %2244 = vst.msk [vmem:[#allocation3 + $0xd8] sm:$0xff] %vm293_vm2, %v2236_v19  ;;  %v1597_v19 = vpop.permute.xlu2 %1596 }
 0x4c6   : > { %3139 = vrot.lane.b32.xlu0 %v3138_v53, %s3361_s28 }
 0x4d9   : > { %v1325_v7 = vpop.permute.xlu1 %1324 }
 0x4da   : > { %v1346_v56 = vadd.f32 %v1325_v7, %v1201_v38  ;;  %v1622_v7 = vsub.f32 %v4299_v59, %v1597_v19 }
 0x4dc   : > { %1355 = vst.msk [vmem:[#allocation4 + $0x10] sm:$0xff] %vm1352_vm4, %v1346_v56  ;;  %v1633_v52 = vmul.f32 1.442695, %v1622_v7  ;;  %v2312_v7 = vld [vmem:[%s3466_s26 + $0x38] sm:$0xff] }
 0x4e1   : > { %v1331_v45 = vpop.permute.xlu1 %1330 }
 0x4e2   : > { %v1349_v11 = vadd.f32 %v1331_v45, %v1204_v14 }
 0x4e4   : > { %1358 = vst.msk [vmem:[#allocation4 + $0x28] sm:$0xff] %vm1352_vm4, %v1349_v11 }
 0x4e9   : > { %v1582_v48 = vpop.permute.xlu1 %1581 }
 0x4ea   : > { %v1619_v15 = vsub.f32 %v4270_v62, %v1582_v48 }
 0x4ec   : > { %v1627_v21 = vmul.f32 1.442695, %v1619_v15 }
 0x4ee   : > { %3235 = vpow2.f32 %v1627_v21 }
 0x4ef   : > { %3237 = vpow2.f32 %v2120_v28 }
 0x4f0   : > { %3239 = vpow2.f32 %v1629_v31 }
 0x4f1   : > { %v4582_v12 = vpop.permute.xlu1 %1710  ;;  %3241 = vpow2.f32 %v1631_v60  ;;  %v2308_v60 = vld [vmem:[%s3466_s26 + $0x18] sm:$0xff] }
 0x4f4   : > { %v3236_v58 = vpop.eup %3235 }
 0x4f5   : > { %2993 = vmatmul.msk.f32.vlgmr.msrb.gmra.mxu3 %vm489_vm1, %v3236_v58  ;;  %v1660_v62 = vsel %vm489_vm1, %v3236_v58, 0.0  ;;  %v4589_v0 = vpop.eup %3237 }
 0x4f6   : > { %1661 = vadd.xlane.f32.xlu0 %v1660_v62  ;;  %v4592_v53 = vpop.eup %3239  ;;  %v2205_v55 = vmul.f32 %v4589_v0, %v2197_v29 }
 0x4f7   : > { %v4599_v14 = vpop.eup %3241 }
 0x4f9   : > { %v2156_v41 = vpop.permute.xlu1 %2155 }
 0x4fa   : > { %v2173_v33 = vsub.f32 %v4233_v47, %v2156_v41  ;;  %v2110_v47 = vsub.f32 %v4357_v24, %v4362_v22 }
 0x4fc   : > { %v2186_v37 = vmul.f32 1.442695, %v2173_v33  ;;  %v2124_v15 = vmul.f32 1.442695, %v2110_v47  ;;  %v2109_v47 = vsub.f32 %v4313_v42, %v4316_v61 }
 0x4fd   : > { %v2223_v38 = vpop.xlane.xlu0 %2222  ;;  %2994 = vmatmul.msk.f32.gmra.mxu3 %vm489_vm1, %v4592_v53 }
 0x4fe   : > { %3243 = vpow2.f32 %v2186_v37  ;;  %v2237_v56 = vadd.f32 %v2223_v38, %v2205_v55  ;;  %v2311_v38 = vld [vmem:[%s3466_s26 + $0x30] sm:$0xff] }
 0x4ff   : > { %3245 = vpow2.f32 %v1633_v52 }
 0x500   : > { %2245 = vst.msk [vmem:[#allocation3 + $0xe0] sm:$0xff] %vm293_vm2, %v2237_v56  ;;  %3247 = vpow2.f32 %v2124_v15  ;;  %v3123_v56 = vpack.i.bf16 %v2311_v38, %v2312_v7  ;;  %v2122_v15 = vmul.f32 1.442695, %v2109_v47 }
 0x501   : > { %v1602_v45 = vpop.permute.xlu1 %1601 }
 0x502   : > { %v1623_v59 = vsub.f32 %v4311_v25, %v1602_v45  ;;  %v1560_v25 = vsub.f32 %v4440_v16, %v4443_v63 }
 0x504   : > { %v4603_v11 = vpop.eup %3243  ;;  %v1635_v9 = vmul.f32 1.442695, %v1623_v59  ;;  %v1573_v17 = vmul.f32 1.442695, %v1560_v25 }
 0x505   : > { %2995 = vmatmul.msk.f32.gmra.mxu3 %vm489_vm1, %v4599_v14  ;;  %v2224_v48 = vsel %vm489_vm1, %v4603_v11, 0.0  ;;  %v3246_v4 = vpop.eup %3245 }
 0x506   : > { %2225 = vadd.xlane.f32.xlu2 %v2224_v48  ;;  %3249 = vpow2.f32 %v1635_v9  ;;  %v4614_v22 = vpop.eup %3247  ;;  %v1669_v33 = vsel %vm489_vm1, %v3246_v4, 0.0  ;;  %v4671_v9 = vpop.permute.xlu2 %1720 }
 0x50a   : > { %2274 = vperm.xlu0 %3121, %v4566_v5  }
 0x50c   : > { %v4617_v23 = vpop.eup %3249 }
 0x50d   : > { %2996 = vmatmul.msk.f32.gmra.mxu3 %vm489_vm1, %v3246_v4  ;;  %v2198_v4 = vld [vmem:[#allocation3 + $0xe8] sm:$0xff] }
 0x510   : > { %v4612_v24 = vpop.permute.xlu0 %1725 }
 0x512   : > { %2289 = vperm.xlu0 %3121, %v4614_v22  }
 0x515   : > { %2997 = vmatmul.msk.f32.gmra.mxu3 %vm489_vm1, %v4617_v23 }
 0x518   : > { %v1607_v5 = vpop.permute.xlu0 %1606 }
 0x519   : > { %v1624_v21 = vsub.f32 %v4322_v10, %v1607_v5 }
 0x51b   : > { %v1637_v28 = vmul.f32 1.442695, %v1624_v21 }
 0x51d   : > { %3251 = vpow2.f32 %v1637_v28 }
 0x51e   : > { %1611 = vperm.xlu2 %3120, %v4486_v8   ;;  %3253 = vpow2.f32 %v1573_v17  ;;  %v2307_v8 = vld [vmem:[%s3466_s26 + $0x10] sm:$0xff] }
 0x51f   : > { %v3133_v41 = vpack.i.bf16 %v2307_v8, %v2308_v60  ;;  %v2199_v17 = vld [vmem:[#allocation3 + $0xf0] sm:$0xff]  ;;  %v1672_v60 = vsel %vm489_vm1, %v4617_v23, 0.0 }
 0x520   : > { %v2161_v31 = vpop.permute.xlu0 %2160 }
 0x521   : > { %v2174_v58 = vsub.f32 %v4256_v46, %v2161_v31  ;;  %v1559_v46 = vsub.f32 %v4411_v49, %v4414_v3 }
 0x523   : > { %v4626_v44 = vpop.eup %3251  ;;  %v2188_v62 = vmul.f32 1.442695, %v2174_v58  ;;  %v1571_v29 = vmul.f32 1.442695, %v1559_v46  ;;  %v1647_v46 = vld [vmem:[#allocation3 + $0x98] sm:$0xff] }
 0x524   : > { %2998 = vmatmul.msk.f32.gmra.mxu3 %vm489_vm1, %v4626_v44  ;;  %v4630_v16 = vpop.eup %3253 }
 0x525   : > { %3255 = vpow2.f32 %v2188_v62 }
 0x526   : > { %1735 = vperm.xlu2 %3120, %v4630_v16   ;;  %3257 = vpow2.f32 %v1571_v29 }
 0x528   : > { %v4650_v3 = vpop.permute.xlu0 %1740 }
 0x52b   : > { %v4633_v10 = vpop.eup %3255 }
 0x52c   : > { %v2227_v63 = vsel %vm489_vm1, %v4633_v10, 0.0  ;;  %v4645_v19 = vpop.eup %3257 }
 0x52d   : > { %2228 = vadd.xlane.f32.xlu1 %v2227_v63 }
 0x52e   : > { %2165 = vperm.xlu2 %3120, %v4517_v1  }
 0x530   : > { %v4655_v55 = vpop.permute.xlu0 %3129 }
 0x536   : > { %2259 = vperm.xlu2 %3120, %v4508_v36   ;;  %v1562_v36 = vsub.f32 %v4422_v50, %v4425_v2  ;;  %v1644_v50 = vld [vmem:[#allocation3 + $0x80] sm:$0xff] }
 0x537   : > { %v1652_v45 = vmul.f32 %v4535_v6, %v1644_v50 }
 0x538   : > { %v1577_v49 = vmul.f32 1.442695, %v1562_v36  ;;  %v4661_v52 = vpop.permute.xlu0 %3139 }
 0x53a   : > { %3259 = vpow2.f32 %v1577_v49 }
 0x53b   : > { %3261 = vpow2.f32 %v2122_v15 }
 0x53c   : > { %1670 = vadd.xlane.f32.xlu0 %v1669_v33 }
 0x53e   : > { %3134 = vrot.lane.b32.xlu2 %v3133_v41, %s3361_s28 }
 0x540   : > { %v4653_v37 = vpop.eup %3259 }
 0x546   : > { %1730 = vperm.xlu1 %3122, %v4645_v19  }
 0x54e   : > { %1616 = vperm.xlu1 %3122, %v4425_v2   ;;  %v1663_v2 = vsel %vm489_vm1, %v4592_v53, 0.0 }
 0x556   : > { %1745 = vperm.xlu1 %3122, %v4653_v37  }
 0x55e   : > { %3124 = vrot.lane.b32.xlu1 %v3123_v56, %s3361_s28 }
 0x566   : > { %2264 = vperm.xlu1 %3122, %v4458_v27   ;;  %v3262_v27 = vpop.eup %3261 }
 0x567   : > { %1664 = vadd.xlane.f32.xlu2 %v1663_v2  ;;  %v2206_v25 = vmul.f32 %v3262_v27, %v2198_v4 }
 0x569   : > { %v1662_v48 = vpop.xlane.xlu0 %1661 }
 0x56a   : > { %v1684_v59 = vadd.f32 %v1662_v48, %v1652_v45  ;;  %v1645_v45 = vld [vmem:[#allocation3 + $0x88] sm:$0xff] }
 0x56c   : > { %1692 = vst.msk [vmem:[#allocation3 + $0x80] sm:$0xff] %vm293_vm2, %v1684_v59  ;;  %v3132_v59 = vunpack.i.h.bf16 %v4655_v55 }
 0x56e   : > { %2279 = vperm.xlu1 %3122, %v4589_v0   ;;  %v1666_v0 = vsel %vm489_vm1, %v4599_v14, 0.0  ;;  %v1655_v14 = vmul.f32 %v4552_v57, %v1647_v46 }
 0x579   : > { %v2226_v53 = vpop.xlane.xlu2 %2225 }
 0x57a   : > { %v2238_v5 = vadd.f32 %v2226_v53, %v2206_v25  ;;  %v3141_v53 = vunpack.i.l.bf16 %v4661_v52 }
 0x57c   : > { %2246 = vst.msk [vmem:[#allocation3 + $0xe8] sm:$0xff] %vm293_vm2, %v2238_v5  ;;  %v4682_v28 = vpop.permute.xlu0 %2274 }
 0x57f   : > { %2269 = vperm.xlu2 %3120, %v4530_v30   ;;  %v2207_v30 = vmul.f32 %v4614_v22, %v2199_v17 }
 0x581   : > { %v1612_v42 = vpop.permute.xlu2 %1611 }
 0x582   : > { %v1625_v61 = vsub.f32 %v4328_v40, %v1612_v42  ;;  %v2111_v40 = vsub.f32 %v4514_v43, %v4517_v1 }
 0x584   : > { %v1639_v6 = vmul.f32 1.442695, %v1625_v61  ;;  %v2126_v62 = vmul.f32 1.442695, %v2111_v40  ;;  %v4688_v63 = vpop.permute.xlu0 %2289 }
 0x586   : > { %3263 = vpow2.f32 %v1639_v6 }
 0x587   : > { %2284 = vperm.xlu2 %3120, %v3262_v27   ;;  %3265 = vpow2.f32 %v2126_v62  ;;  %v1653_v27 = vmul.f32 %v4445_v32, %v1645_v45  ;;  %v4988_v32 = vld [vmem:[#allocation5_spill] sm:$0xff] }
 0x589   : > { %v4697_v43 = vpop.permute.xlu2 %1735 }
 0x58c   : > { %v4676_v21 = vpop.eup %3263 }
 0x58d   : > { %2999 = vmatmul.msk.f32.gmra.mxu3 %vm489_vm1, %v4676_v21  ;;  %v4693_v41 = vpop.eup %3265  ;;  %v1678_v46 = vsel %vm489_vm1, %v4676_v21, 0.0  ;;  %v2474_v21 = vld [vmem:[#allocation3 + $0x20] sm:$0xff] }
 0x591   : > { %v2166_v29 = vpop.permute.xlu2 %2165 }
 0x592   : > { %v2175_v2 = vsub.f32 %v4416_v18, %v2166_v29 }
 0x594   : > { %v2190_v48 = vmul.f32 1.442695, %v2175_v2 }
 0x598   : > { %1667 = vadd.xlane.f32.xlu1 %v1666_v0 }
 0x599   : > { %v4702_v49 = vpop.permute.xlu2 %2259 }
 0x5a0   : > { %v2229_v31 = vpop.xlane.xlu1 %2228 }
 0x5a1   : > { %v2239_v58 = vadd.f32 %v2229_v31, %v2207_v30  ;;  %v3135_v56 = vpop.permute.xlu2 %3134 }
 0x5a2   : > { %v3136_v15 = vunpack.i.l.bf16 %v3135_v56  ;;  %v3137_v25 = vunpack.i.h.bf16 %v3135_v56 }
 0x5a3   : > { %2247 = vst.msk [vmem:[#allocation3 + $0xf0] sm:$0xff] %vm293_vm2, %v2239_v58 }
 0x5af   : > { %v1671_v8 = vpop.xlane.xlu0 %1670 }
 0x5b0   : > { %v1687_v22 = vadd.f32 %v1671_v8, %v1655_v14  ;;  %1673 = vadd.xlane.f32.xlu2 %v1672_v60  ;;  %v2470_v8 = vld [vmem:[#allocation3] sm:$0xff]  ;;  %v2472_v60 = vld [vmem:[#allocation3 + $0x10] sm:$0xff] }
 0x5b1   : > { %2294 = vperm.xlu1 %3122, %v4693_v41  }
 0x5b2   : > { %1695 = vst.msk [vmem:[#allocation3 + $0x98] sm:$0xff] %vm293_vm2, %v1687_v22  ;;  %v2471_v22 = vld [vmem:[#allocation3 + $0x8] sm:$0xff] }
 0x5b8   : > { %v4699_v1 = vpop.permute.xlu1 %1730 }
 0x5c0   : > { %v1617_v33 = vpop.permute.xlu1 %1616 }
 0x5c1   : > { %v1626_v57 = vsub.f32 %v4334_v13, %v1617_v33  ;;  %v3131_v13 = vunpack.i.l.bf16 %v4655_v55  ;;  %v3142_v55 = vunpack.i.h.bf16 %v4661_v52 }
 0x5c3   : > { %v1641_v36 = vmul.f32 1.442695, %v1626_v57 }
 0x5c5   : > { %3267 = vpow2.f32 %v1641_v36 }
 0x5c6   : > { %3269 = vpow2.f32 %v2190_v48  ;;  %v2552_v48 = vld [vmem:[#allocation3 + $0x50] sm:$0xff] }
 0x5c7   : > { %3271 = vrcp.f32 %v2470_v8 }
 0x5c8   : > { %v4704_v23 = vpop.permute.xlu1 %1745  ;;  %3273 = vrcp.f32 %v2472_v60 }
 0x5c9   : > { %3275 = vrcp.f32 %v2471_v22 }
 0x5cb   : > { %v4706_v38 = vpop.eup %3267 }
 0x5cc   : > { %3000 = vmatmul.msk.f32.gmra.mxu3 %vm489_vm1, %v4706_v38  ;;  %v4717_v5 = vpop.eup %3269  ;;  %v1681_v62 = vsel %vm489_vm1, %v4706_v38, 0.0  ;;  %v1837_v38 = vpop.f32.mrf.mxu3 }
 0x5cd   : > { %v3272_v33 = vpop.eup %3271 }
 0x5ce   : > { %v3274_v57 = vpop.eup %3273 }
 0x5cf   : > { %v3276_v36 = vpop.eup %3275 }
 0x5d0   : > { %v3125_v7 = vpop.permute.xlu1 %3124 }
 0x5d1   : > { %v3126_v50 = vunpack.i.l.bf16 %v3125_v7  ;;  %v3127_v47 = vunpack.i.h.bf16 %v3125_v7  ;;  %v2476_v7 = vld [vmem:[#allocation3 + $0x30] sm:$0xff] }
 0x5d3   : > { %2377 = vmatpush.msrb.mxu2 %v3126_v50  ;;  %3039 = vmatpush.msra.mxu3 %v3126_v50  ;;  %v2477_v50 = vld [vmem:[#allocation3 + $0x38] sm:$0xff] }
 0x5d4   : > { %v4760_v45 = vpop.f32.mrf.mxu3 }
 0x5d5   : > { %2378 = vmatpush.msrb.mxu2 %v3127_v47  ;;  %3040 = vmatpush.msra.mxu3 %v3127_v47  ;;  %v2551_v47 = vld [vmem:[#allocation3 + $0x48] sm:$0xff] }
 0x5d7   : > { %2379 = vmatpush.msrb.mxu2 %v3131_v13  ;;  %3041 = vmatpush.msra.mxu3 %v3131_v13 }
 0x5d8   : > { %v4727_v42 = vpop.permute.xlu1 %2264 }
 0x5d9   : > { %2380 = vmatpush.msrb.mxu2 %v3132_v59  ;;  %3042 = vmatpush.msra.mxu3 %v3132_v59 }
 0x5da   : > { %v1665_v4 = vpop.xlane.xlu2 %1664 }
 0x5db   : > { %v1685_v18 = vadd.f32 %v1665_v4, %v1653_v27  ;;  %2381 = vmatpush.msrb.mxu2 %v3136_v15  ;;  %3043 = vmatpush.msra.mxu3 %v3136_v15  ;;  %v2554_v15 = vld [vmem:[#allocation3 + $0x60] sm:$0xff] }
 0x5dc   : > { %v1843_v4 = vpop.f32.mrf.mxu3 }
 0x5dd   : > { %1693 = vst.msk [vmem:[#allocation3 + $0x88] sm:$0xff] %vm293_vm2, %v1685_v18  ;;  %2382 = vmatpush.msrb.mxu2 %v3137_v25  ;;  %3044 = vmatpush.msra.mxu3 %v3137_v25  ;;  %v2555_v18 = vld [vmem:[#allocation3 + $0x68] sm:$0xff] }
 0x5df   : > { %2383 = vmatpush.msrb.mxu2 %v3141_v53  ;;  %3045 = vmatpush.msra.mxu3 %v3141_v53  ;;  %v2557_v53 = vld [vmem:[#allocation3 + $0x78] sm:$0xff] }
 0x5e0   : > { %v4733_v52 = vpop.permute.xlu1 %2279 }
 0x5e1   : > { %2384 = vmatpush.msrb.mxu2 %v3142_v55  ;;  %3046 = vmatpush.msra.mxu3 %v3142_v55 }
 0x5e2   : > { %3017 = vmatmul.msk.f32.vlgmr.msrb.gmra.mxu2 %vm489_vm1, %v4406_v26  ;;  %3024 = vmatmul.msk.f32.vlgmr.msra.gmra.mxu3 %vm489_vm1, %v4717_v5  ;;  %v1646_v26 = vld [vmem:[#allocation3 + $0x90] sm:$0xff] }
 0x5e3   : > { %v1654_v61 = vmul.f32 %v4495_v34, %v1646_v26  ;;  %v2630_v26 = vld [vmem:[#allocation3 + $0x80] sm:$0xff] }
 0x5ea   : > { %3018 = vmatmul.msk.f32.gmra.mxu2 %vm489_vm1, %v4988_v32  ;;  %v1846_v32 = vpop.f32.mrf.mxu3 }
 0x5f2   : > { %3019 = vmatmul.msk.f32.gmra.mxu2 %vm489_vm1, %v4435_v54  ;;  %v4739_v54 = vpop.permute.xlu2 %2269 }
 0x5fa   : > { %3020 = vmatmul.msk.f32.gmra.mxu2 %vm489_vm1, %v4503_v35  ;;  %v4743_v35 = vpop.permute.xlu2 %2284 }
 0x602   : > { %3021 = vmatmul.msk.f32.gmra.mxu2 %vm489_vm1, %v4541_v39  ;;  %v1648_v39 = vld [vmem:[#allocation3 + $0xa0] sm:$0xff] }
 0x603   : > { %v1656_v17 = vmul.f32 %v4645_v19, %v1648_v39  ;;  %v1675_v19 = vsel %vm489_vm1, %v4626_v44, 0.0  ;;  %v2473_v44 = vld [vmem:[#allocation3 + $0x18] sm:$0xff] }
 0x604   : > { %3277 = vrcp.f32 %v2473_v44  ;;  %v2633_v39 = vld [vmem:[#allocation3 + $0x98] sm:$0xff]  ;;  %v2556_v44 = vld [vmem:[#allocation3 + $0x70] sm:$0xff] }
 0x605   : > { %3279 = vrcp.f32 %v2474_v21 }
 0x606   : > { %3281 = vrcp.f32 %v2476_v7 }
 0x607   : > { %3283 = vrcp.f32 %v2477_v50 }
 0x608   : > { %3285 = vrcp.f32 %v2551_v47 }
 0x609   : > { %3287 = vrcp.f32 %v2552_v48 }
 0x60a   : > { %3022 = vmatmul.msk.f32.gmra.mxu2 %vm489_vm1, %v4603_v11  ;;  %v3278_v56 = vpop.eup %3277  ;;  %3289 = vrcp.f32 %v2554_v15  ;;  %v2631_v15 = vld [vmem:[#allocation3 + $0x88] sm:$0xff] }
 0x60b   : > { %v1668_v6 = vpop.xlane.xlu1 %1667  ;;  %v3280_v2 = vpop.eup %3279  ;;  %3291 = vrcp.f32 %v2555_v18 }
 0x60c   : > { %v1686_v0 = vadd.f32 %v1668_v6, %v1654_v61  ;;  %v3282_v13 = vpop.eup %3281  ;;  %3293 = vrcp.f32 %v2557_v53 }
 0x60d   : > { %v3284_v59 = vpop.eup %3283  ;;  %3295 = vrcp.f32 %v2630_v26 }
 0x60e   : > { %1694 = vst.msk [vmem:[#allocation3 + $0x90] sm:$0xff] %vm293_vm2, %v1686_v0  ;;  %v3286_v27 = vpop.eup %3285  ;;  %v2230_v0 = vsel %vm489_vm1, %v4717_v5, 0.0  ;;  %3297 = vrcp.f32 %v2633_v39 }
 0x60f   : > { %v3288_v25 = vpop.eup %3287 }
 0x610   : > { %v3290_v55 = vpop.eup %3289 }
 0x611   : > { %v3292_v61 = vpop.eup %3291 }
 0x612   : > { %3023 = vmatmul.msk.f32.gmra.mxu2 %vm489_vm1, %v4633_v10  ;;  %v3294_v6 = vpop.eup %3293 }
 0x623   : > { %v1674_v30 = vpop.xlane.xlu2 %1673 }
 0x624   : > { %v1688_v31 = vadd.f32 %v1674_v30, %v1656_v17  ;;  %v3296_v17 = vpop.eup %3295  ;;  %v1849_v30 = vpop.f32.mrf.mxu3 }
 0x626   : > { %1696 = vst.msk [vmem:[#allocation3 + $0xa0] sm:$0xff] %vm293_vm2, %v1688_v31  ;;  %v3298_v31 = vpop.eup %3297 }
 0x665   : > { %v2386_v11 = vpop.f32.mrf.mxu2 }
 0x666   : > { %2418 = vrot.lane.b32.xlu2 %v2386_v11, %s3366_s30  ;;  %v4765_v11 = vpop.f32.mrf.mxu3 }
 0x66d   : > { %v2389_v34 = vpop.f32.mrf.mxu2 }
 0x66e   : > { %2420 = vrot.lane.b32.xlu0 %v2389_v34, %s3366_s30  ;;  %v2632_v34 = vld [vmem:[#allocation3 + $0x90] sm:$0xff]  ;;  %v1855_v5 = vpop.f32.mrf.mxu3 }
 0x66f   : > { %3299 = vrcp.f32 %v2632_v34  ;;  %v2716_v34 = vld [vmem:[#allocation3 + $0xf0] sm:$0xff] }
 0x675   : > { %v2392_v58 = vpop.f32.mrf.mxu2 }
 0x676   : > { %2422 = vrot.lane.b32.xlu1 %v2392_v58, %s3366_s30  ;;  %v2475_v58 = vld [vmem:[#allocation3 + $0x28] sm:$0xff] }
 0x677   : > { %3301 = vrcp.f32 %v2475_v58 }
 0x67d   : > { %v2395_v10 = vpop.f32.mrf.mxu2 }
 0x67e   : > { %2424 = vrot.lane.b32.xlu2 %v2395_v10, %s3366_s30  ;;  %v3300_v10 = vpop.eup %3299 }
 0x685   : > { %v2398_v40 = vpop.f32.mrf.mxu2 }
 0x686   : > { %2426 = vrot.lane.b32.xlu0 %v2398_v40, %s3366_s30  ;;  %v2550_v40 = vld [vmem:[#allocation3 + $0x40] sm:$0xff] }
 0x687   : > { %3303 = vrcp.f32 %v2550_v40 }
 0x68d   : > { %v2401_v14 = vpop.f32.mrf.mxu2 }
 0x695   : > { %v2404_v29 = vpop.f32.mrf.mxu2 }
 0x6a0   : > { %1676 = vadd.xlane.f32.xlu1 %v1675_v19  ;;  %v3302_v19 = vpop.eup %3301 }
 0x6a1   : > { %v3304_v8 = vpop.eup %3303 }
 0x6a7   : > { %1682 = vadd.xlane.f32.xlu2 %v1681_v62  ;;  %v4769_v62 = vpop.permute.xlu1 %2294 }
 0x6b0   : > { %1679 = vadd.xlane.f32.xlu0 %v1678_v46  ;;  %v1858_v46 = vpop.f32.mrf.mxu3 }
 0x6b9   : > { %2428 = vrot.lane.b32.xlu1 %v2401_v14, %s3366_s30  ;;  %v2553_v14 = vld [vmem:[#allocation3 + $0x58] sm:$0xff] }
 0x6ba   : > { %3305 = vrcp.f32 %v2553_v14 }
 0x6bb   : > { %3307 = vrcp.f32 %v2556_v44 }
 0x6bf   : > { %2430 = vrot.lane.b32.xlu2 %v2404_v29, %s3366_s30  ;;  %v1649_v29 = vld [vmem:[#allocation3 + $0xa8] sm:$0xff] }
 0x6c0   : > { %v4773_v60 = vpop.permute.xlu2 %2418  ;;  %v1657_v21 = vmul.f32 %v4630_v16, %v1649_v29  ;;  %v1650_v16 = vld [vmem:[#allocation3 + $0xb0] sm:$0xff] }
 0x6c1   : > { %2496 = vperm.xlu1 %3122, %v3272_v33   ;;  %v3306_v33 = vpop.eup %3305 }
 0x6c2   : > { %v3308_v50 = vpop.eup %3307 }
 0x6c4   : > { %2506 = vperm.xlu0 %3121, %v3274_v57  }
 0x6c7   : > { %2501 = vperm.xlu2 %3120, %v3276_v36  }
 0x6c9   : > { %2511 = vperm.xlu1 %3122, %v3278_v56   ;;  %v1651_v56 = vld [vmem:[#allocation3 + $0xb8] sm:$0xff] }
 0x6cf   : > { %2516 = vperm.xlu2 %3120, %v3280_v2   ;;  %v1659_v2 = vmul.f32 %v4653_v37, %v1651_v56  ;;  %v2710_v37 = vld [vmem:[#allocation3 + $0xc0] sm:$0xff]  ;;  %v2715_v56 = vld [vmem:[#allocation3 + $0xe8] sm:$0xff] }
 0x6d1   : > { %2526 = vperm.xlu1 %3122, %v3282_v13  }
 0x6d7   : > { %2531 = vperm.xlu2 %3120, %v3284_v59  }
 0x6d8   : > { %v4778_v57 = vpop.permute.xlu2 %2424 }
 0x6d9   : > { %2581 = vperm.xlu1 %3122, %v3286_v27  }
 0x6df   : > { %2586 = vperm.xlu2 %3120, %v3288_v25  }
 0x6e0   : > { %v4781_v36 = vpop.permute.xlu0 %2420 }
 0x6e1   : > { %2596 = vperm.xlu1 %3122, %v3290_v55   ;;  %v2634_v55 = vld [vmem:[#allocation3 + $0xa0] sm:$0xff] }
 0x6e7   : > { %2601 = vperm.xlu2 %3120, %v3292_v61   ;;  %v2713_v61 = vld [vmem:[#allocation3 + $0xd8] sm:$0xff] }
 0x6e8   : > { %v4775_v22 = vpop.permute.xlu1 %2422 }
 0x6e9   : > { %2611 = vperm.xlu1 %3122, %v3294_v6  }
 0x6ee   : > { %2231 = vadd.xlane.f32.xlu0 %v2230_v0 }
 0x6ef   : > { %2656 = vperm.xlu2 %3120, %v3296_v17   ;;  %v2711_v17 = vld [vmem:[#allocation3 + $0xc8] sm:$0xff] }
 0x6f1   : > { %1869 = vrot.lane.b32.xlu1 %v1837_v38, %s3367_s4 }
 0x6f7   : > { %2671 = vperm.xlu2 %3120, %v3298_v31  }
 0x6f8   : > { %v4785_v13 = vpop.permute.xlu0 %2426 }
 0x6f9   : > { %1873 = vrot.lane.b32.xlu1 %v1843_v4, %s3367_s4  ;;  %v1658_v4 = vmul.f32 %v4561_v51, %v1650_v16 }
 0x6ff   : > { %1877 = vrot.lane.b32.xlu2 %v1849_v30, %s3367_s4 }
 0x701   : > { %2666 = vperm.xlu1 %3122, %v3300_v10  }
 0x702   : > { %2521 = vperm.xlu0 %3121, %v3302_v19  }
 0x707   : > { %1883 = vrot.lane.b32.xlu2 %v1858_v46, %s3367_s4  ;;  %v2714_v46 = vld [vmem:[#allocation3 + $0xe0] sm:$0xff] }
 0x709   : > { %1875 = vrot.lane.b32.xlu1 %v1846_v32, %s3367_s4 }
 0x70a   : > { %2576 = vperm.xlu0 %3121, %v3304_v8  }
 0x711   : > { %1881 = vrot.lane.b32.xlu1 %v1855_v5, %s3367_s4 }
 0x712   : > { %2591 = vperm.xlu0 %3121, %v3306_v33  }
 0x713   : > { %v1677_v38 = vpop.xlane.xlu1 %1676 }
 0x714   : > { %v1689_v7 = vadd.f32 %v1677_v38, %v1657_v21  ;;  %v2407_v21 = vpop.f32.mrf.mxu3 }
 0x716   : > { %1697 = vst.msk [vmem:[#allocation3 + $0xa8] sm:$0xff] %vm293_vm2, %v1689_v7 }
 0x71a   : > { %v1683_v47 = vpop.xlane.xlu2 %1682  ;;  %2606 = vperm.xlu0 %3121, %v3308_v50  }
 0x71b   : > { %v1691_v48 = vadd.f32 %v1683_v47, %v1659_v2 }
 0x71d   : > { %1699 = vst.msk [vmem:[#allocation3 + $0xb8] sm:$0xff] %vm293_vm2, %v1691_v48  ;;  %v2635_v59 = vld [vmem:[#allocation3 + $0xa8] sm:$0xff] }
 0x71e   : > { %3309 = vrcp.f32 %v2635_v59 }
 0x71f   : > { %3311 = vrcp.f32 %v2631_v15 }
 0x720   : > { %3313 = vrcp.f32 %v2710_v37 }
 0x721   : > { %3315 = vrcp.f32 %v2634_v55 }
 0x722   : > { %1871 = vrot.lane.b32.xlu0 %v4760_v45, %s3367_s4  ;;  %v4790_v27 = vpop.permute.xlu2 %2430  ;;  %3317 = vrcp.f32 %v2713_v61 }
 0x723   : > { %v1680_v18 = vpop.xlane.xlu0 %1679 }
 0x724   : > { %v3310_v25 = vpop.eup %3309  ;;  %v1690_v53 = vadd.f32 %v1680_v18, %v1658_v4  ;;  %v2637_v5 = vld [vmem:[#allocation3 + $0xb8] sm:$0xff]  ;;  %v1704_v18 = vld [vmem:[#allocation4 + $0x20] sm:$0xff] }
 0x725   : > { %2681 = vperm.xlu1 %3122, %v3310_v25   ;;  %v3312_v32 = vpop.eup %3311  ;;  %v2200_v4 = vld [vmem:[#allocation3 + $0xf8] sm:$0xff]  ;;  %v1700_v25 = vld [vmem:[#allocation4] sm:$0xff] }
 0x726   : > { %1698 = vst.msk [vmem:[#allocation3 + $0xb0] sm:$0xff] %vm293_vm2, %v1690_v53  ;;  %v3314_v6 = vpop.eup %3313  ;;  %v2208_v37 = vmul.f32 %v4693_v41, %v2200_v4  ;;  %v1752_v53 = vmul.f32 %v4699_v1, %v1704_v18  ;;  %v1707_v41 = vld [vmem:[#allocation4 + $0x38] sm:$0xff] }
 0x727   : > { %v3316_v0 = vpop.eup %3315 }
 0x728   : > { %v3318_v30 = vpop.eup %3317 }
 0x72a   : > { %2661 = vperm.xlu0 %3121, %v3312_v32   ;;  %v4794_v26 = vpop.permute.xlu2 %2501  ;;  %v1748_v32 = vmul.f32 %v4582_v12, %v1700_v25 }
 0x72b   : > { %v4796_v45 = vpop.permute.xlu1 %2428 }
 0x72d   : > { %2736 = vperm.xlu1 %3122, %v3314_v6   ;;  %v2636_v51 = vld [vmem:[#allocation3 + $0xb0] sm:$0xff] }
 0x72e   : > { %3319 = vrcp.f32 %v2636_v51 }
 0x72f   : > { %3321 = vrcp.f32 %v2711_v17 }
 0x730   : > { %3323 = vrcp.f32 %v2716_v34  ;;  %v1755_v34 = vmul.f32 %v4704_v23, %v1707_v41 }
 0x731   : > { %3325 = vrcp.f32 %v2637_v5 }
 0x732   : > { %2676 = vperm.xlu0 %3121, %v3316_v0   ;;  %v4798_v39 = vpop.permute.xlu2 %2516  ;;  %3327 = vrcp.f32 %v2714_v46 }
 0x733   : > { %v4800_v31 = vpop.permute.xlu1 %2496 }
 0x734   : > { %v3320_v58 = vpop.eup %3319 }
 0x735   : > { %2751 = vperm.xlu1 %3122, %v3318_v30   ;;  %2686 = vperm.xlu2 %3120, %v3320_v58   ;;  %v3322_v40 = vpop.eup %3321  ;;  %v1702_v30 = vld [vmem:[#allocation4 + $0x10] sm:$0xff] }
 0x736   : > { %v3324_v14 = vpop.eup %3323  ;;  %v4819_v59 = vpop.permute.xlu0 %2506  ;;  %v1750_v58 = vmul.f32 %v4671_v9, %v1702_v30 }
 0x737   : > { %v3326_v8 = vpop.eup %3325 }
 0x738   : > { %v3328_v33 = vpop.eup %3327 }
 0x73a   : > { %1879 = vrot.lane.b32.xlu0 %v4765_v11, %s3367_s4  ;;  %v4804_v10 = vpop.permute.xlu2 %2531  ;;  %v2712_v11 = vld [vmem:[#allocation3 + $0xd0] sm:$0xff] }
 0x73b   : > { %v4806_v19 = vpop.permute.xlu1 %2511  ;;  %3329 = vrcp.f32 %v2712_v11 }
 0x73c   : > { %3331 = vrcp.f32 %v2715_v56 }
 0x73d   : > { %2766 = vperm.xlu1 %3122, %v3324_v14   ;;  %2741 = vperm.xlu2 %3120, %v3322_v40  }
 0x741   : > { %v3330_v50 = vpop.eup %3329 }
 0x742   : > { %2691 = vperm.xlu0 %3121, %v3326_v8   ;;  %v4808_v29 = vpop.permute.xlu2 %2586  ;;  %v3332_v48 = vpop.eup %3331 }
 0x743   : > { %v4810_v44 = vpop.permute.xlu1 %2526 }
 0x745   : > { %2756 = vperm.xlu2 %3120, %v3328_v33  }
 0x74a   : > { %2432 = vrot.lane.b32.xlu0 %v2407_v21, %s3366_s30  ;;  %v4813_v38 = vpop.permute.xlu2 %2601 }
 0x74b   : > { %v4815_v7 = vpop.permute.xlu1 %2581 }
 0x752   : > { %2746 = vperm.xlu0 %3121, %v3330_v50   ;;  %v4817_v2 = vpop.permute.xlu2 %2656 }
 0x753   : > { %v2597_v47 = vpop.permute.xlu1 %2596 }
 0x75a   : > { %2761 = vperm.xlu0 %3121, %v3332_v48   ;;  %v4821_v16 = vpop.permute.xlu2 %2671 }
 0x75b   : > { %v4823_v15 = vpop.permute.xlu1 %2611 }
 0x761   : > { %v2232_v55 = vpop.xlane.xlu0 %2231 }
 0x762   : > { %v2240_v61 = vadd.f32 %v2232_v55, %v2208_v37  ;;  %v1878_v6 = vpop.permute.xlu2 %1877 }
 0x763   : > { %v1897_v51 = vadd.f32 %v1878_v6, %v1752_v53  ;;  %v1870_v0 = vpop.permute.xlu1 %1869 }
 0x764   : > { %2248 = vst.msk [vmem:[#allocation3 + $0xf8] sm:$0xff] %vm293_vm2, %v2240_v61  ;;  %v1893_v17 = vadd.f32 %v1870_v0, %v1748_v32 }
 0x765   : > { %1906 = vst.msk [vmem:[#allocation4 + $0x20] sm:$0xff] %vm1901_vm5, %v1897_v51 }
 0x766   : > { %1902 = vst.msk [vmem:[#allocation4] sm:$0xff] %vm1901_vm5, %v1893_v17 }
 0x76a   : > { %v1884_v1 = vpop.permute.xlu2 %1883 }
 0x76b   : > { %v1900_v12 = vadd.f32 %v1884_v1, %v1755_v34  ;;  %v1874_v5 = vpop.permute.xlu1 %1873  ;;  %v2717_v40 = vld [vmem:[#allocation3 + $0xf8] sm:$0xff] }
 0x76c   : > { %v2253_v46 = vld [vmem:[#allocation4 + $0x20] sm:$0xff]  ;;  %v1895_v14 = vadd.f32 %v1874_v5, %v1750_v58  ;;  %3333 = vrcp.f32 %v2717_v40  ;;  %v1701_v5 = vld [vmem:[#allocation4 + $0x8] sm:$0xff] }
 0x76d   : > { %v2301_v8 = vmul.f32 %v4733_v52, %v2253_v46  ;;  %v2249_v33 = vld [vmem:[#allocation4] sm:$0xff]  ;;  %1909 = vst.msk [vmem:[#allocation4 + $0x38] sm:$0xff] %vm1901_vm5, %v1900_v12  ;;  %v1749_v46 = vmul.f32 %v4585_v20, %v1701_v5 }
 0x76e   : > { %v2297_v11 = vmul.f32 %v4702_v49, %v2249_v33  ;;  %1904 = vst.msk [vmem:[#allocation4 + $0x10] sm:$0xff] %vm1901_vm5, %v1895_v14 }
 0x76f   : > { %v2446_v23 = vadd.f32 %v4785_v13, %v2301_v8  ;;  %v1703_v13 = vld [vmem:[#allocation4 + $0x18] sm:$0xff] }
 0x770   : > { %v2442_v9 = vadd.f32 %v4773_v60, %v2297_v11  ;;  %v1751_v18 = vmul.f32 %v4612_v24, %v1703_v13 }
 0x771   : > { %2455 = vst.msk [vmem:[#allocation4 + $0x20] sm:$0xff] %vm2450_vm6, %v2446_v23 }
 0x772   : > { %v3334_v21 = vpop.eup %3333  ;;  %2451 = vst.msk [vmem:[#allocation4] sm:$0xff] %vm2450_vm6, %v2442_v9 }
 0x773   : > { %v2667_v56 = vpop.permute.xlu1 %2666  ;;  %2771 = vperm.xlu2 %3120, %v3334_v21  }
 0x774   : > { %v4841_v52 = vpop.permute.xlu0 %2521 }
 0x775   : > { %v2251_v50 = vld [vmem:[#allocation4 + $0x10] sm:$0xff] }
 0x776   : > { %v2299_v48 = vmul.f32 %v4739_v54, %v2251_v50 }
 0x778   : > { %v2444_v49 = vadd.f32 %v4775_v22, %v2299_v48  ;;  %v4851_v60 = vld [vmem:[#allocation4 + $0x20] sm:$0xff] }
 0x779   : > { %v4853_v4 = vld [vmem:[#allocation4] sm:$0xff]  ;;  %v2538_v54 = vmul.f32 %v4851_v60, %v4798_v39  ;;  %v2618_v22 = vmul.f32 %v4851_v60, %v2597_v47  ;;  %v1706_v39 = vld [vmem:[#allocation4 + $0x30] sm:$0xff] }
 0x77a   : > { %2453 = vst.msk [vmem:[#allocation4 + $0x10] sm:$0xff] %vm2450_vm6, %v2444_v49  ;;  %v2534_v37 = vmul.f32 %v4800_v31, %v4853_v4  ;;  %v2694_v24 = vmul.f32 %v4817_v2, %v4853_v4  ;;  %v1754_v47 = vmul.f32 %v4650_v3, %v1706_v39 }
 0x77b   : > { %v1876_v25 = vpop.permute.xlu1 %1875  ;;  %2546 = vst.msk [vmem:[%s4849_s7 + $0x20] sm:$0xff] %vm391_vm0, %v2538_v54 }
 0x77c   : > { %v1896_v53 = vadd.f32 %v1876_v25, %v1751_v18  ;;  %v2577_v55 = vpop.permute.xlu0 %2576  ;;  %2542 = vst.msk [vmem:[%s4849_s7] sm:$0xff] %vm391_vm0, %v2534_v37 }
 0x77d   : > { %v2614_v32 = vmul.f32 %v2577_v55, %v4853_v4  ;;  %2626 = vst.msk [vmem:[%s4849_s7 + $0x20] sm:$0xff] %vm1352_vm4, %v2618_v22 }
 0x77e   : > { %1905 = vst.msk [vmem:[#allocation4 + $0x18] sm:$0xff] %vm1901_vm5, %v1896_v53 }
 0x77f   : > { %2622 = vst.msk [vmem:[%s4849_s7] sm:$0xff] %vm1352_vm4, %v2614_v32 }
 0x780   : > { %2702 = vst.msk [vmem:[%s4849_s7] sm:$0xff] %vm1901_vm5, %v2694_v24 }
 0x781   : > { %v4876_v31 = vld [vmem:[#allocation4 + $0x10] sm:$0xff] }
 0x782   : > { %v2536_v61 = vmul.f32 %v4819_v59, %v4876_v31  ;;  %v2616_v6 = vmul.f32 %v4808_v29, %v4876_v31  ;;  %v2696_v2 = vmul.f32 %v2667_v56, %v4876_v31 }
 0x783   : > { %v1882_v51 = vpop.permute.xlu1 %1881 }
 0x784   : > { %2544 = vst.msk [vmem:[%s4849_s7 + $0x10] sm:$0xff] %vm391_vm0, %v2536_v61  ;;  %v1899_v0 = vadd.f32 %v1882_v51, %v1754_v47  ;;  %v2592_v17 = vpop.permute.xlu0 %2591 }
 0x785   : > { %2624 = vst.msk [vmem:[%s4849_s7 + $0x10] sm:$0xff] %vm1352_vm4, %v2616_v6  ;;  %v2252_v30 = vld [vmem:[#allocation4 + $0x18] sm:$0xff] }
 0x786   : > { %2704 = vst.msk [vmem:[%s4849_s7 + $0x10] sm:$0xff] %vm1901_vm5, %v2696_v2  ;;  %v2300_v3 = vmul.f32 %v4682_v28, %v2252_v30 }
 0x787   : > { %1908 = vst.msk [vmem:[#allocation4 + $0x30] sm:$0xff] %vm1901_vm5, %v1899_v0 }
 0x788   : > { %v2445_v59 = vadd.f32 %v4778_v57, %v2300_v3 }
 0x78a   : > { %2454 = vst.msk [vmem:[#allocation4 + $0x18] sm:$0xff] %vm2450_vm6, %v2445_v59 }
 0x78c   : > { %v2607_v29 = vpop.permute.xlu0 %2606 }
 0x78e   : > { %v2255_v41 = vld [vmem:[#allocation4 + $0x30] sm:$0xff] }
 0x78f   : > { %v2303_v34 = vmul.f32 %v4688_v63, %v2255_v41  ;;  %v2687_v1 = vpop.permute.xlu2 %2686 }
 0x791   : > { %v2448_v58 = vadd.f32 %v4790_v27, %v2303_v34  ;;  %v2489_v12 = vld [vmem:[#allocation4 + $0x18] sm:$0xff] }
 0x792   : > { %v2537_v40 = vmul.f32 %v4806_v19, %v2489_v12  ;;  %v2617_v28 = vmul.f32 %v2592_v17, %v2489_v12  ;;  %v2697_v63 = vmul.f32 %v4821_v16, %v2489_v12 }
 0x793   : > { %2457 = vst.msk [vmem:[#allocation4 + $0x30] sm:$0xff] %vm2450_vm6, %v2448_v58 }
 0x794   : > { %2545 = vst.msk [vmem:[%s4849_s7 + $0x18] sm:$0xff] %vm391_vm0, %v2537_v40  ;;  %v1872_v57 = vpop.permute.xlu0 %1871 }
 0x795   : > { %2625 = vst.msk [vmem:[%s4849_s7 + $0x18] sm:$0xff] %vm1352_vm4, %v2617_v28  ;;  %v1894_v27 = vadd.f32 %v1872_v57, %v1749_v46 }
 0x796   : > { %2705 = vst.msk [vmem:[%s4849_s7 + $0x18] sm:$0xff] %vm1901_vm5, %v2697_v63 }
 0x797   : > { %1903 = vst.msk [vmem:[#allocation4 + $0x8] sm:$0xff] %vm1901_vm5, %v1894_v27  ;;  %v2682_v19 = vpop.permute.xlu1 %2681  ;;  %v2742_v14 = vpop.permute.xlu2 %2741 }
 0x79a   : > { %v2492_v20 = vld [vmem:[#allocation4 + $0x30] sm:$0xff] }
 0x79b   : > { %v2540_v8 = vmul.f32 %v4810_v44, %v2492_v20  ;;  %v2620_v33 = vmul.f32 %v2607_v29, %v2492_v20  ;;  %v2700_v23 = vmul.f32 %v2687_v1, %v2492_v20 }
 0x79c   : > { %v2662_v11 = vpop.permute.xlu0 %2661 }
 0x79d   : > { %2548 = vst.msk [vmem:[%s4849_s7 + $0x30] sm:$0xff] %vm391_vm0, %v2540_v8 }
 0x79e   : > { %2628 = vst.msk [vmem:[%s4849_s7 + $0x30] sm:$0xff] %vm1352_vm4, %v2620_v33  ;;  %v2250_v16 = vld [vmem:[#allocation4 + $0x8] sm:$0xff] }
 0x79f   : > { %2708 = vst.msk [vmem:[%s4849_s7 + $0x30] sm:$0xff] %vm1901_vm5, %v2700_v23  ;;  %v2298_v9 = vmul.f32 %v4727_v42, %v2250_v16  ;;  %v2737_v21 = vpop.permute.xlu1 %2736  ;;  %v2757_v50 = vpop.permute.xlu2 %2756 }
 0x7a0   : > { %v2774_v56 = vmul.f32 %v2737_v21, %v4853_v4  ;;  %v2778_v13 = vmul.f32 %v2757_v50, %v4851_v60  ;;  %v1705_v4 = vld [vmem:[#allocation4 + $0x28] sm:$0xff] }
 0x7a1   : > { %v2443_v44 = vadd.f32 %v4781_v36, %v2298_v9  ;;  %v1753_v22 = vmul.f32 %v4697_v43, %v1705_v4 }
 0x7a2   : > { %2782 = vst.msk [vmem:[%s4849_s7] sm:$0xff] %vm2450_vm6, %v2774_v56 }
 0x7a3   : > { %2452 = vst.msk [vmem:[#allocation4 + $0x8] sm:$0xff] %vm2450_vm6, %v2443_v44 }
 0x7a4   : > { %v2677_v48 = vpop.permute.xlu0 %2676 }
 0x7a5   : > { %v2698_v49 = vmul.f32 %v4851_v60, %v2677_v48 }
 0x7a7   : > { %2706 = vst.msk [vmem:[%s4849_s7 + $0x20] sm:$0xff] %vm1901_vm5, %v2698_v49  ;;  %v2752_v42 = vpop.permute.xlu1 %2751 }
 0x7a8   : > { %2786 = vst.msk [vmem:[%s4849_s7 + $0x20] sm:$0xff] %vm2450_vm6, %v2778_v13  ;;  %v2777_v36 = vmul.f32 %v2752_v42, %v2489_v12 }
 0x7aa   : > { %v2727_v54 = vld [vmem:[#allocation4 + $0x8] sm:$0xff]  ;;  %2785 = vst.msk [vmem:[%s4849_s7 + $0x18] sm:$0xff] %vm2450_vm6, %v2777_v36 }
 0x7ab   : > { %v2535_v18 = vmul.f32 %v2727_v54, %v4794_v26  ;;  %v2615_v60 = vmul.f32 %v2727_v54, %v4815_v7  ;;  %v2695_v25 = vmul.f32 %v2727_v54, %v2662_v11  ;;  %v2775_v55 = vmul.f32 %v2742_v14, %v2727_v54  ;;  %v2256_v7 = vld [vmem:[#allocation4 + $0x38] sm:$0xff] }
 0x7ac   : > { %v1880_v37 = vpop.permute.xlu0 %1879  ;;  %v2304_v61 = vmul.f32 %v4769_v62, %v2256_v7 }
 0x7ad   : > { %2543 = vst.msk [vmem:[%s4849_s7 + $0x8] sm:$0xff] %vm391_vm0, %v2535_v18  ;;  %v1898_v53 = vadd.f32 %v1880_v37, %v1753_v22 }
 0x7ae   : > { %2623 = vst.msk [vmem:[%s4849_s7 + $0x8] sm:$0xff] %vm1352_vm4, %v2615_v60 }
 0x7af   : > { %2703 = vst.msk [vmem:[%s4849_s7 + $0x8] sm:$0xff] %vm1901_vm5, %v2695_v25  ;;  %v2767_v32 = vpop.permute.xlu1 %2766 }
 0x7b0   : > { %2783 = vst.msk [vmem:[%s4849_s7 + $0x8] sm:$0xff] %vm2450_vm6, %v2775_v55  ;;  %v2780_v24 = vmul.f32 %v2767_v32, %v2492_v20 }
 0x7b1   : > { %1907 = vst.msk [vmem:[#allocation4 + $0x28] sm:$0xff] %vm1901_vm5, %v1898_v53 }
 0x7b2   : > { %2788 = vst.msk [vmem:[%s4849_s7 + $0x30] sm:$0xff] %vm2450_vm6, %v2780_v24 }
 0x7b4   : > { %v2692_v43 = vpop.permute.xlu0 %2691 }
 0x7b8   : > { %v2254_v26 = vld [vmem:[#allocation4 + $0x28] sm:$0xff] }
 0x7b9   : > { %v2302_v39 = vmul.f32 %v4743_v35, %v2254_v26 }
 0x7bb   : > { %v2447_v47 = vadd.f32 %v4796_v45, %v2302_v39 }
 0x7bc   : > { %v2433_v6 = vpop.permute.xlu0 %2432 }
 0x7bd   : > { %2456 = vst.msk [vmem:[#allocation4 + $0x28] sm:$0xff] %vm2450_vm6, %v2447_v47  ;;  %v2449_v51 = vadd.f32 %v2433_v6, %v2304_v61 }
 0x7bf   : > { %2458 = vst.msk [vmem:[#allocation4 + $0x38] sm:$0xff] %vm2450_vm6, %v2449_v51 }
 0x7c4   : > { %v2747_v2 = vpop.permute.xlu0 %2746  ;;  %v2491_v0 = vld [vmem:[#allocation4 + $0x28] sm:$0xff] }
 0x7c5   : > { %v2776_v17 = vmul.f32 %v2747_v2, %v4876_v31  ;;  %v2539_v35 = vmul.f32 %v4841_v52, %v2491_v0  ;;  %v2619_v45 = vmul.f32 %v4813_v38, %v2491_v0  ;;  %v2699_v3 = vmul.f32 %v2682_v19, %v2491_v0 }
 0x7c6   : > { %v2493_v62 = vld [vmem:[#allocation4 + $0x38] sm:$0xff] }
 0x7c7   : > { %2784 = vst.msk [vmem:[%s4849_s7 + $0x10] sm:$0xff] %vm2450_vm6, %v2776_v17  ;;  %v2541_v30 = vmul.f32 %v4804_v10, %v2493_v62  ;;  %v2621_v59 = vmul.f32 %v4823_v15, %v2493_v62  ;;  %v2701_v52 = vmul.f32 %v2692_v43, %v2493_v62 }
 0x7c8   : > { %2547 = vst.msk [vmem:[%s4849_s7 + $0x28] sm:$0xff] %vm391_vm0, %v2539_v35 }
 0x7c9   : > { %2627 = vst.msk [vmem:[%s4849_s7 + $0x28] sm:$0xff] %vm1352_vm4, %v2619_v45 }
 0x7ca   : > { %2707 = vst.msk [vmem:[%s4849_s7 + $0x28] sm:$0xff] %vm1901_vm5, %v2699_v3 }
 0x7cb   : > { %2549 = vst.msk [vmem:[%s4849_s7 + $0x38] sm:$0xff] %vm391_vm0, %v2541_v30 }
 0x7cc   : > { %v2762_v38 = vpop.permute.xlu0 %2761  ;;  %2629 = vst.msk [vmem:[%s4849_s7 + $0x38] sm:$0xff] %vm1352_vm4, %v2621_v59 }
 0x7cd   : > { %v2779_v31 = vmul.f32 %v2762_v38, %v2491_v0  ;;  %2709 = vst.msk [vmem:[%s4849_s7 + $0x38] sm:$0xff] %vm1901_vm5, %v2701_v52  ;;  %v2772_v29 = vpop.permute.xlu2 %2771 }
 0x7ce   : > { %v2781_v10 = vmul.f32 %v2772_v29, %v2493_v62 }
 0x7cf   : > { %2787 = vst.msk [vmem:[%s4849_s7 + $0x28] sm:$0xff] %vm2450_vm6, %v2779_v31 }
 0x7d0   : > { %2789 = vst.msk [vmem:[%s4849_s7 + $0x38] sm:$0xff] %vm2450_vm6, %v2781_v10 }
 0x7d1 PF: > { %s13_s14 = sadd.s32 1, %s3357_s14   ;;  %s4989_s12 = smov %s3353_s13 }
 0x7d2   : > { %p10_p5 = scmp.ge.s32.totalorder %s13_s14, 4   ;;  %s4990_s13 = smov %s4992_s15 }
 0x7d4   :  { %12 = sbr.rel (!%p10_p5) target bundleno = 2 (0x2), region = 82 }

</bundles_post_ra>
